<compile_context>
chip_gen: v7x
topology: tpu7x:2x2x1
jax: 0.10.0
libtpu: 0.0.40
codegen_flags: <defaults>
</compile_context>

<pallas_src>
import numpy as np

import jax
import jax.numpy as jnp
from jax.experimental import pallas as pl
from jax.experimental.pallas import tpu as pltpu


S0 = 40   # per-image row-slab height of the conv1 input (32 valid + 8 pad)
S1 = 20   # per-image row-slab height after pool1 / of the conv2 output
KS = 5    # conv kernel size


# ---------------------------------------------------------------------------
# Wrapper-side constant preprocessing (weight reshaping only, done once)
# ---------------------------------------------------------------------------
def _conv_tap_mats(w, w_in, w_out):
    """Banded per-vertical-tap matrices for a kxk conv in (H, W*C) layout.

    w: (Cout, Cin, k, k) ->  (k, w_in*Cin, w_out*Cout)  with
    M[ki, win*Cin+ci, wo*Cout+co] = w[co, ci, ki, win-wo]  for 0 <= win-wo < k.
    """
    c_out, c_in, k, _ = w.shape
    taps = []
    for ki in range(k):
        m = jnp.zeros((w_in * c_in, w_out * c_out), jnp.float32)
        for kj in range(k):
            sel = np.zeros((w_in, w_out), np.float32)
            sel[np.arange(w_out) + kj, np.arange(w_out)] = 1.0
            m = m + jnp.kron(jnp.asarray(sel), w[:, :, ki, kj].T)
        taps.append(m)
    return jnp.stack(taps, axis=0)


def _pool_col_mat(w, c):
    """Column half of an exact 2x2/stride-2 average pool in (H, W*C) layout."""
    wp = w // 2
    sw = np.zeros((w, wp), np.float32)
    sw[2 * np.arange(wp), np.arange(wp)] = 0.5
    sw[2 * np.arange(wp) + 1, np.arange(wp)] = 0.5
    return jnp.asarray(np.kron(sw, np.eye(c, dtype=np.float32)))


def _prepare_constants(params, tb):
    f32 = jnp.float32
    l1 = tb * S0 - 8          # rows of the conv1 output computed per tile
    l2 = tb * S1 - 8          # rows of the conv2 output computed per tile

    m1 = _conv_tap_mats(params["conv1_w"].astype(f32), 32, 28)   # (5, 32, 168)
    m2 = _conv_tap_mats(params["conv2_w"].astype(f32), 14, 10)   # (5, 84, 160)
    m3 = _conv_tap_mats(params["conv3_w"].astype(f32), 5, 1)     # (5, 80, 120)
    pw1 = _pool_col_mat(28, 6)                                   # (168, 84)
    pw2 = _pool_col_mat(10, 16)                                  # (160, 80)
    # Fold the column pools into the next conv's tap matrices.
    m2f = jnp.einsum("pk,tkn->tpn", pw1, m2)                     # (5, 168, 160)
    m3f = jnp.einsum("pk,tkn->tpn", pw2, m3)                     # (5, 160, 120)

    b1 = jnp.tile(params["conv1_b"].astype(f32), 28)[None, :]    # (1, 168)
    b2 = jnp.tile(params["conv2_b"].astype(f32), 10)[None, :]    # (1, 160)
    b3 = params["conv3_b"].astype(f32)[None, :]                  # (1, 120)

    # pool1 rows, batch-merged: p1[b*20+p] = 0.5*(a1[b*40+2p] + a1[b*40+2p+1]).
    ph1 = np.zeros((tb * S1, l1), np.float32)
    for m in range(tb * S1):
        if 2 * m + 1 < l1:
            ph1[m, 2 * m] = 0.5
            ph1[m, 2 * m + 1] = 0.5

    # pool2 rows + per-image row gather for conv3:
    # (Q[ki] @ a2)[b] = 0.5*(a2[b*20+2ki] + a2[b*20+2ki+1]).
    q = np.zeros((KS, tb, l2), np.float32)
    for ki in range(KS):
        for b in range(tb):
            q[ki, b, b * S1 + 2 * ki] = 0.5
            q[ki, b, b * S1 + 2 * ki + 1] = 0.5

    wf1 = params["fc1_w"].astype(f32)                              # (120, 84)
    bf1 = params["fc1_b"].astype(f32)[None, :]                     # (1, 84)
    wf2 = jnp.pad(params["fc2_w"].astype(f32), ((0, 0), (0, 118)))  # (84, 128)
    bf2 = jnp.pad(params["fc2_b"].astype(f32), (0, 118))[None, :]   # (1, 128)

    return (m1, b1, jnp.asarray(ph1), m2f, b2, jnp.asarray(q), m3f, b3,
            wf1, bf1, wf2, bf2)


# ---------------------------------------------------------------------------
# Fused Pallas kernel: TB images per grid step, everything VMEM-resident
# ---------------------------------------------------------------------------
def _lenet_kernel(x_ref, m1_ref, b1_ref, ph1_ref, m2_ref, b2_ref, q_ref,
                  m3_ref, b3_ref, wf1_ref, bf1_ref, wf2_ref, bf2_ref,
                  out_ref, p1_ref):
    def dot(a, b):
        return jnp.dot(a, b, preferred_element_type=jnp.float32)

    k = m1_ref.shape[0]          # 5 vertical taps per conv
    l1 = ph1_ref.shape[1]        # TB*40 - 8 conv1-output rows
    l2 = q_ref.shape[2]          # TB*20 - 8 conv2-output rows

    # conv1 (1->6, k5) + tanh on batch-merged rows: M = l1, per-tap K = 32.
    acc = dot(x_ref[0:l1, :], m1_ref[0])
    for ki in range(1, k):
        acc = acc + dot(x_ref[ki:ki + l1, :], m1_ref[ki])
    a1 = jnp.tanh(acc + b1_ref[...])                       # (l1, 168)

    # avg_pool1 row half (block-diagonal 0.5 pairs); column half is in m2_ref.
    p1_ref[...] = dot(ph1_ref[...], a1)                    # (TB*20, 168)

    # conv2 (6->16, k5) + tanh: M = l2, per-tap K = 168 (pool1 cols folded in).
    acc = dot(p1_ref[0:l2, :], m2_ref[0])
    for ki in range(1, k):
        acc = acc + dot(p1_ref[ki:ki + l2, :], m2_ref[ki])
    a2 = jnp.tanh(acc + b2_ref[...])                       # (l2, 160)

    # avg_pool2 row half + per-image gather + conv3 (16->120, k5) + tanh:
    # Q[ki] @ a2 -> (TB, 160) batched rows; pool2 cols folded into m3_ref.
    acc = dot(dot(q_ref[0], a2), m3_ref[0])
    for ki in range(1, k):
        acc = acc + dot(dot(q_ref[ki], a2), m3_ref[ki])
    h = jnp.tanh(acc + b3_ref[...])                        # (TB, 120)

    # fc1 (120->84) + tanh, fc2 (84->10 padded to 128 lanes), batch in M.
    h = jnp.tanh(dot(h, wf1_ref[...]) + bf1_ref[...])      # (TB, 84)
    out_ref[...] = dot(h, wf2_ref[...]) + bf2_ref[...]     # (TB, 128) dense


def lenet_forward(x, params, *, tile_batch=8):
    """x: (B, 1, 28, 28) float32 NCHW -> logits (B, 10) float32."""
    B = x.shape[0]
    tb = max(1, min(tile_batch, B))          # TB=8: best overhead/flop balance
    bpad = pl.cdiv(B, tb) * tb
    consts = _prepare_constants(params, tb)

    # conv1 padding=2, extra 8 zero rows per image, batch merged into rows.
    xp = jnp.pad(x[:, 0, :, :].astype(jnp.float32),
                 ((0, bpad - B), (2, 10), (2, 2)))          # (bpad, 40, 32)
    x2d = xp.reshape(bpad * S0, 32)                         # (bpad*40, 32)

    def _const_spec(a):
        zeros = (0,) * a.ndim
        return pl.BlockSpec(a.shape, lambda i, z=zeros: z)

    l1 = tb * S0 - 8
    l2 = tb * S1 - 8
    steps = bpad // tb
    flops = 2 * steps * (KS * l1 * 32 * 168 + tb * S1 * l1 * 168
                         + KS * l2 * 168 * 160
                         + KS * (tb * l2 * 160 + tb * 160 * 120)
                         + tb * 120 * 84 + tb * 84 * 128)
    trans = steps * (l1 * 168 + l2 * 160 + tb * (120 + 84))
    nbytes = 4 * (x2d.size + sum(int(c.size) for c in consts) + bpad * 128)

    out = pl.pallas_call(
        _lenet_kernel,
        out_shape=jax.ShapeDtypeStruct((bpad, 128), jnp.float32),
        grid=(steps,),
        in_specs=[pl.BlockSpec((tb * S0, 32), lambda i: (i, 0))]
                 + [_const_spec(c) for c in consts],
        out_specs=pl.BlockSpec((tb, 128), lambda i: (i, 0)),
        scratch_shapes=[pltpu.VMEM((tb * S1, 168), jnp.float32)],  # pool1 act
        compiler_params=pltpu.CompilerParams(
            dimension_semantics=("parallel",),
            vmem_limit_bytes=32 * 1024 * 1024),
        cost_estimate=pl.CostEstimate(flops=int(flops),
                                      transcendentals=int(trans),
                                      bytes_accessed=int(nbytes)),
    )(x2d, *consts)
    return out[:B, :10]


# ---------------------------------------------------------------------------
# Parameter init (deterministic, PyTorch-like uniform(+-1/sqrt(fan_in)))
# ---------------------------------------------------------------------------
def init_params(key):
    def uni(k, shape, fan_in):
        bound = 1.0 / jnp.sqrt(jnp.float32(fan_in))
        return jax.random.uniform(k, shape, jnp.float32, -bound, bound)

    ks = jax.random.split(key, 10)
    p = {}
    p["conv1_w"] = uni(ks[0], (6, 1, 5, 5), 1 * 25)
    p["conv1_b"] = uni(ks[1], (6,), 1 * 25)
    p["conv2_w"] = uni(ks[2], (16, 6, 5, 5), 6 * 25)
    p["conv2_b"] = uni(ks[3], (16,), 6 * 25)
    p["conv3_w"] = uni(ks[4], (120, 16, 5, 5), 16 * 25)
    p["conv3_b"] = uni(ks[5], (120,), 16 * 25)
    p["fc1_w"] = uni(ks[6], (120, 84), 120)       # stored (in, out)
    p["fc1_b"] = uni(ks[7], (84,), 120)
    p["fc2_w"] = uni(ks[8], (84, 10), 84)         # stored (in, out)
    p["fc2_b"] = uni(ks[9], (10,), 84)
    return p


# ---------------------------------------------------------------------------
# Pure-JAX reference (f32, highest precision) for validation
# ---------------------------------------------------------------------------
def lenet_reference(x, params):
    hi = jax.lax.Precision.HIGHEST
    dn = ("NCHW", "OIHW", "NCHW")

    def avg_pool(y):
        b, c, h, w = y.shape
        return y.reshape(b, c, h // 2, 2, w // 2, 2).mean(axis=(3, 5))

    y = jax.lax.conv_general_dilated(x, params["conv1_w"], (1, 1), ((2, 2), (2, 2)),
                                     dimension_numbers=dn, precision=hi)
    y = jnp.tanh(y + params["conv1_b"][None, :, None, None])
    y = avg_pool(y)
    y = jax.lax.conv_general_dilated(y, params["conv2_w"], (1, 1), "VALID",
                                     dimension_numbers=dn, precision=hi)
    y = jnp.tanh(y + params["conv2_b"][None, :, None, None])
    y = avg_pool(y)
    y = jax.lax.conv_general_dilated(y, params["conv3_w"], (1, 1), "VALID",
                                     dimension_numbers=dn, precision=hi)
    y = jnp.tanh(y + params["conv3_b"][None, :, None, None])
    y = y.reshape(y.shape[0], -1)
    y = jnp.tanh(jnp.dot(y, params["fc1_w"], precision=hi) + params["fc1_b"])
    return jnp.dot(y, params["fc2_w"], precision=hi) + params["fc2_b"]


if __name__ == "__main__":
    key = jax.random.PRNGKey(0)
    k_x, k_p = jax.random.split(key)
    # LeNet geometry requires 28x28 single-channel inputs; small batch=2.
    x = jax.random.normal(k_x, (2, 1, 28, 28), jnp.float32)
    params = init_params(k_p)

    logits = jax.jit(lenet_forward)(x, params)
    jax.block_until_ready(logits)
    assert logits.shape == (2, 10) and logits.dtype == jnp.float32

    ref = lenet_reference(x, params)
    err = float(jnp.max(jnp.abs(logits - ref)))
    assert err < 1e-3, f"mismatch vs XLA reference: max abs err = {err}"
    print("KERNEL_OK")
</pallas_src>

<mosaic_0001>
module attributes {stable_mosaic.version = 11 : i64} {
  func.func @_lenet_kernel(%arg0: i32, %arg1: memref<80x32xf32, #tpu.memory_space<vmem>>, %arg2: memref<5x32x168xf32, #tpu.memory_space<vmem>>, %arg3: memref<1x168xf32, #tpu.memory_space<vmem>>, %arg4: memref<40x72xf32, #tpu.memory_space<vmem>>, %arg5: memref<5x168x160xf32, #tpu.memory_space<vmem>>, %arg6: memref<1x160xf32, #tpu.memory_space<vmem>>, %arg7: memref<5x2x32xf32, #tpu.memory_space<vmem>>, %arg8: memref<5x160x120xf32, #tpu.memory_space<vmem>>, %arg9: memref<1x120xf32, #tpu.memory_space<vmem>>, %arg10: memref<120x84xf32, #tpu.memory_space<vmem>>, %arg11: memref<1x84xf32, #tpu.memory_space<vmem>>, %arg12: memref<84x128xf32, #tpu.memory_space<vmem>>, %arg13: memref<1x128xf32, #tpu.memory_space<vmem>>, %arg14: memref<2x128xf32, #tpu.memory_space<vmem>>, %arg15: memref<40x168xf32, #tpu.memory_space<vmem>>) attributes {dimension_semantics = [#tpu.dimension_semantics<parallel>], iteration_bounds = array<i64: 1>, scalar_prefetch = 0 : i64, scratch_operands = 1 : i64, tpu.core_type = #tpu.core_type<tc>, window_params = [{transform_indices = @transform_0, window_bounds = array<i64: 80, 32>}, {pipeline_mode = #tpu.pipeline_mode<synchronous>, transform_indices = @transform_1, window_bounds = array<i64: 5, 32, 168>}, {pipeline_mode = #tpu.pipeline_mode<synchronous>, transform_indices = @transform_2, window_bounds = array<i64: 1, 168>}, {pipeline_mode = #tpu.pipeline_mode<synchronous>, transform_indices = @transform_3, window_bounds = array<i64: 40, 72>}, {pipeline_mode = #tpu.pipeline_mode<synchronous>, transform_indices = @transform_4, window_bounds = array<i64: 5, 168, 160>}, {pipeline_mode = #tpu.pipeline_mode<synchronous>, transform_indices = @transform_5, window_bounds = array<i64: 1, 160>}, {pipeline_mode = #tpu.pipeline_mode<synchronous>, transform_indices = @transform_6, window_bounds = array<i64: 5, 2, 32>}, {pipeline_mode = #tpu.pipeline_mode<synchronous>, transform_indices = @transform_7, window_bounds = array<i64: 5, 160, 120>}, {pipeline_mode = #tpu.pipeline_mode<synchronous>, transform_indices = @transform_8, window_bounds = array<i64: 1, 120>}, {pipeline_mode = #tpu.pipeline_mode<synchronous>, transform_indices = @transform_9, window_bounds = array<i64: 120, 84>}, {pipeline_mode = #tpu.pipeline_mode<synchronous>, transform_indices = @transform_10, window_bounds = array<i64: 1, 84>}, {pipeline_mode = #tpu.pipeline_mode<synchronous>, transform_indices = @transform_11, window_bounds = array<i64: 84, 128>}, {pipeline_mode = #tpu.pipeline_mode<synchronous>, transform_indices = @transform_12, window_bounds = array<i64: 1, 128>}, {transform_indices = @transform_13, window_bounds = array<i64: 2, 128>}]} {
    %c0 = arith.constant 0 : index
    %c0_0 = arith.constant 0 : index
    %0 = vector.load %arg1[%c0, %c0_0] : memref<80x32xf32, #tpu.memory_space<vmem>>, vector<72x32xf32>
    %c0_1 = arith.constant 0 : index
    %c0_2 = arith.constant 0 : index
    %c0_3 = arith.constant 0 : index
    %1 = vector.load %arg2[%c0_1, %c0_2, %c0_3] : memref<5x32x168xf32, #tpu.memory_space<vmem>>, vector<1x32x168xf32>
    %2 = vector.shape_cast %1 : vector<1x32x168xf32> to vector<32x168xf32>
    %cst = arith.constant dense<0.000000e+00> : vector<72x168xf32>
    %3 = tpu.matmul %0, %2, %cst {dimension_numbers = #tpu.dot_dimension_numbers<[1], [0], [0], [1], [0, 0, 1, 1], [], []>} : vector<72x32xf32>, vector<32x168xf32>, vector<72x168xf32> -> vector<72x168xf32>
    %c1 = arith.constant 1 : index
    %c0_4 = arith.constant 0 : index
    %4 = vector.load %arg1[%c1, %c0_4] : memref<80x32xf32, #tpu.memory_space<vmem>>, vector<72x32xf32>
    %c1_5 = arith.constant 1 : index
    %c0_6 = arith.constant 0 : index
    %c0_7 = arith.constant 0 : index
    %5 = vector.load %arg2[%c1_5, %c0_6, %c0_7] : memref<5x32x168xf32, #tpu.memory_space<vmem>>, vector<1x32x168xf32>
    %6 = vector.shape_cast %5 : vector<1x32x168xf32> to vector<32x168xf32>
    %cst_8 = arith.constant dense<0.000000e+00> : vector<72x168xf32>
    %7 = tpu.matmul %4, %6, %cst_8 {dimension_numbers = #tpu.dot_dimension_numbers<[1], [0], [0], [1], [0, 0, 1, 1], [], []>} : vector<72x32xf32>, vector<32x168xf32>, vector<72x168xf32> -> vector<72x168xf32>
    %8 = arith.addf %3, %7 : vector<72x168xf32>
    %c2 = arith.constant 2 : index
    %c0_9 = arith.constant 0 : index
    %9 = vector.load %arg1[%c2, %c0_9] : memref<80x32xf32, #tpu.memory_space<vmem>>, vector<72x32xf32>
    %c2_10 = arith.constant 2 : index
    %c0_11 = arith.constant 0 : index
    %c0_12 = arith.constant 0 : index
    %10 = vector.load %arg2[%c2_10, %c0_11, %c0_12] : memref<5x32x168xf32, #tpu.memory_space<vmem>>, vector<1x32x168xf32>
    %11 = vector.shape_cast %10 : vector<1x32x168xf32> to vector<32x168xf32>
    %cst_13 = arith.constant dense<0.000000e+00> : vector<72x168xf32>
    %12 = tpu.matmul %9, %11, %cst_13 {dimension_numbers = #tpu.dot_dimension_numbers<[1], [0], [0], [1], [0, 0, 1, 1], [], []>} : vector<72x32xf32>, vector<32x168xf32>, vector<72x168xf32> -> vector<72x168xf32>
    %13 = arith.addf %8, %12 : vector<72x168xf32>
    %c3 = arith.constant 3 : index
    %c0_14 = arith.constant 0 : index
    %14 = vector.load %arg1[%c3, %c0_14] : memref<80x32xf32, #tpu.memory_space<vmem>>, vector<72x32xf32>
    %c3_15 = arith.constant 3 : index
    %c0_16 = arith.constant 0 : index
    %c0_17 = arith.constant 0 : index
    %15 = vector.load %arg2[%c3_15, %c0_16, %c0_17] : memref<5x32x168xf32, #tpu.memory_space<vmem>>, vector<1x32x168xf32>
    %16 = vector.shape_cast %15 : vector<1x32x168xf32> to vector<32x168xf32>
    %cst_18 = arith.constant dense<0.000000e+00> : vector<72x168xf32>
    %17 = tpu.matmul %14, %16, %cst_18 {dimension_numbers = #tpu.dot_dimension_numbers<[1], [0], [0], [1], [0, 0, 1, 1], [], []>} : vector<72x32xf32>, vector<32x168xf32>, vector<72x168xf32> -> vector<72x168xf32>
    %18 = arith.addf %13, %17 : vector<72x168xf32>
    %c4 = arith.constant 4 : index
    %c0_19 = arith.constant 0 : index
    %19 = vector.load %arg1[%c4, %c0_19] : memref<80x32xf32, #tpu.memory_space<vmem>>, vector<72x32xf32>
    %c4_20 = arith.constant 4 : index
    %c0_21 = arith.constant 0 : index
    %c0_22 = arith.constant 0 : index
    %20 = vector.load %arg2[%c4_20, %c0_21, %c0_22] : memref<5x32x168xf32, #tpu.memory_space<vmem>>, vector<1x32x168xf32>
    %21 = vector.shape_cast %20 : vector<1x32x168xf32> to vector<32x168xf32>
    %cst_23 = arith.constant dense<0.000000e+00> : vector<72x168xf32>
    %22 = tpu.matmul %19, %21, %cst_23 {dimension_numbers = #tpu.dot_dimension_numbers<[1], [0], [0], [1], [0, 0, 1, 1], [], []>} : vector<72x32xf32>, vector<32x168xf32>, vector<72x168xf32> -> vector<72x168xf32>
    %23 = arith.addf %18, %22 : vector<72x168xf32>
    %c0_24 = arith.constant 0 : index
    %c0_25 = arith.constant 0 : index
    %24 = vector.load %arg3[%c0_24, %c0_25] : memref<1x168xf32, #tpu.memory_space<vmem>>, vector<1x168xf32>
    %25 = vector.broadcast %24 : vector<1x168xf32> to vector<72x168xf32>
    %26 = arith.addf %23, %25 : vector<72x168xf32>
    %27 = math.tanh %26 : vector<72x168xf32>
    %c0_26 = arith.constant 0 : index
    %c0_27 = arith.constant 0 : index
    %28 = vector.load %arg4[%c0_26, %c0_27] : memref<40x72xf32, #tpu.memory_space<vmem>>, vector<40x72xf32>
    %cst_28 = arith.constant dense<0.000000e+00> : vector<40x168xf32>
    %29 = tpu.matmul %28, %27, %cst_28 {dimension_numbers = #tpu.dot_dimension_numbers<[1], [0], [0], [1], [0, 0, 1, 1], [], []>} : vector<40x72xf32>, vector<72x168xf32>, vector<40x168xf32> -> vector<40x168xf32>
    %c0_29 = arith.constant 0 : index
    %c0_30 = arith.constant 0 : index
    %30 = vector.load %arg15[%c0_29, %c0_30] : memref<40x168xf32, #tpu.memory_space<vmem>>, vector<40x168xf32>
    tpu.vector_store %arg15[%c0_29, %c0_30], %29 {strides = array<i32>} : memref<40x168xf32, #tpu.memory_space<vmem>>, vector<40x168xf32>,
    %c0_31 = arith.constant 0 : index
    %c0_32 = arith.constant 0 : index
    %31 = vector.load %arg15[%c0_31, %c0_32] : memref<40x168xf32, #tpu.memory_space<vmem>>, vector<32x168xf32>
    %c0_33 = arith.constant 0 : index
    %c0_34 = arith.constant 0 : index
    %c0_35 = arith.constant 0 : index
    %32 = vector.load %arg5[%c0_33, %c0_34, %c0_35] : memref<5x168x160xf32, #tpu.memory_space<vmem>>, vector<1x168x160xf32>
    %33 = vector.shape_cast %32 : vector<1x168x160xf32> to vector<168x160xf32>
    %cst_36 = arith.constant dense<0.000000e+00> : vector<32x160xf32>
    %34 = tpu.matmul %31, %33, %cst_36 {dimension_numbers = #tpu.dot_dimension_numbers<[1], [0], [0], [1], [0, 0, 1, 1], [], []>} : vector<32x168xf32>, vector<168x160xf32>, vector<32x160xf32> -> vector<32x160xf32>
    %c1_37 = arith.constant 1 : index
    %c0_38 = arith.constant 0 : index
    %35 = vector.load %arg15[%c1_37, %c0_38] : memref<40x168xf32, #tpu.memory_space<vmem>>, vector<32x168xf32>
    %c1_39 = arith.constant 1 : index
    %c0_40 = arith.constant 0 : index
    %c0_41 = arith.constant 0 : index
    %36 = vector.load %arg5[%c1_39, %c0_40, %c0_41] : memref<5x168x160xf32, #tpu.memory_space<vmem>>, vector<1x168x160xf32>
    %37 = vector.shape_cast %36 : vector<1x168x160xf32> to vector<168x160xf32>
    %cst_42 = arith.constant dense<0.000000e+00> : vector<32x160xf32>
    %38 = tpu.matmul %35, %37, %cst_42 {dimension_numbers = #tpu.dot_dimension_numbers<[1], [0], [0], [1], [0, 0, 1, 1], [], []>} : vector<32x168xf32>, vector<168x160xf32>, vector<32x160xf32> -> vector<32x160xf32>
    %39 = arith.addf %34, %38 : vector<32x160xf32>
    %c2_43 = arith.constant 2 : index
    %c0_44 = arith.constant 0 : index
    %40 = vector.load %arg15[%c2_43, %c0_44] : memref<40x168xf32, #tpu.memory_space<vmem>>, vector<32x168xf32>
    %c2_45 = arith.constant 2 : index
    %c0_46 = arith.constant 0 : index
    %c0_47 = arith.constant 0 : index
    %41 = vector.load %arg5[%c2_45, %c0_46, %c0_47] : memref<5x168x160xf32, #tpu.memory_space<vmem>>, vector<1x168x160xf32>
    %42 = vector.shape_cast %41 : vector<1x168x160xf32> to vector<168x160xf32>
    %cst_48 = arith.constant dense<0.000000e+00> : vector<32x160xf32>
    %43 = tpu.matmul %40, %42, %cst_48 {dimension_numbers = #tpu.dot_dimension_numbers<[1], [0], [0], [1], [0, 0, 1, 1], [], []>} : vector<32x168xf32>, vector<168x160xf32>, vector<32x160xf32> -> vector<32x160xf32>
    %44 = arith.addf %39, %43 : vector<32x160xf32>
    %c3_49 = arith.constant 3 : index
    %c0_50 = arith.constant 0 : index
    %45 = vector.load %arg15[%c3_49, %c0_50] : memref<40x168xf32, #tpu.memory_space<vmem>>, vector<32x168xf32>
    %c3_51 = arith.constant 3 : index
    %c0_52 = arith.constant 0 : index
    %c0_53 = arith.constant 0 : index
    %46 = vector.load %arg5[%c3_51, %c0_52, %c0_53] : memref<5x168x160xf32, #tpu.memory_space<vmem>>, vector<1x168x160xf32>
    %47 = vector.shape_cast %46 : vector<1x168x160xf32> to vector<168x160xf32>
    %cst_54 = arith.constant dense<0.000000e+00> : vector<32x160xf32>
    %48 = tpu.matmul %45, %47, %cst_54 {dimension_numbers = #tpu.dot_dimension_numbers<[1], [0], [0], [1], [0, 0, 1, 1], [], []>} : vector<32x168xf32>, vector<168x160xf32>, vector<32x160xf32> -> vector<32x160xf32>
    %49 = arith.addf %44, %48 : vector<32x160xf32>
    %c4_55 = arith.constant 4 : index
    %c0_56 = arith.constant 0 : index
    %50 = vector.load %arg15[%c4_55, %c0_56] : memref<40x168xf32, #tpu.memory_space<vmem>>, vector<32x168xf32>
    %c4_57 = arith.constant 4 : index
    %c0_58 = arith.constant 0 : index
    %c0_59 = arith.constant 0 : index
    %51 = vector.load %arg5[%c4_57, %c0_58, %c0_59] : memref<5x168x160xf32, #tpu.memory_space<vmem>>, vector<1x168x160xf32>
    %52 = vector.shape_cast %51 : vector<1x168x160xf32> to vector<168x160xf32>
    %cst_60 = arith.constant dense<0.000000e+00> : vector<32x160xf32>
    %53 = tpu.matmul %50, %52, %cst_60 {dimension_numbers = #tpu.dot_dimension_numbers<[1], [0], [0], [1], [0, 0, 1, 1], [], []>} : vector<32x168xf32>, vector<168x160xf32>, vector<32x160xf32> -> vector<32x160xf32>
    %54 = arith.addf %49, %53 : vector<32x160xf32>
    %c0_61 = arith.constant 0 : index
    %c0_62 = arith.constant 0 : index
    %55 = vector.load %arg6[%c0_61, %c0_62] : memref<1x160xf32, #tpu.memory_space<vmem>>, vector<1x160xf32>
    %56 = vector.broadcast %55 : vector<1x160xf32> to vector<32x160xf32>
    %57 = arith.addf %54, %56 : vector<32x160xf32>
    %58 = math.tanh %57 : vector<32x160xf32>
    %c0_63 = arith.constant 0 : index
    %c0_64 = arith.constant 0 : index
    %c0_65 = arith.constant 0 : index
    %59 = vector.load %arg7[%c0_63, %c0_64, %c0_65] : memref<5x2x32xf32, #tpu.memory_space<vmem>>, vector<1x2x32xf32>
    %60 = vector.shape_cast %59 : vector<1x2x32xf32> to vector<2x32xf32>
    %cst_66 = arith.constant dense<0.000000e+00> : vector<2x160xf32>
    %61 = tpu.matmul %60, %58, %cst_66 {dimension_numbers = #tpu.dot_dimension_numbers<[1], [0], [0], [1], [0, 0, 1, 1], [], []>} : vector<2x32xf32>, vector<32x160xf32>, vector<2x160xf32> -> vector<2x160xf32>
    %c0_67 = arith.constant 0 : index
    %c0_68 = arith.constant 0 : index
    %c0_69 = arith.constant 0 : index
    %62 = vector.load %arg8[%c0_67, %c0_68, %c0_69] : memref<5x160x120xf32, #tpu.memory_space<vmem>>, vector<1x160x120xf32>
    %63 = vector.shape_cast %62 : vector<1x160x120xf32> to vector<160x120xf32>
    %cst_70 = arith.constant dense<0.000000e+00> : vector<2x120xf32>
    %64 = tpu.matmul %61, %63, %cst_70 {dimension_numbers = #tpu.dot_dimension_numbers<[1], [0], [0], [1], [0, 0, 1, 1], [], []>} : vector<2x160xf32>, vector<160x120xf32>, vector<2x120xf32> -> vector<2x120xf32>
    %c1_71 = arith.constant 1 : index
    %c0_72 = arith.constant 0 : index
    %c0_73 = arith.constant 0 : index
    %65 = vector.load %arg7[%c1_71, %c0_72, %c0_73] : memref<5x2x32xf32, #tpu.memory_space<vmem>>, vector<1x2x32xf32>
    %66 = vector.shape_cast %65 : vector<1x2x32xf32> to vector<2x32xf32>
    %cst_74 = arith.constant dense<0.000000e+00> : vector<2x160xf32>
    %67 = tpu.matmul %66, %58, %cst_74 {dimension_numbers = #tpu.dot_dimension_numbers<[1], [0], [0], [1], [0, 0, 1, 1], [], []>} : vector<2x32xf32>, vector<32x160xf32>, vector<2x160xf32> -> vector<2x160xf32>
    %c1_75 = arith.constant 1 : index
    %c0_76 = arith.constant 0 : index
    %c0_77 = arith.constant 0 : index
    %68 = vector.load %arg8[%c1_75, %c0_76, %c0_77] : memref<5x160x120xf32, #tpu.memory_space<vmem>>, vector<1x160x120xf32>
    %69 = vector.shape_cast %68 : vector<1x160x120xf32> to vector<160x120xf32>
    %cst_78 = arith.constant dense<0.000000e+00> : vector<2x120xf32>
    %70 = tpu.matmul %67, %69, %cst_78 {dimension_numbers = #tpu.dot_dimension_numbers<[1], [0], [0], [1], [0, 0, 1, 1], [], []>} : vector<2x160xf32>, vector<160x120xf32>, vector<2x120xf32> -> vector<2x120xf32>
    %71 = arith.addf %64, %70 : vector<2x120xf32>
    %c2_79 = arith.constant 2 : index
    %c0_80 = arith.constant 0 : index
    %c0_81 = arith.constant 0 : index
    %72 = vector.load %arg7[%c2_79, %c0_80, %c0_81] : memref<5x2x32xf32, #tpu.memory_space<vmem>>, vector<1x2x32xf32>
    %73 = vector.shape_cast %72 : vector<1x2x32xf32> to vector<2x32xf32>
    %cst_82 = arith.constant dense<0.000000e+00> : vector<2x160xf32>
    %74 = tpu.matmul %73, %58, %cst_82 {dimension_numbers = #tpu.dot_dimension_numbers<[1], [0], [0], [1], [0, 0, 1, 1], [], []>} : vector<2x32xf32>, vector<32x160xf32>, vector<2x160xf32> -> vector<2x160xf32>
    %c2_83 = arith.constant 2 : index
    %c0_84 = arith.constant 0 : index
    %c0_85 = arith.constant 0 : index
    %75 = vector.load %arg8[%c2_83, %c0_84, %c0_85] : memref<5x160x120xf32, #tpu.memory_space<vmem>>, vector<1x160x120xf32>
    %76 = vector.shape_cast %75 : vector<1x160x120xf32> to vector<160x120xf32>
    %cst_86 = arith.constant dense<0.000000e+00> : vector<2x120xf32>
    %77 = tpu.matmul %74, %76, %cst_86 {dimension_numbers = #tpu.dot_dimension_numbers<[1], [0], [0], [1], [0, 0, 1, 1], [], []>} : vector<2x160xf32>, vector<160x120xf32>, vector<2x120xf32> -> vector<2x120xf32>
    %78 = arith.addf %71, %77 : vector<2x120xf32>
    %c3_87 = arith.constant 3 : index
    %c0_88 = arith.constant 0 : index
    %c0_89 = arith.constant 0 : index
    %79 = vector.load %arg7[%c3_87, %c0_88, %c0_89] : memref<5x2x32xf32, #tpu.memory_space<vmem>>, vector<1x2x32xf32>
    %80 = vector.shape_cast %79 : vector<1x2x32xf32> to vector<2x32xf32>
    %cst_90 = arith.constant dense<0.000000e+00> : vector<2x160xf32>
    %81 = tpu.matmul %80, %58, %cst_90 {dimension_numbers = #tpu.dot_dimension_numbers<[1], [0], [0], [1], [0, 0, 1, 1], [], []>} : vector<2x32xf32>, vector<32x160xf32>, vector<2x160xf32> -> vector<2x160xf32>
    %c3_91 = arith.constant 3 : index
    %c0_92 = arith.constant 0 : index
    %c0_93 = arith.constant 0 : index
    %82 = vector.load %arg8[%c3_91, %c0_92, %c0_93] : memref<5x160x120xf32, #tpu.memory_space<vmem>>, vector<1x160x120xf32>
    %83 = vector.shape_cast %82 : vector<1x160x120xf32> to vector<160x120xf32>
    %cst_94 = arith.constant dense<0.000000e+00> : vector<2x120xf32>
    %84 = tpu.matmul %81, %83, %cst_94 {dimension_numbers = #tpu.dot_dimension_numbers<[1], [0], [0], [1], [0, 0, 1, 1], [], []>} : vector<2x160xf32>, vector<160x120xf32>, vector<2x120xf32> -> vector<2x120xf32>
    %85 = arith.addf %78, %84 : vector<2x120xf32>
    %c4_95 = arith.constant 4 : index
    %c0_96 = arith.constant 0 : index
    %c0_97 = arith.constant 0 : index
    %86 = vector.load %arg7[%c4_95, %c0_96, %c0_97] : memref<5x2x32xf32, #tpu.memory_space<vmem>>, vector<1x2x32xf32>
    %87 = vector.shape_cast %86 : vector<1x2x32xf32> to vector<2x32xf32>
    %cst_98 = arith.constant dense<0.000000e+00> : vector<2x160xf32>
    %88 = tpu.matmul %87, %58, %cst_98 {dimension_numbers = #tpu.dot_dimension_numbers<[1], [0], [0], [1], [0, 0, 1, 1], [], []>} : vector<2x32xf32>, vector<32x160xf32>, vector<2x160xf32> -> vector<2x160xf32>
    %c4_99 = arith.constant 4 : index
    %c0_100 = arith.constant 0 : index
    %c0_101 = arith.constant 0 : index
    %89 = vector.load %arg8[%c4_99, %c0_100, %c0_101] : memref<5x160x120xf32, #tpu.memory_space<vmem>>, vector<1x160x120xf32>
    %90 = vector.shape_cast %89 : vector<1x160x120xf32> to vector<160x120xf32>
    %cst_102 = arith.constant dense<0.000000e+00> : vector<2x120xf32>
    %91 = tpu.matmul %88, %90, %cst_102 {dimension_numbers = #tpu.dot_dimension_numbers<[1], [0], [0], [1], [0, 0, 1, 1], [], []>} : vector<2x160xf32>, vector<160x120xf32>, vector<2x120xf32> -> vector<2x120xf32>
    %92 = arith.addf %85, %91 : vector<2x120xf32>
    %c0_103 = arith.constant 0 : index
    %c0_104 = arith.constant 0 : index
    %93 = vector.load %arg9[%c0_103, %c0_104] : memref<1x120xf32, #tpu.memory_space<vmem>>, vector<1x120xf32>
    %94 = vector.broadcast %93 : vector<1x120xf32> to vector<2x120xf32>
    %95 = arith.addf %92, %94 : vector<2x120xf32>
    %96 = math.tanh %95 : vector<2x120xf32>
    %c0_105 = arith.constant 0 : index
    %c0_106 = arith.constant 0 : index
    %97 = vector.load %arg10[%c0_105, %c0_106] : memref<120x84xf32, #tpu.memory_space<vmem>>, vector<120x84xf32>
    %cst_107 = arith.constant dense<0.000000e+00> : vector<2x84xf32>
    %98 = tpu.matmul %96, %97, %cst_107 {dimension_numbers = #tpu.dot_dimension_numbers<[1], [0], [0], [1], [0, 0, 1, 1], [], []>} : vector<2x120xf32>, vector<120x84xf32>, vector<2x84xf32> -> vector<2x84xf32>
    %c0_108 = arith.constant 0 : index
    %c0_109 = arith.constant 0 : index
    %99 = vector.load %arg11[%c0_108, %c0_109] : memref<1x84xf32, #tpu.memory_space<vmem>>, vector<1x84xf32>
    %100 = vector.broadcast %99 : vector<1x84xf32> to vector<2x84xf32>
    %101 = arith.addf %98, %100 : vector<2x84xf32>
    %102 = math.tanh %101 : vector<2x84xf32>
    %c0_110 = arith.constant 0 : index
    %c0_111 = arith.constant 0 : index
    %103 = vector.load %arg12[%c0_110, %c0_111] : memref<84x128xf32, #tpu.memory_space<vmem>>, vector<84x128xf32>
    %cst_112 = arith.constant dense<0.000000e+00> : vector<2x128xf32>
    %104 = tpu.matmul %102, %103, %cst_112 {dimension_numbers = #tpu.dot_dimension_numbers<[1], [0], [0], [1], [0, 0, 1, 1], [], []>} : vector<2x84xf32>, vector<84x128xf32>, vector<2x128xf32> -> vector<2x128xf32>
    %c0_113 = arith.constant 0 : index
    %c0_114 = arith.constant 0 : index
    %105 = vector.load %arg13[%c0_113, %c0_114] : memref<1x128xf32, #tpu.memory_space<vmem>>, vector<1x128xf32>
    %106 = vector.broadcast %105 : vector<1x128xf32> to vector<2x128xf32>
    %107 = arith.addf %104, %106 : vector<2x128xf32>
    %c0_115 = arith.constant 0 : index
    %c0_116 = arith.constant 0 : index
    %108 = vector.load %arg14[%c0_115, %c0_116] : memref<2x128xf32, #tpu.memory_space<vmem>>, vector<2x128xf32>
    tpu.vector_store %arg14[%c0_115, %c0_116], %107 {strides = array<i32>} : memref<2x128xf32, #tpu.memory_space<vmem>>, vector<2x128xf32>,
    return
  }
  func.func @transform_0(%arg0: i32) -> (i32, i32) {
    %c0_i32 = arith.constant 0 : i32
    %c0_i32_0 = arith.constant 0 : i32
    return %arg0, %c0_i32 : i32, i32
  }
  func.func @transform_1(%arg0: i32) -> (i32, i32, i32) {
    %c0_i32 = arith.constant 0 : i32
    %c0_i32_0 = arith.constant 0 : i32
    %c0_i32_1 = arith.constant 0 : i32
    %c0_i32_2 = arith.constant 0 : i32
    return %c0_i32, %c0_i32_0, %c0_i32_1 : i32, i32, i32
  }
  func.func @transform_2(%arg0: i32) -> (i32, i32) {
    %c0_i32 = arith.constant 0 : i32
    %c0_i32_0 = arith.constant 0 : i32
    %c0_i32_1 = arith.constant 0 : i32
    return %c0_i32, %c0_i32_0 : i32, i32
  }
  func.func @transform_3(%arg0: i32) -> (i32, i32) {
    %c0_i32 = arith.constant 0 : i32
    %c0_i32_0 = arith.constant 0 : i32
    %c0_i32_1 = arith.constant 0 : i32
    return %c0_i32, %c0_i32_0 : i32, i32
  }
  func.func @transform_4(%arg0: i32) -> (i32, i32, i32) {
    %c0_i32 = arith.constant 0 : i32
    %c0_i32_0 = arith.constant 0 : i32
    %c0_i32_1 = arith.constant 0 : i32
    %c0_i32_2 = arith.constant 0 : i32
    return %c0_i32, %c0_i32_0, %c0_i32_1 : i32, i32, i32
  }
  func.func @transform_5(%arg0: i32) -> (i32, i32) {
    %c0_i32 = arith.constant 0 : i32
    %c0_i32_0 = arith.constant 0 : i32
    %c0_i32_1 = arith.constant 0 : i32
    return %c0_i32, %c0_i32_0 : i32, i32
  }
  func.func @transform_6(%arg0: i32) -> (i32, i32, i32) {
    %c0_i32 = arith.constant 0 : i32
    %c0_i32_0 = arith.constant 0 : i32
    %c0_i32_1 = arith.constant 0 : i32
    %c0_i32_2 = arith.constant 0 : i32
    return %c0_i32, %c0_i32_0, %c0_i32_1 : i32, i32, i32
  }
  func.func @transform_7(%arg0: i32) -> (i32, i32, i32) {
    %c0_i32 = arith.constant 0 : i32
    %c0_i32_0 = arith.constant 0 : i32
    %c0_i32_1 = arith.constant 0 : i32
    %c0_i32_2 = arith.constant 0 : i32
    return %c0_i32, %c0_i32_0, %c0_i32_1 : i32, i32, i32
  }
  func.func @transform_8(%arg0: i32) -> (i32, i32) {
    %c0_i32 = arith.constant 0 : i32
    %c0_i32_0 = arith.constant 0 : i32
    %c0_i32_1 = arith.constant 0 : i32
    return %c0_i32, %c0_i32_0 : i32, i32
  }
  func.func @transform_9(%arg0: i32) -> (i32, i32) {
    %c0_i32 = arith.constant 0 : i32
    %c0_i32_0 = arith.constant 0 : i32
    %c0_i32_1 = arith.constant 0 : i32
    return %c0_i32, %c0_i32_0 : i32, i32
  }
  func.func @transform_10(%arg0: i32) -> (i32, i32) {
    %c0_i32 = arith.constant 0 : i32
    %c0_i32_0 = arith.constant 0 : i32
    %c0_i32_1 = arith.constant 0 : i32
    return %c0_i32, %c0_i32_0 : i32, i32
  }
  func.func @transform_11(%arg0: i32) -> (i32, i32) {
    %c0_i32 = arith.constant 0 : i32
    %c0_i32_0 = arith.constant 0 : i32
    %c0_i32_1 = arith.constant 0 : i32
    return %c0_i32, %c0_i32_0 : i32, i32
  }
  func.func @transform_12(%arg0: i32) -> (i32, i32) {
    %c0_i32 = arith.constant 0 : i32
    %c0_i32_0 = arith.constant 0 : i32
    %c0_i32_1 = arith.constant 0 : i32
    return %c0_i32, %c0_i32_0 : i32, i32
  }
  func.func @transform_13(%arg0: i32) -> (i32, i32) {
    %c0_i32 = arith.constant 0 : i32
    %c0_i32_0 = arith.constant 0 : i32
    return %arg0, %c0_i32 : i32, i32
  }
}

</mosaic_0001>

<bundles_post_ra>
// kernel: tile.14
= control target key start
LH: loop header
LB: loop body
LE: loop exit
PB: predicated region body
PF: predicated region fallthrough
CT: control target
= control target key end

     0   :  { %vm9_vm0 = vcmask 15360   ;;  %s247_s12 = smov 126   ;;  %s248_s13 = smov 114   ;;  %vm3_vm1 = vcmask 48128   ;;  %vm13_vm2 = vcmask 31744   ;;  %vm16_vm3 = vcmask 1048560   ;;  %s377_s0 = inlined_call_operand.vmem [shape: f32[28,6], index: 0, kind: input, shape index: {}]   ;;  %s378_s1 = inlined_call_operand.vmem [shape: f32[1,168], index: 1, kind: output, shape index: {}]  }
   0x1   :  { %v191_v0 = vld [vmem:[%s377_s0 + $0x15] sm:$0x1]   ;;  %v194_v3 = vld [vmem:[%s377_s0 + $0x13] sm:$0x1]   ;;  %v193_v4 = vld [vmem:[%s377_s0 + $0x14] sm:$0x1]  }
   0x2   :  { %v192_v1 = vld [vmem:[%s377_s0 + $0x15] sm:$0x1]   ;;  %26 = vrot.lane.b32.xlu1 %v194_v3, %s248_s13  ;;  %v195_v5 = vld [vmem:[%s377_s0 + $0x12] sm:$0x1]   ;;  %s249_s18 = smov 120   ;;  %s250_s19 = smov 108  }
   0x3   :  { %v10_v2 = vsel %vm9_vm0, %v192_v1, %v191_v0  ;;  %v196_v6 = vld [vmem:[%s377_s0 + $0x11] sm:$0x1]   ;;  %v197_v7 = vld [vmem:[%s377_s0 + $0x10] sm:$0x1]   ;;  %s251_s24 = smov 102   ;;  %s252_s25 = smov 96  }
   0x4   :  { %11 = vrot.lane.b32.xlu0 %v10_v2, %s247_s12  ;;  %v198_v8 = vld [vmem:[%s377_s0 + $0xf] sm:$0x1]   ;;  %v199_v9 = vld [vmem:[%s377_s0 + $0xe] sm:$0x1]   ;;  %s253_s30 = smov 90   ;;  %s254_s2 = smov 84  }
   0x5   :  { %v2_v10 = vld [vmem:[%s377_s0] sm:$0x1]   ;;  %v200_v11 = vld [vmem:[%s377_s0 + $0xd] sm:$0x1]   ;;  %v201_v12 = vld [vmem:[%s377_s0 + $0xc] sm:$0x1]  }
   0x6   :  { %32 = vrot.lane.b32.xlu1 %v195_v5, %s250_s19  ;;  %4 = vst.msk [vmem:[#allocation0] sm:$0x1] %vm3_vm1, %v2_v10   ;;  %s255_s9 = smov 78   ;;  %s256_s10 = smov 72   ;;  %v202_v13 = vld [vmem:[%s377_s0 + $0xb] sm:$0x1]  }
   0x7   :  { %v203_v14 = vld [vmem:[%s377_s0 + $0xa] sm:$0x1]   ;;  %s257_s15 = smov 66   ;;  %s258_s16 = smov 60   ;;  %v204_v15 = vld [vmem:[%s377_s0 + $0x9] sm:$0x1]  }
   0x8   :  { %20 = vrot.lane.b32.xlu0 %v193_v4, %s249_s18  ;;  %v205_v16 = vld [vmem:[%s377_s0 + $0x8] sm:$0x1]   ;;  %s259_s21 = smov 54   ;;  %s260_s22 = smov 48   ;;  %v206_v17 = vld [vmem:[%s377_s0 + $0x7] sm:$0x1]  }
   0x9   :  { %v207_v18 = vld [vmem:[%s377_s0 + $0x6] sm:$0x1]   ;;  %s261_s27 = smov 42   ;;  %s262_s28 = smov 36   ;;  %v208_v19 = vld [vmem:[%s377_s0 + $0x1b] sm:$0x1]  }
   0xa   :  { %44 = vrot.lane.b32.xlu1 %v197_v7, %s252_s25  ;;  %v209_v20 = vld [vmem:[%s377_s0 + $0x5] sm:$0x1]   ;;  %s263_s4 = smov 34   ;;  %s264_s5 = smov 30   ;;  %v210_v21 = vld [vmem:[%s377_s0 + $0x1a] sm:$0x1]  }
   0xb   :  { %v211_v22 = vld [vmem:[%s377_s0 + $0x4] sm:$0x1]   ;;  %s266_s11 = smov 24   ;;  %v212_v23 = vld [vmem:[%s377_s0 + $0x19] sm:$0x1]   ;;  %s268_s17 = smov 18  }
   0xc   :  { %38 = vrot.lane.b32.xlu0 %v196_v6, %s251_s24  ;;  %v213_v24 = vld [vmem:[%s377_s0 + $0x3] sm:$0x1]   ;;  %v214_v25 = vld [vmem:[%s377_s0 + $0x18] sm:$0x1]   ;;  %v215_v26 = vld [vmem:[%s377_s0 + $0x2] sm:$0x1]  }
   0xd   :  { %s270_s23 = smov 12   ;;  %v216_v27 = vld [vmem:[%s377_s0 + $0x17] sm:$0x1]   ;;  %v217_v28 = vld [vmem:[%s377_s0 + $0x1] sm:$0x1]   ;;  %s272_s29 = smov 6  }
   0xe   :  { %56 = vrot.lane.b32.xlu1 %v199_v9, %s254_s2  ;;  %v218_v29 = vld [vmem:[%s377_s0 + $0x16] sm:$0x1]   ;;  %s273_s0 = smov 4   ;;  %vm22_vm4 = vcmask 1032128   ;;  %vm28_vm5 = vcmask 982928   ;;  %vm34_vm6 = vcmask 933728  }
   0xf   :  { %vm40_vm7 = vcmask 884528   ;;  %vm46_vm8 = vcmask 835328   ;;  %vm52_vm9 = vcmask 786128   ;;  %vm58_vm10 = vcmask 736928  }
  0x10   :  { %50 = vrot.lane.b32.xlu0 %v198_v8, %s253_s30  ;;  %vm64_vm11 = vcmask 687728   ;;  %vm70_vm12 = vcmask 638528   ;;  %vm76_vm13 = vcmask 589328   ;;  %vm82_vm14 = vcmask 540128  }
  0x11   :  { %vm88_vm15 = vcmask 490928   ;;  %vm94_vm0 = vcmask 441728   ;;  %vm100_vm1 = vcmask 392528  }
  0x12   :  { %68 = vrot.lane.b32.xlu1 %v201_v12, %s256_s10  ;;  %s265_s10 = smov 28  }
  0x14   :  { %62 = vrot.lane.b32.xlu0 %v200_v11, %s255_s9 }
  0x16   :  { %80 = vrot.lane.b32.xlu1 %v203_v14, %s258_s16  ;;  %s267_s16 = smov 22  }
  0x18   :  { %74 = vrot.lane.b32.xlu0 %v202_v13, %s257_s15 }
  0x1a   :  { %92 = vrot.lane.b32.xlu1 %v205_v16, %s260_s22  ;;  %s269_s22 = smov 16  }
  0x1c   :  { %86 = vrot.lane.b32.xlu0 %v204_v15, %s259_s21 }
  0x1e   :  { %104 = vrot.lane.b32.xlu1 %v207_v18, %s262_s28  ;;  %s271_s28 = smov 10  }
  0x20   :  { %98 = vrot.lane.b32.xlu0 %v206_v17, %s261_s27 }
  0x22   :  { %117 = vrot.lane.b32.xlu1 %v209_v20, %s264_s5 }
  0x24   :  { %110 = vrot.lane.b32.xlu0 %v208_v19, %s263_s4 }
  0x26   :  { %130 = vrot.lane.b32.xlu1 %v211_v22, %s266_s11 }
  0x28   :  { %123 = vrot.lane.b32.xlu0 %v210_v21, %s265_s10 }
  0x2a   :  { %143 = vrot.lane.b32.xlu1 %v213_v24, %s268_s17 }
  0x2c   :  { %136 = vrot.lane.b32.xlu0 %v212_v23, %s267_s16 }
  0x2e   :  { %156 = vrot.lane.b32.xlu1 %v215_v26, %s270_s23 }
  0x30   :  { %149 = vrot.lane.b32.xlu0 %v214_v25, %s269_s22 }
  0x32   :  { %169 = vrot.lane.b32.xlu1 %v217_v28, %s272_s29 }
  0x34   :  { %162 = vrot.lane.b32.xlu0 %v216_v27, %s271_s28 }
  0x38   :  { %175 = vrot.lane.b32.xlu0 %v218_v29, %s273_s0 }
  0x74   :  { %v27_v31 = vpop.permute.xlu1 %26  }
  0x76   :  { %v12_v30 = vpop.permute.xlu0 %11  }
  0x77   :  { %15 = vst.msk [vmem:[#allocation0 + $0x8] sm:$0x1] %vm13_vm2, %v12_v30   ;;  %vm106_vm2 = vcmask 343328  }
  0x78   :  { %17 = vst.msk [vmem:[#allocation0] sm:$0x1] %vm16_vm3, %v12_v30   ;;  %v33_v33 = vpop.permute.xlu1 %32   ;;  %vm112_vm3 = vcmask 326928  }
  0x7a   :  { %v21_v32 = vpop.permute.xlu0 %20  }
  0x7b   :  { %23 = vst.msk [vmem:[#allocation0] sm:$0x1] %vm22_vm4, %v21_v32   ;;  %vm119_vm4 = vcmask 294128  }
  0x7c   :  { %29 = vst.msk [vmem:[#allocation0] sm:$0x1] %vm28_vm5, %v27_v31   ;;  %v45_v35 = vpop.permute.xlu1 %44   ;;  %vm125_vm5 = vcmask 277728  }
  0x7d   :  { %35 = vst.msk [vmem:[#allocation0] sm:$0x1] %vm34_vm6, %v33_v33   ;;  %vm132_vm6 = vcmask 244928  }
  0x7e   :  { %v39_v34 = vpop.permute.xlu0 %38  }
  0x7f   :  { %41 = vst.msk [vmem:[#allocation0] sm:$0x1] %vm40_vm7, %v39_v34   ;;  %vm138_vm7 = vcmask 228528  }
  0x80   :  { %47 = vst.msk [vmem:[#allocation0] sm:$0x1] %vm46_vm8, %v45_v35   ;;  %v57_v37 = vpop.permute.xlu1 %56   ;;  %vm145_vm8 = vcmask 195728  }
  0x82   :  { %v51_v36 = vpop.permute.xlu0 %50  }
  0x83   :  { %53 = vst.msk [vmem:[#allocation0] sm:$0x1] %vm52_vm9, %v51_v36   ;;  %vm151_vm9 = vcmask 179328  }
  0x84   :  { %59 = vst.msk [vmem:[#allocation0] sm:$0x1] %vm58_vm10, %v57_v37   ;;  %v69_v39 = vpop.permute.xlu1 %68   ;;  %vm158_vm10 = vcmask 146528  }
  0x86   :  { %v63_v38 = vpop.permute.xlu0 %62  }
  0x87   :  { %65 = vst.msk [vmem:[#allocation0] sm:$0x1] %vm64_vm11, %v63_v38   ;;  %vm164_vm11 = vcmask 130128  }
  0x88   :  { %71 = vst.msk [vmem:[#allocation0] sm:$0x1] %vm70_vm12, %v69_v39   ;;  %v81_v41 = vpop.permute.xlu1 %80   ;;  %vm171_vm12 = vcmask 97328  }
  0x8a   :  { %v75_v40 = vpop.permute.xlu0 %74  }
  0x8b   :  { %77 = vst.msk [vmem:[#allocation0] sm:$0x1] %vm76_vm13, %v75_v40   ;;  %vm177_vm13 = vcmask 80928  }
  0x8c   :  { %83 = vst.msk [vmem:[#allocation0] sm:$0x1] %vm82_vm14, %v81_v41   ;;  %v93_v43 = vpop.permute.xlu1 %92  }
  0x8e   :  { %v87_v42 = vpop.permute.xlu0 %86  }
  0x8f   :  { %89 = vst.msk [vmem:[#allocation0] sm:$0x1] %vm88_vm15, %v87_v42  }
  0x90   :  { %95 = vst.msk [vmem:[#allocation0] sm:$0x1] %vm94_vm0, %v93_v43   ;;  %v105_v45 = vpop.permute.xlu1 %104  }
  0x92   :  { %v99_v44 = vpop.permute.xlu0 %98  }
  0x93   :  { %101 = vst.msk [vmem:[#allocation0] sm:$0x1] %vm100_vm1, %v99_v44  }
  0x94   :  { %107 = vst.msk [vmem:[#allocation0] sm:$0x1] %vm106_vm2, %v105_v45   ;;  %v118_v47 = vpop.permute.xlu1 %117  }
  0x95   :  { %120 = vst.msk [vmem:[#allocation0] sm:$0x1] %vm119_vm4, %v118_v47  }
  0x96   :  { %v111_v46 = vpop.permute.xlu0 %110  }
  0x97   :  { %114 = vst.msk [vmem:[#allocation0 + $0x8] sm:$0x1] %vm112_vm3, %v111_v46  }
  0x98   :  { %v131_v49 = vpop.permute.xlu1 %130  }
  0x99   :  { %133 = vst.msk [vmem:[#allocation0] sm:$0x1] %vm132_vm6, %v131_v49  }
  0x9a   :  { %v124_v48 = vpop.permute.xlu0 %123  }
  0x9b   :  { %127 = vst.msk [vmem:[#allocation0 + $0x8] sm:$0x1] %vm125_vm5, %v124_v48  }
  0x9c   :  { %v144_v51 = vpop.permute.xlu1 %143  }
  0x9d   :  { %146 = vst.msk [vmem:[#allocation0] sm:$0x1] %vm145_vm8, %v144_v51  }
  0x9e   :  { %v137_v50 = vpop.permute.xlu0 %136  }
  0x9f   :  { %140 = vst.msk [vmem:[#allocation0 + $0x8] sm:$0x1] %vm138_vm7, %v137_v50  }
  0xa0   :  { %v157_v53 = vpop.permute.xlu1 %156  }
  0xa1   :  { %159 = vst.msk [vmem:[#allocation0] sm:$0x1] %vm158_vm10, %v157_v53  }
  0xa2   :  { %v150_v52 = vpop.permute.xlu0 %149  }
  0xa3   :  { %153 = vst.msk [vmem:[#allocation0 + $0x8] sm:$0x1] %vm151_vm9, %v150_v52  }
  0xa4   :  { %v170_v55 = vpop.permute.xlu1 %169  }
  0xa5   :  { %172 = vst.msk [vmem:[#allocation0] sm:$0x1] %vm171_vm12, %v170_v55  }
  0xa6   :  { %v163_v54 = vpop.permute.xlu0 %162  }
  0xa7   :  { %166 = vst.msk [vmem:[#allocation0 + $0x8] sm:$0x1] %vm164_vm11, %v163_v54  }
  0xaa   :  { %v176_v56 = vpop.permute.xlu0 %175  }
  0xab   :  { %179 = vst.msk [vmem:[#allocation0 + $0x8] sm:$0x1] %vm177_vm13, %v176_v56  }
  0xac   :  { %v183_v57 = vld [vmem:[#allocation0] sm:$0x1] }
  0xad   :  { %185 = vst [vmem:[%s378_s1] sm:$0x1] %v183_v57 }
  0xb2   :  { %v187_v58 = vld [vmem:[#allocation0 + $0x8] sm:$0x1] }
  0xb3   :  { %219 = vst [vmem:[%s378_s1 + $0x1] sm:$0x1] %v187_v58 }

// kernel: tile.18
= control target key start
LH: loop header
LB: loop body
LE: loop exit
PB: predicated region body
PF: predicated region fallthrough
CT: control target
= control target key end

     0   :  { %s28_s0 = inlined_call_operand.vmem [shape: f32[16], index: 0, kind: input, shape index: {}]   ;;  %s29_s1 = inlined_call_operand.vmem [shape: f32[10,16], index: 1, kind: output, shape index: {}]  }
   0x1   :  { %v4_v0 = vld [vmem:[%s28_s0] ss:$0 sm:$0xff] }
   0x2   :  { %5 = vst [vmem:[%s29_s1] sm:$0xff] %v4_v0  ;;  %8 = vst [vmem:[%s29_s1 + $0x8] sm:$0xff] %v4_v0 }

// kernel: tile.19
= control target key start
LH: loop header
LB: loop body
LE: loop exit
PB: predicated region body
PF: predicated region fallthrough
CT: control target
= control target key end

     0   :  { %s75_s10 = smov 112   ;;  %s76_s11 = smov 80   ;;  %vm4_vm0 = vcmask 130048   ;;  %vm10_vm1 = vcmask 1048448   ;;  %vm16_vm2 = vcmask 917248   ;;  %vm22_vm3 = vcmask 786048   ;;  %s122_s0 = inlined_call_operand.vmem [shape: f32[10,16], index: 0, kind: input, shape index: {}]   ;;  %s123_s1 = inlined_call_operand.vmem [shape: f32[1,160], index: 1, kind: output, shape index: {}]  }
   0x1   :  { %v60_v0 = vld [vmem:[%s122_s0 + $0x7] sm:$0x1]   ;;  %v62_v1 = vld [vmem:[%s122_s0 + $0x5] sm:$0x1]   ;;  %v61_v2 = vld [vmem:[%s122_s0 + $0x6] sm:$0x1]  }
   0x2   :  { %8 = vrot.lane.b32.xlu0 %v60_v0, %s75_s10  ;;  %20 = vrot.lane.b32.xlu1 %v62_v1, %s76_s11  ;;  %v63_v3 = vld [vmem:[%s122_s0 + $0x4] sm:$0x1]   ;;  %s2_s16 = smov 3  ;;  %s77_s17 = smov 96   ;;  %v64_v5 = vld [vmem:[%s122_s0 + $0x3] sm:$0x1]  }
   0x3   :  { %s78_s18 = smov 64   ;;  %v3_v4 = vld [vmem:[%s122_s0] ss:$8 sm:%s2_s16]   ;;  %v65_v6 = vld [vmem:[%s122_s0 + $0x2] sm:$0x1]   ;;  %s43_s25 = smov 3 }
   0x4   :  { %5 = vst.msk [vmem:[#allocation0] ss:$8 sm:$0x3] %vm4_vm0, %v3_v4   ;;  %s79_s26 = smov 48   ;;  %s80_s27 = smov 32   ;;  %vm28_vm4 = vcmask 654848  }
   0x5   :  { %v66_v7 = vld [vmem:[%s122_s0 + $0x1] ss:$8 sm:%s43_s25]   ;;  %s81_s0 = smov 16   ;;  %vm34_vm5 = vcmask 523648   ;;  %vm40_vm6 = vcmask 392448   ;;  %vm47_vm7 = vcmask 261248  }
   0x6   :  { %14 = vrot.lane.b32.xlu0 %v61_v2, %s77_s17  ;;  %26 = vrot.lane.b32.xlu1 %v63_v3, %s78_s18 }
   0xa   :  { %32 = vrot.lane.b32.xlu0 %v64_v5, %s79_s26  ;;  %38 = vrot.lane.b32.xlu1 %v65_v6, %s80_s27 }
   0xe   :  { %45 = vrot.lane.b32.xlu0 %v66_v7, %s81_s0 }
  0x74   :  { %v9_v8 = vpop.permute.xlu0 %8   ;;  %v21_v9 = vpop.permute.xlu1 %20  }
  0x75   :  { %11 = vst.msk [vmem:[#allocation0] sm:$0x1] %vm10_vm1, %v9_v8  }
  0x78   :  { %v15_v10 = vpop.permute.xlu0 %14   ;;  %v27_v11 = vpop.permute.xlu1 %26  }
  0x79   :  { %17 = vst.msk [vmem:[#allocation0] sm:$0x1] %vm16_vm2, %v15_v10  }
  0x7a   :  { %23 = vst.msk [vmem:[#allocation0] sm:$0x1] %vm22_vm3, %v21_v9  }
  0x7b   :  { %29 = vst.msk [vmem:[#allocation0] sm:$0x1] %vm28_vm4, %v27_v11  }
  0x7c   :  { %v33_v12 = vpop.permute.xlu0 %32   ;;  %v39_v13 = vpop.permute.xlu1 %38  }
  0x7d   :  { %35 = vst.msk [vmem:[#allocation0] sm:$0x1] %vm34_vm5, %v33_v12  }
  0x7e   :  { %41 = vst.msk [vmem:[#allocation0] sm:$0x1] %vm40_vm6, %v39_v13  }
  0x80   :  { %v46_v14 = vpop.permute.xlu0 %45  }
  0x81   :  { %48 = vst.msk [vmem:[#allocation0] ss:$8 sm:$0x3] %vm47_vm7, %v46_v14  }
  0x88   :  { %v52_v15 = vld [vmem:[#allocation0] sm:$0x1]  ;;  %v56_v16 = vld [vmem:[#allocation0 + $0x8] sm:$0x1] }
  0x89   :  { %54 = vst [vmem:[%s123_s1] sm:$0x1] %v52_v15  ;;  %67 = vst [vmem:[%s123_s1 + $0x1] sm:$0x1] %v56_v16 }

// kernel: lenet_forward.1
= control target key start
LH: loop header
LB: loop body
LE: loop exit
PB: predicated region body
PF: predicated region fallthrough
CT: control target
= control target key end

     0   :  { %v4177_v7 = vmov 0.0   ;;  %vm80_vm0 = vcmask 261120   ;;  %s6013_s0 = inlined_call_operand.vmem [shape: f32[80,32], index: 0, kind: input, shape index: {}]   ;;  %s6014_s1 = inlined_call_operand.vmem [shape: f32[5,32,168], index: 1, kind: input, shape index: {}]   ;;  %s6015_s2 = inlined_call_operand.vmem [shape: f32[1,168], index: 2, kind: input, shape index: {}]   ;;  %s6016_s3 = inlined_call_operand.vmem [shape: f32[40,72], index: 3, kind: input, shape index: {}]   ;;  %s6017_s4 = inlined_call_operand.vmem [shape: f32[5,168,160], index: 4, kind: input, shape index: {}]   ;;  %s6018_s5 = inlined_call_operand.vmem [shape: f32[1,160], index: 5, kind: input, shape index: {}]   ;;  %s6019_s6 = inlined_call_operand.vmem [shape: f32[5,2,32], index: 6, kind: input, shape index: {}]   ;;  %s6020_s7 = inlined_call_operand.vmem [shape: f32[5,160,120], index: 7, kind: input, shape index: {}]   ;;  %s6021_s8 = inlined_call_operand.vmem [shape: f32[1,120], index: 8, kind: input, shape index: {}]   ;;  %s6022_s9 = inlined_call_operand.vmem [shape: f32[120,84], index: 9, kind: input, shape index: {}]   ;;  %s6023_s10 = inlined_call_operand.vmem [shape: f32[1,84], index: 10, kind: input, shape index: {}]   ;;  %s6024_s11 = inlined_call_operand.vmem [shape: f32[84,128], index: 11, kind: input, shape index: {}]   ;;  %s6025_s12 = inlined_call_operand.vmem [shape: f32[1,128], index: 12, kind: input, shape index: {}]   ;;  %s6026_s13 = inlined_call_operand.hbm [shape: f32[2,128], index: 13, kind: output, shape index: {}]  }
   0x1   :  { %v3052_v0 = vld [vmem:[%s6014_s1 + $0x48] sm:$0xff]  ;;  %v3054_v1 = vld [vmem:[%s6014_s1 + $0x58] sm:$0xff]  ;;  %v3051_v2 = vld [vmem:[%s6014_s1 + $0x40] sm:$0xff]  ;;  %172 = vmatprep.mubr.f32.mxu0 %v4177_v7  ;;  %1052 = vmatprep.mubr.f32.mxu1 %v4177_v7 }
   0x2   :  { %v3507_v3 = vpack.c.bf16 %v3054_v1, %v3052_v0  ;;  %v3053_v4 = vld [vmem:[%s6014_s1 + $0x50] sm:$0xff]  ;;  %v3056_v5 = vld [vmem:[%s6014_s1 + $0x68] sm:$0xff]  ;;  %v3058_v6 = vld [vmem:[%s6014_s1 + $0x78] sm:$0xff] }
   0x3   :  { %v3509_v8 = vpack.c.bf16 %v3053_v4, %v3051_v2  ;;  %v3511_v9 = vpack.c.bf16 %v3058_v6, %v3056_v5  ;;  %v3055_v10 = vld [vmem:[%s6014_s1 + $0x60] sm:$0xff]  ;;  %v3057_v11 = vld [vmem:[%s6014_s1 + $0x70] sm:$0xff]  ;;  %v55_v13 = vld [vmem:[%s6014_s1 + $0x8] sm:$0xff] }
   0x4   :  { %3508 = vmatprep.subr.bf16.mxu0 %v3507_v3  ;;  %v3513_v12 = vpack.c.bf16 %v3057_v11, %v3055_v10  ;;  %v57_v14 = vld [vmem:[%s6014_s1 + $0x18] sm:$0xff]  ;;  %v54_v15 = vld [vmem:[%s6014_s1] sm:$0xff]  ;;  %v56_v17 = vld [vmem:[%s6014_s1 + $0x10] sm:$0xff] }
   0x5   :  { %3510 = vmatpush1.bf16.msra.mxu0 %v3509_v8  ;;  %v3515_v16 = vpack.c.bf16 %v57_v14, %v55_v13  ;;  %v59_v18 = vld [vmem:[%s6014_s1 + $0x28] sm:$0xff]  ;;  %v61_v19 = vld [vmem:[%s6014_s1 + $0x38] sm:$0xff]  ;;  %v3517_v21 = vpack.c.bf16 %v56_v17, %v54_v15  ;;  %v58_v23 = vld [vmem:[%s6014_s1 + $0x20] sm:$0xff] }
   0x6   :  { %3512 = vmatprep.subr.bf16.mxu0 %v3511_v9  ;;  %v62_v20 = vld [vmem:[%s6013_s0 + $0x1] sm:$0xff]  ;;  %v3519_v22 = vpack.c.bf16 %v61_v19, %v59_v18  ;;  %v60_v24 = vld [vmem:[%s6014_s1 + $0x30] sm:$0xff]  ;;  %v3080_v26 = vld [vmem:[%s6014_s1 + $0x98] sm:$0xff] }
   0x7   :  { %v3078_v25 = vld [vmem:[%s6014_s1 + $0x88] sm:$0xff]  ;;  %v3521_v28 = vpack.c.bf16 %v60_v24, %v58_v23  ;;  %v64_v30 = vld [vmem:[%s6013_s0 + $0x11] sm:$0xff]  ;;  %v65_v31 = vld [vmem:[%s6013_s0 + $0x19] sm:$0xff] }
   0x8   :  { %v63_v27 = vld [vmem:[%s6013_s0 + $0x9] sm:$0xff]  ;;  %v3523_v29 = vpack.c.bf16 %v3080_v26, %v3078_v25  ;;  %v66_v32 = vld [vmem:[%s6013_s0 + $0x21] sm:$0xff] }
   0x9   :  { %3514 = vmatpush1.bf16.msra.mxu0 %v3513_v12 }
   0xa   :  { %3516 = vmatprep.subr.bf16.mxu0 %v3515_v16 }
   0xc   :  { %3059 = vmatmul.mubr.msk.f32.vlgmr.msra.gmra.mrb[0].mxu0 %vm80_vm0, %v62_v20 }
   0xd   :  { %178 = vmatprep.mubr.f32.mxu0 %v4177_v7  ;;  %3518 = vmatpush1.bf16.msra.mxu0 %v3517_v21 }
   0xe   :  { %3520 = vmatprep.subr.bf16.mxu0 %v3519_v22 }
  0x10   :  { %3060 = vmatmul.mubr.msk.f32.gmra.mrb[2].mxu0 %vm80_vm0, %v63_v27 }
  0x11   :  { %184 = vmatprep.mubr.f32.mxu0 %v4177_v7  ;;  %3522 = vmatpush1.bf16.msra.mxu0 %v3521_v28 }
  0x12   :  { %3524 = vmatprep.subr.bf16.mxu0 %v3523_v29 }
  0x14   :  { %3061 = vmatmul.mubr.msk.f32.gmra.mrb[4].mxu0 %vm80_vm0, %v64_v30 }
  0x15   :  { %190 = vmatprep.mubr.f32.mxu0 %v4177_v7 }
  0x18   :  { %3062 = vmatmul.mubr.msk.f32.gmra.mrb[6].mxu0 %vm80_vm0, %v65_v31 }
  0x19   :  { %196 = vmatprep.mubr.f32.mxu0 %v4177_v7 }
  0x1a   :  { %18 = vsyncpa [#allocation4], 0  ;;  %v67_v33 = vld [vmem:[%s6013_s0 + $0x29] sm:$0xff]  ;;  %v68_v34 = vld [vmem:[%s6013_s0 + $0x31] sm:$0xff]  ;;  %vm972_vm1 = vcmask 588800   ;;  %vm1084_vm2 = vcmask 326656  }
  0x1b   :  { %v69_v35 = vld [vmem:[%s6013_s0 + $0x39] sm:$0xff]  ;;  %v70_v36 = vld [vmem:[%s6013_s0 + $0x41] sm:$0xff]  ;;  %v3079_v38 = vld [vmem:[%s6014_s1 + $0x90] sm:$0xff]  ;;  %vm1201_vm3 = vcmask 1046528   ;;  %vm1470_vm4 = vcmask 1045504   ;;  %vm1649_vm5 = vcmask 1044480  }
  0x1c   :  { %3063 = vmatmul.mubr.msk.f32.gmra.mrb[8].mxu0 %vm80_vm0, %v66_v32  ;;  %v3077_v37 = vld [vmem:[%s6014_s1 + $0x80] sm:$0xff]  ;;  %v3082_v39 = vld [vmem:[%s6014_s1 + $0xa8] sm:$0xff]  ;;  %v3084_v40 = vld [vmem:[%s6014_s1 + $0xb8] sm:$0xff]  ;;  %vm1828_vm6 = vcmask 1043456   ;;  %vm4179_vm7 = vmmov 0   ;;  %vm2866_vm8 = vcmask 982016  }
  0x1d   :  { %202 = vmatprep.mubr.f32.mxu0 %v4177_v7  ;;  %v45_v41 = vld [vmem:[%s6013_s0] sm:$0xff]  ;;  %v3525_v42 = vpack.c.bf16 %v3079_v38, %v3077_v37  ;;  %v3527_v43 = vpack.c.bf16 %v3084_v40, %v3082_v39  ;;  %v3083_v45 = vld [vmem:[%s6014_s1 + $0xb0] sm:$0xff]  ;;  %v3095_v46 = vld [vmem:[%s6014_s1 + $0xc8] sm:$0xff]  ;;  %vm2959_vm9 = vcmask 687104  }
  0x1e   :  { %v3081_v44 = vld [vmem:[%s6014_s1 + $0xa0] sm:$0xff]  ;;  %v3097_v47 = vld [vmem:[%s6014_s1 + $0xd8] sm:$0xff]  ;;  %v46_v48 = vld [vmem:[%s6013_s0 + $0x8] sm:$0xff] }
  0x1f   :  { %v3529_v49 = vpack.c.bf16 %v3083_v45, %v3081_v44  ;;  %v3531_v50 = vpack.c.bf16 %v3097_v47, %v3095_v46  ;;  %v47_v51 = vld [vmem:[%s6013_s0 + $0x10] sm:$0xff]  ;;  %v48_v52 = vld [vmem:[%s6013_s0 + $0x18] sm:$0xff]  ;;  %v49_v53 = vld [vmem:[%s6013_s0 + $0x20] sm:$0xff] }
  0x20   :  { %3064 = vmatmul.mubr.msk.f32.gmra.mrb[10].mxu0 %vm80_vm0, %v67_v33  ;;  %v50_v54 = vld [vmem:[%s6013_s0 + $0x28] sm:$0xff]  ;;  %v51_v55 = vld [vmem:[%s6013_s0 + $0x30] sm:$0xff]  ;;  %v52_v56 = vld [vmem:[%s6013_s0 + $0x38] sm:$0xff] }
  0x21   :  { %208 = vmatprep.mubr.f32.mxu0 %v4177_v7  ;;  %v53_v57 = vld [vmem:[%s6013_s0 + $0x40] sm:$0xff]  ;;  %v3096_v59 = vld [vmem:[%s6014_s1 + $0xd0] sm:$0xff]  ;;  %v3099_v60 = vld [vmem:[%s6014_s1 + $0xe8] sm:$0xff] }
  0x22   :  { %v3094_v58 = vld [vmem:[%s6014_s1 + $0xc0] sm:$0xff]  ;;  %v3101_v61 = vld [vmem:[%s6014_s1 + $0xf8] sm:$0xff]  ;;  %v3100_v2 = vld [vmem:[%s6014_s1 + $0xf0] sm:$0xff] }
  0x23   :  { %v373_v62 = vld [vmem:[%s6013_s0 + $0x2] sm:$0xff]  ;;  %v3533_v63 = vpack.c.bf16 %v3096_v59, %v3094_v58  ;;  %v3535_v0 = vpack.c.bf16 %v3101_v61, %v3099_v60  ;;  %v3114_v4 = vld [vmem:[%s6014_s1 + $0x118] sm:$0xff]  ;;  %v374_v5 = vld [vmem:[%s6013_s0 + $0xa] sm:$0xff] }
  0x24   :  { %3065 = vmatmul.mubr.msk.f32.gmra.mrb[12].mxu0 %vm80_vm0, %v68_v34  ;;  %v3098_v1 = vld [vmem:[%s6014_s1 + $0xe0] sm:$0xff]  ;;  %v3112_v3 = vld [vmem:[%s6014_s1 + $0x108] sm:$0xff]  ;;  %v375_v9 = vld [vmem:[%s6013_s0 + $0x12] sm:$0xff] }
  0x25   :  { %214 = vmatprep.mubr.f32.mxu0 %v4177_v7  ;;  %v3537_v6 = vpack.c.bf16 %v3100_v2, %v3098_v1  ;;  %v3539_v8 = vpack.c.bf16 %v3114_v4, %v3112_v3  ;;  %v376_v10 = vld [vmem:[%s6013_s0 + $0x1a] sm:$0xff]  ;;  %v377_v11 = vld [vmem:[%s6013_s0 + $0x22] sm:$0xff]  ;;  %v378_v12 = vld [vmem:[%s6013_s0 + $0x2a] sm:$0xff] }
  0x26   :  { %v379_v13 = vld [vmem:[%s6013_s0 + $0x32] sm:$0xff]  ;;  %v380_v14 = vld [vmem:[%s6013_s0 + $0x3a] sm:$0xff]  ;;  %v381_v15 = vld [vmem:[%s6013_s0 + $0x42] sm:$0xff] }
  0x27   :  { %v3111_v16 = vld [vmem:[%s6014_s1 + $0x100] sm:$0xff]  ;;  %v3113_v17 = vld [vmem:[%s6014_s1 + $0x110] sm:$0xff]  ;;  %v3116_v18 = vld [vmem:[%s6014_s1 + $0x128] sm:$0xff] }
  0x28   :  { %3066 = vmatmul.mubr.msk.f32.gmra.mrb[14].mxu0 %vm80_vm0, %v69_v35  ;;  %v3118_v19 = vld [vmem:[%s6014_s1 + $0x138] sm:$0xff]  ;;  %v555_v20 = vld [vmem:[%s6013_s0 + $0x3] sm:$0xff]  ;;  %v3541_v21 = vpack.c.bf16 %v3113_v17, %v3111_v16  ;;  %v3117_v24 = vld [vmem:[%s6014_s1 + $0x130] sm:$0xff] }
  0x29   :  { %220 = vmatprep.mubr.f32.mxu0 %v4177_v7  ;;  %v3543_v22 = vpack.c.bf16 %v3118_v19, %v3116_v18  ;;  %v3115_v23 = vld [vmem:[%s6014_s1 + $0x120] sm:$0xff]  ;;  %v556_v25 = vld [vmem:[%s6013_s0 + $0xb] sm:$0xff]  ;;  %v557_v27 = vld [vmem:[%s6013_s0 + $0x13] sm:$0xff] }
  0x2a   :  { %v3545_v26 = vpack.c.bf16 %v3117_v24, %v3115_v23  ;;  %v558_v28 = vld [vmem:[%s6013_s0 + $0x1b] sm:$0xff]  ;;  %v559_v29 = vld [vmem:[%s6013_s0 + $0x23] sm:$0xff]  ;;  %v560_v30 = vld [vmem:[%s6013_s0 + $0x2b] sm:$0xff] }
  0x2b   :  { %v561_v31 = vld [vmem:[%s6013_s0 + $0x33] sm:$0xff]  ;;  %v562_v32 = vld [vmem:[%s6013_s0 + $0x3b] sm:$0xff]  ;;  %v563_v33 = vld [vmem:[%s6013_s0 + $0x43] sm:$0xff] }
  0x2c   :  { %3067 = vmatmul.mubr.msk.f32.gmra.mrb[16].mxu0 %vm80_vm0, %v70_v36  ;;  %v737_v34 = vld [vmem:[%s6013_s0 + $0x4] sm:$0xff]  ;;  %v738_v35 = vld [vmem:[%s6013_s0 + $0xc] sm:$0xff]  ;;  %v739_v36 = vld [vmem:[%s6013_s0 + $0x14] sm:$0xff] }
  0x2d   :  { %318 = vmatprep.mubr.f32.mxu0 %v4177_v7  ;;  %v740_v37 = vld [vmem:[%s6013_s0 + $0x1c] sm:$0xff]  ;;  %v741_v38 = vld [vmem:[%s6013_s0 + $0x24] sm:$0xff]  ;;  %v742_v39 = vld [vmem:[%s6013_s0 + $0x2c] sm:$0xff] }
  0x2e   :  { %v743_v40 = vld [vmem:[%s6013_s0 + $0x34] sm:$0xff]  ;;  %v919_v46 = vld [vmem:[%s6015_s2] sm:$0x3]  ;;  %s4180_s2 = smov [#allocation3]  }
  0x30   :  { %3068 = vmatmul.mubr.msk.f32.vlgmr.msra.gmra.mrb[0].mxu0 %vm80_vm0, %v45_v41  ;;  %v744_v41 = vld [vmem:[%s6013_s0 + $0x3c] sm:$0xff] }
  0x31   :  { %324 = vmatprep.mubr.f32.mxu0 %v4177_v7  ;;  %3526 = vmatpush1.bf16.msra.mxu0 %v3525_v42  ;;  %v745_v42 = vld [vmem:[%s6013_s0 + $0x44] sm:$0xff] }
  0x32   :  { %3528 = vmatprep.subr.bf16.mxu0 %v3527_v43  ;;  %v921_v43 = vlaneseq }
  0x34   :  { %3069 = vmatmul.mubr.msk.f32.gmra.mrb[2].mxu0 %vm80_vm0, %v46_v48  ;;  %v4598_v44 = vshrl.u32 %v921_v43, 7 }
  0x35   :  { %330 = vmatprep.mubr.f32.mxu0 %v4177_v7  ;;  %3530 = vmatpush1.bf16.msra.mxu0 %v3529_v49 }
  0x36   :  { %3532 = vmatprep.subr.bf16.mxu0 %v3531_v50  ;;  %v923_v45 = vsub.s32 0, %v4598_v44  ;;  %v927_v47 = vsub.s32 1, %v4598_v44 }
  0x38   :  { %3070 = vmatmul.mubr.msk.f32.gmra.mrb[4].mxu0 %vm80_vm0, %v47_v51  ;;  %v4607_v48 = vrot.slane %v919_v46, %v923_v45  ;;  %v4611_v49 = vrot.slane %v919_v46, %v927_v47 }
  0x39   :  { %336 = vmatprep.mubr.f32.mxu0 %v4177_v7 }
  0x3c   :  { %3071 = vmatmul.mubr.msk.f32.gmra.mrb[6].mxu0 %vm80_vm0, %v48_v52 }
  0x3d   :  { %342 = vmatprep.mubr.f32.mxu0 %v4177_v7 }
  0x40   :  { %3072 = vmatmul.mubr.msk.f32.gmra.mrb[8].mxu0 %vm80_vm0, %v49_v53 }
  0x41   :  { %348 = vmatprep.mubr.f32.mxu0 %v4177_v7 }
  0x44   :  { %3073 = vmatmul.mubr.msk.f32.gmra.mrb[10].mxu0 %vm80_vm0, %v50_v54 }
  0x45   :  { %354 = vmatprep.mubr.f32.mxu0 %v4177_v7 }
  0x48   :  { %3074 = vmatmul.mubr.msk.f32.gmra.mrb[12].mxu0 %vm80_vm0, %v51_v55 }
  0x49   :  { %360 = vmatprep.mubr.f32.mxu0 %v4177_v7 }
  0x4c   :  { %3075 = vmatmul.mubr.msk.f32.gmra.mrb[14].mxu0 %vm80_vm0, %v52_v56 }
  0x4d   :  { %366 = vmatprep.mubr.f32.mxu0 %v4177_v7 }
  0x50   :  { %3076 = vmatmul.mubr.msk.f32.gmra.mrb[16].mxu0 %vm80_vm0, %v53_v57 }
  0x51   :  { %482 = vmatprep.mubr.f32.mxu0 %v4177_v7 }
  0x54   :  { %3085 = vmatmul.mubr.msk.f32.vlgmr.msra.gmra.mrb[0].mxu0 %vm80_vm0, %v373_v62 }
  0x55   :  { %488 = vmatprep.mubr.f32.mxu0 %v4177_v7  ;;  %3534 = vmatpush1.bf16.msra.mxu0 %v3533_v63 }
  0x56   :  { %3536 = vmatprep.subr.bf16.mxu0 %v3535_v0 }
  0x58   :  { %3086 = vmatmul.mubr.msk.f32.gmra.mrb[2].mxu0 %vm80_vm0, %v374_v5 }
  0x59   :  { %494 = vmatprep.mubr.f32.mxu0 %v4177_v7  ;;  %3538 = vmatpush1.bf16.msra.mxu0 %v3537_v6 }
  0x5a   :  { %3540 = vmatprep.subr.bf16.mxu0 %v3539_v8 }
  0x5c   :  { %3087 = vmatmul.mubr.msk.f32.gmra.mrb[4].mxu0 %vm80_vm0, %v375_v9 }
  0x5d   :  { %500 = vmatprep.mubr.f32.mxu0 %v4177_v7 }
  0x60   :  { %3088 = vmatmul.mubr.msk.f32.gmra.mrb[6].mxu0 %vm80_vm0, %v376_v10 }
  0x61   :  { %506 = vmatprep.mubr.f32.mxu0 %v4177_v7 }
  0x64   :  { %3089 = vmatmul.mubr.msk.f32.gmra.mrb[8].mxu0 %vm80_vm0, %v377_v11 }
  0x65   :  { %512 = vmatprep.mubr.f32.mxu0 %v4177_v7 }
  0x68   :  { %3090 = vmatmul.mubr.msk.f32.gmra.mrb[10].mxu0 %vm80_vm0, %v378_v12 }
  0x69   :  { %518 = vmatprep.mubr.f32.mxu0 %v4177_v7 }
  0x6c   :  { %3091 = vmatmul.mubr.msk.f32.gmra.mrb[12].mxu0 %vm80_vm0, %v379_v13 }
  0x6d   :  { %524 = vmatprep.mubr.f32.mxu0 %v4177_v7 }
  0x70   :  { %3092 = vmatmul.mubr.msk.f32.gmra.mrb[14].mxu0 %vm80_vm0, %v380_v14 }
  0x71   :  { %530 = vmatprep.mubr.f32.mxu0 %v4177_v7 }
  0x74   :  { %3093 = vmatmul.mubr.msk.f32.gmra.mrb[16].mxu0 %vm80_vm0, %v381_v15 }
  0x75   :  { %664 = vmatprep.mubr.f32.mxu0 %v4177_v7 }
  0x78   :  { %3102 = vmatmul.mubr.msk.f32.vlgmr.msra.gmra.mrb[0].mxu0 %vm80_vm0, %v555_v20 }
  0x79   :  { %670 = vmatprep.mubr.f32.mxu0 %v4177_v7  ;;  %3542 = vmatpush1.bf16.msra.mxu0 %v3541_v21 }
  0x7a   :  { %3544 = vmatprep.subr.bf16.mxu0 %v3543_v22 }
  0x7c   :  { %3103 = vmatmul.mubr.msk.f32.gmra.mrb[2].mxu0 %vm80_vm0, %v556_v25 }
  0x7d   :  { %676 = vmatprep.mubr.f32.mxu0 %v4177_v7  ;;  %3546 = vmatpush1.bf16.msra.mxu0 %v3545_v26 }
  0x80   :  { %3104 = vmatmul.mubr.msk.f32.gmra.mrb[4].mxu0 %vm80_vm0, %v557_v27 }
  0x81   :  { %682 = vmatprep.mubr.f32.mxu0 %v4177_v7 }
  0x84   :  { %3105 = vmatmul.mubr.msk.f32.gmra.mrb[6].mxu0 %vm80_vm0, %v558_v28 }
  0x85   :  { %688 = vmatprep.mubr.f32.mxu0 %v4177_v7 }
  0x88   :  { %3106 = vmatmul.mubr.msk.f32.gmra.mrb[8].mxu0 %vm80_vm0, %v559_v29 }
  0x89   :  { %694 = vmatprep.mubr.f32.mxu0 %v4177_v7 }
  0x8c   :  { %3107 = vmatmul.mubr.msk.f32.gmra.mrb[10].mxu0 %vm80_vm0, %v560_v30 }
  0x8d   :  { %700 = vmatprep.mubr.f32.mxu0 %v4177_v7 }
  0x90   :  { %3108 = vmatmul.mubr.msk.f32.gmra.mrb[12].mxu0 %vm80_vm0, %v561_v31 }
  0x91   :  { %706 = vmatprep.mubr.f32.mxu0 %v4177_v7 }
  0x94   :  { %3109 = vmatmul.mubr.msk.f32.gmra.mrb[14].mxu0 %vm80_vm0, %v562_v32 }
  0x95   :  { %712 = vmatprep.mubr.f32.mxu0 %v4177_v7 }
  0x98   :  { %3110 = vmatmul.mubr.msk.f32.gmra.mrb[16].mxu0 %vm80_vm0, %v563_v33 }
  0x99   :  { %846 = vmatprep.mubr.f32.mxu0 %v4177_v7 }
  0x9c   :  { %3119 = vmatmul.mubr.msk.f32.vlgmr.msra.gmra.mrb[0].mxu0 %vm80_vm0, %v737_v34 }
  0x9d   :  { %852 = vmatprep.mubr.f32.mxu0 %v4177_v7 }
  0xa0   :  { %3120 = vmatmul.mubr.msk.f32.gmra.mrb[2].mxu0 %vm80_vm0, %v738_v35 }
  0xa1   :  { %858 = vmatprep.mubr.f32.mxu0 %v4177_v7 }
  0xa4   :  { %3121 = vmatmul.mubr.msk.f32.gmra.mrb[4].mxu0 %vm80_vm0, %v739_v36 }
  0xa5   :  { %864 = vmatprep.mubr.f32.mxu0 %v4177_v7 }
  0xa8   :  { %3122 = vmatmul.mubr.msk.f32.gmra.mrb[6].mxu0 %vm80_vm0, %v740_v37 }
  0xa9   :  { %870 = vmatprep.mubr.f32.mxu0 %v4177_v7 }
  0xac   :  { %3123 = vmatmul.mubr.msk.f32.gmra.mrb[8].mxu0 %vm80_vm0, %v741_v38 }
  0xad   :  { %876 = vmatprep.mubr.f32.mxu0 %v4177_v7 }
  0xb0   :  { %3124 = vmatmul.mubr.msk.f32.gmra.mrb[10].mxu0 %vm80_vm0, %v742_v39 }
  0xb1   :  { %882 = vmatprep.mubr.f32.mxu0 %v4177_v7 }
  0xb4   :  { %3125 = vmatmul.mubr.msk.f32.gmra.mrb[12].mxu0 %vm80_vm0, %v743_v40 }
  0xb5   :  { %888 = vmatprep.mubr.f32.mxu0 %v4177_v7 }
  0xb8   :  { %3126 = vmatmul.mubr.msk.f32.gmra.mrb[14].mxu0 %vm80_vm0, %v744_v41 }
  0xb9   :  { %894 = vmatprep.mubr.f32.mxu0 %v4177_v7 }
  0xbc   :  { %3127 = vmatmul.mubr.msk.f32.gmra.mrb[16].mxu0 %vm80_vm0, %v745_v42 }
  0xbd   :  { %2052 = vmatprep.mubr.f32.mxu0 %v4177_v7 }
 0x16f   :  { %v848_v50 = vpop.f32.mrb[0].mxu0 }
 0x170   :  { %v931_v51 = vadd.f32 %v4607_v48, %v848_v50  ;;  %v850_v52 = vpop.f32.mrb[1].mxu0 }
 0x171   :  { %v932_v53 = vadd.f32 %v4611_v49, %v850_v52  ;;  %v3134_v52 = vld [vmem:[%s6017_s4 + $0x158] sm:$0xff] }
 0x172   :  { %4097 = vtanh.f32 %v931_v51 }
 0x173   :  { %v854_v54 = vpop.f32.mrb[2].mxu0  ;;  %4099 = vtanh.f32 %v932_v53  ;;  %v3135_v53 = vld [vmem:[%s6017_s4 + $0x160] sm:$0xff] }
 0x174   :  { %v933_v55 = vadd.f32 %v4607_v48, %v854_v54  ;;  %v856_v56 = vpop.f32.mrb[3].mxu0 }
 0x175   :  { %v934_v57 = vadd.f32 %v4611_v49, %v856_v56  ;;  %v3140_v56 = vld [vmem:[%s6017_s4 + $0x188] sm:$0xff] }
 0x176   :  { %4101 = vtanh.f32 %v933_v55  ;;  %v3138_v55 = vld [vmem:[%s6017_s4 + $0x178] sm:$0xff] }
 0x177   :  { %4103 = vtanh.f32 %v934_v57  ;;  %v860_v58 = vpop.f32.mrb[4].mxu0 }
 0x178   :  { %v935_v59 = vadd.f32 %v4607_v48, %v860_v58  ;;  %v862_v60 = vpop.f32.mrb[5].mxu0  ;;  %v967_v58 = vld [vmem:[%s6016_s3] sm:$0xff] }
 0x179   :  { %v936_v61 = vadd.f32 %v4611_v49, %v862_v60 }
 0x17a   :  { %4105 = vtanh.f32 %v935_v59 }
 0x17b   :  { %v866_v62 = vpop.f32.mrb[6].mxu0  ;;  %4107 = vtanh.f32 %v936_v61  ;;  %v3567_v61 = vpack.c.bf16 %v3140_v56, %v3138_v55  ;;  %v3171_v55 = vld [vmem:[%s6017_s4 + $0x280] sm:$0xff] }
 0x17c   :  { %v937_v63 = vadd.f32 %v4607_v48, %v866_v62  ;;  %v868_v0 = vpop.f32.mrb[7].mxu0  ;;  %v4098_v2 = vpop.eup %4097  ;;  %v3137_v62 = vld [vmem:[%s6017_s4 + $0x170] sm:$0xff] }
 0x17d   :  { %v938_v1 = vadd.f32 %v4611_v49, %v868_v0  ;;  %v4100_v3 = vpop.eup %4099  ;;  %v3142_v0 = vld [vmem:[%s6017_s4 + $0x198] sm:$0xff] }
 0x17e   :  { %4109 = vtanh.f32 %v937_v63  ;;  %v3139_v63 = vld [vmem:[%s6017_s4 + $0x180] sm:$0xff] }
 0x17f   :  { %4111 = vtanh.f32 %v938_v1  ;;  %v872_v4 = vpop.f32.mrb[8].mxu0  ;;  %v3144_v1 = vld [vmem:[%s6017_s4 + $0x1a8] sm:$0xff] }
 0x180   :  { %v4102_v5 = vpop.eup %4101  ;;  %v939_v6 = vadd.f32 %v4607_v48, %v872_v4  ;;  %v874_v8 = vpop.f32.mrb[9].mxu0  ;;  %v3571_v4 = vpack.c.bf16 %v3144_v1, %v3142_v0 }
 0x181   :  { %v4104_v9 = vpop.eup %4103  ;;  %v940_v10 = vadd.f32 %v4611_v49, %v874_v8  ;;  %v3549_v11 = vpack.c.bf16 %v4102_v5, %v4098_v2  ;;  %v968_v2 = vld [vmem:[%s6016_s3 + $0x8] sm:$0xff]  ;;  %v3141_v5 = vld [vmem:[%s6017_s4 + $0x190] sm:$0xff]  ;;  %v3146_v8 = vld [vmem:[%s6017_s4 + $0x1b8] sm:$0xff] }
 0x182   :  { %v3547_v12 = vpack.c.bf16 %v4104_v9, %v4100_v3  ;;  %4113 = vtanh.f32 %v939_v6  ;;  %v3569_v3 = vpack.c.bf16 %v3139_v63, %v3137_v62  ;;  %v3143_v6 = vld [vmem:[%s6017_s4 + $0x1a0] sm:$0xff]  ;;  %v3148_v9 = vld [vmem:[%s6017_s4 + $0x1c8] sm:$0xff] }
 0x183   :  { %v878_v13 = vpop.f32.mrb[10].mxu0  ;;  %4115 = vtanh.f32 %v940_v10  ;;  %v969_v10 = vld [vmem:[%s6016_s3 + $0x10] sm:$0xff] }
 0x184   :  { %v941_v14 = vadd.f32 %v4607_v48, %v878_v13  ;;  %v880_v15 = vpop.f32.mrb[11].mxu0  ;;  %3548 = vmatprep.subr.bf16.mxu1 %v3547_v12  ;;  %v4106_v17 = vpop.eup %4105  ;;  %v3575_v12 = vpack.c.bf16 %v3148_v9, %v3146_v8  ;;  %v3145_v13 = vld [vmem:[%s6017_s4 + $0x1b0] sm:$0xff] }
 0x185   :  { %v942_v16 = vadd.f32 %v4611_v49, %v880_v15  ;;  %3550 = vmatpush1.bf16.msra.mxu1 %v3549_v11  ;;  %v4108_v18 = vpop.eup %4107  ;;  %v3573_v11 = vpack.c.bf16 %v3143_v6, %v3141_v5  ;;  %v3150_v15 = vld [vmem:[%s6017_s4 + $0x1d8] sm:$0xff] }
 0x186   :  { %4117 = vtanh.f32 %v941_v14  ;;  %v3147_v14 = vld [vmem:[%s6017_s4 + $0x1c0] sm:$0xff] }
 0x187   :  { %4119 = vtanh.f32 %v942_v16  ;;  %v884_v19 = vpop.f32.mrb[12].mxu0  ;;  %v3152_v16 = vld [vmem:[%s6017_s4 + $0x1e8] sm:$0xff] }
 0x188   :  { %v4110_v20 = vpop.eup %4109  ;;  %v943_v21 = vadd.f32 %v4607_v48, %v884_v19  ;;  %v886_v22 = vpop.f32.mrb[13].mxu0  ;;  %v3579_v19 = vpack.c.bf16 %v3152_v16, %v3150_v15  ;;  %v1107_v16 = vld [vmem:[%s6017_s4 + $0x28] sm:$0xff] }
 0x189   :  { %v4112_v23 = vpop.eup %4111  ;;  %v944_v24 = vadd.f32 %v4611_v49, %v886_v22  ;;  %v3553_v25 = vpack.c.bf16 %v4110_v20, %v4106_v17  ;;  %v970_v17 = vld [vmem:[%s6016_s3 + $0x18] sm:$0xff]  ;;  %v3149_v20 = vld [vmem:[%s6017_s4 + $0x1d0] sm:$0xff] }
 0x18a   :  { %v3551_v26 = vpack.c.bf16 %v4112_v23, %v4108_v18  ;;  %4121 = vtanh.f32 %v943_v21  ;;  %v3577_v18 = vpack.c.bf16 %v3147_v14, %v3145_v13  ;;  %v3151_v21 = vld [vmem:[%s6017_s4 + $0x1e0] sm:$0xff]  ;;  %v3154_v22 = vld [vmem:[%s6017_s4 + $0x1f8] sm:$0xff]  ;;  %v3156_v23 = vld [vmem:[%s6017_s4 + $0x208] sm:$0xff] }
 0x18b   :  { %v890_v27 = vpop.f32.mrb[14].mxu0  ;;  %4123 = vtanh.f32 %v944_v24  ;;  %v971_v24 = vld [vmem:[%s6016_s3 + $0x20] sm:$0xff]  ;;  %s3043_s3 = sshll.u32 %s4180_s2, 4  ;;  %s3044_s3 = int_to_ptr.vmem [resolvable:$true] %s3043_s3 }
 0x18c   :  { %v945_v28 = vadd.f32 %v4607_v48, %v890_v27  ;;  %v892_v29 = vpop.f32.mrb[15].mxu0  ;;  %3552 = vmatprep.subr.bf16.mxu1 %v3551_v26  ;;  %v4114_v31 = vpop.eup %4113  ;;  %v3583_v26 = vpack.c.bf16 %v3156_v23, %v3154_v22  ;;  %v3153_v27 = vld [vmem:[%s6017_s4 + $0x1f0] sm:$0xff]  ;;  %p4158_p1 = scmp.lt.s32.totalorder %s3044_s3, %s3044_s3 }
 0x18d   :  { %v946_v30 = vadd.f32 %v4611_v49, %v892_v29  ;;  %3554 = vmatpush1.bf16.msra.mxu1 %v3553_v25  ;;  %v4116_v32 = vpop.eup %4115  ;;  %v3581_v25 = vpack.c.bf16 %v3151_v21, %v3149_v20  ;;  %v3158_v29 = vld [vmem:[%s6017_s4 + $0x218] sm:$0xff] }
 0x18e   :  { %4125 = vtanh.f32 %v945_v28  ;;  %v3155_v28 = vld [vmem:[%s6017_s4 + $0x200] sm:$0xff] }
 0x18f   :  { %4127 = vtanh.f32 %v946_v30  ;;  %v896_v33 = vpop.f32.mrb[16].mxu0  ;;  %v3160_v30 = vld [vmem:[%s6017_s4 + $0x228] sm:$0xff] }
 0x190   :  { %v4118_v34 = vpop.eup %4117  ;;  %v898_v35 = vpop.f32.mrb[17].mxu0  ;;  %v947_v39 = vadd.f32 %v4607_v48, %v896_v33  ;;  %v3133_v48 = vld [vmem:[%s6017_s4 + $0x150] sm:$0xff] }
 0x191   :  { %v4120_v36 = vpop.eup %4119  ;;  %v948_v37 = vadd.f32 %v4611_v49, %v898_v35  ;;  %v3557_v38 = vpack.c.bf16 %v4118_v34, %v4114_v31  ;;  %v3136_v49 = vld [vmem:[%s6017_s4 + $0x168] sm:$0xff]  ;;  %v3565_v59 = vpack.c.bf16 %v3135_v53, %v3133_v48  ;;  %v3585_v31 = vpack.c.bf16 %v3155_v28, %v3153_v27  ;;  %v3157_v33 = vld [vmem:[%s6017_s4 + $0x210] sm:$0xff]  ;;  %v3159_v34 = vld [vmem:[%s6017_s4 + $0x220] sm:$0xff] }
 0x192   :  { %v3555_v40 = vpack.c.bf16 %v4120_v36, %v4116_v32  ;;  %v3563_v57 = vpack.c.bf16 %v3136_v49, %v3134_v52  ;;  %v3587_v32 = vpack.c.bf16 %v3160_v30, %v3158_v29  ;;  %v3589_v35 = vpack.c.bf16 %v3159_v34, %v3157_v33  ;;  %v3162_v36 = vld [vmem:[%s6017_s4 + $0x238] sm:$0xff]  ;;  %v3172_v48 = vld [vmem:[%s6017_s4 + $0x288] sm:$0xff] }
 0x193   :  { %4129 = vtanh.f32 %v948_v37  ;;  %v3164_v37 = vld [vmem:[%s6017_s4 + $0x248] sm:$0xff]  ;;  %v3170_v49 = vld [vmem:[%s6017_s4 + $0x278] sm:$0xff] }
 0x194   :  { %3556 = vmatprep.subr.bf16.mxu1 %v3555_v40  ;;  %v4122_v41 = vpop.eup %4121  ;;  %4131 = vtanh.f32 %v947_v39  ;;  %v3161_v39 = vld [vmem:[%s6017_s4 + $0x230] sm:$0xff]  ;;  %v3163_v40 = vld [vmem:[%s6017_s4 + $0x240] sm:$0xff]  ;;  %v3599_v53 = vpack.c.bf16 %v3172_v48, %v3170_v49 }
 0x195   :  { %3558 = vmatpush1.bf16.msra.mxu1 %v3557_v38  ;;  %v4124_v42 = vpop.eup %4123  ;;  %v3591_v38 = vpack.c.bf16 %v3164_v37, %v3162_v36  ;;  %v1106_v36 = vld [vmem:[%s6017_s4 + $0x20] sm:$0xff]  ;;  %v1108_v37 = vld [vmem:[%s6017_s4 + $0x30] sm:$0xff] }
 0x196   :  { %v3609_v49 = vpack.c.bf16 %v1108_v37, %v1106_v36 }
 0x198   :  { %v4126_v43 = vpop.eup %4125 }
 0x199   :  { %v4128_v46 = vpop.eup %4127  ;;  %v3561_v50 = vpack.c.bf16 %v4126_v43, %v4122_v41  ;;  %v3593_v41 = vpack.c.bf16 %v3163_v40, %v3161_v39  ;;  %v3168_v43 = vld [vmem:[%s6017_s4 + $0x268] sm:$0xff] }
 0x19a   :  { %v3559_v51 = vpack.c.bf16 %v4128_v46, %v4124_v42  ;;  %v3166_v42 = vld [vmem:[%s6017_s4 + $0x258] sm:$0xff] }
 0x19b   :  { %v3595_v46 = vpack.c.bf16 %v3168_v43, %v3166_v42  ;;  %v1113_v42 = vld [vmem:[%s6017_s4 + $0x58] sm:$0xff] }
 0x19c   :  { %3560 = vmatprep.subr.bf16.mxu1 %v3559_v51  ;;  %v3167_v51 = vld [vmem:[%s6017_s4 + $0x260] sm:$0xff] }
 0x19d   :  { %v4130_v54 = vpop.eup %4129  ;;  %3562 = vmatpush1.bf16.msra.mxu1 %v3561_v50  ;;  %v3165_v50 = vld [vmem:[%s6017_s4 + $0x250] sm:$0xff] }
 0x19e   :  { %1004 = vmatprep.subr.mxu1 %v4130_v54  ;;  %v4132_v60 = vpop.eup %4131  ;;  %v3597_v52 = vpack.c.bf16 %v3167_v51, %v3165_v50  ;;  %v3169_v54 = vld [vmem:[%s6017_s4 + $0x270] sm:$0xff] }
 0x19f   :  { %v3601_v56 = vpack.c.bf16 %v3171_v55, %v3169_v54 }
 0x1a1   :  { %1005 = vmatpush1.msra.mxu1 %v4132_v60  ;;  %v3173_v60 = vld [vmem:[%s6017_s4 + $0x290] sm:$0xff] }
 0x1a2   :  { %3128 = vmatmul.mubr.msk.f32.vlgmr.msra.gmra.mrb[0].mxu1 %vm972_vm1, %v967_v58  ;;  %3564 = vmatprep.subr.bf16.mxu1 %v3563_v57  ;;  %v3174_v57 = vld [vmem:[%s6017_s4 + $0x298] sm:$0xff]  ;;  %v1103_v58 = vld [vmem:[%s6017_s4 + $0x8] sm:$0xff] }
 0x1a3   :  { %1058 = vmatprep.mubr.f32.mxu1 %v4177_v7  ;;  %3566 = vmatpush1.bf16.msra.mxu1 %v3565_v59  ;;  %v1105_v59 = vld [vmem:[%s6017_s4 + $0x18] sm:$0xff] }
 0x1a4   :  { %3568 = vmatprep.subr.bf16.mxu1 %v3567_v61  ;;  %v3603_v61 = vpack.c.bf16 %v1105_v59, %v1103_v58  ;;  %v1112_v58 = vld [vmem:[%s6017_s4 + $0x50] sm:$0xff] }
 0x1a6   :  { %3129 = vmatmul.mubr.msk.f32.gmra.mrb[2].mxu1 %vm972_vm1, %v968_v2 }
 0x1a7   :  { %1064 = vmatprep.mubr.f32.mxu1 %v4177_v7  ;;  %3570 = vmatpush1.bf16.msra.mxu1 %v3569_v3 }
 0x1a8   :  { %3572 = vmatprep.subr.bf16.mxu1 %v3571_v4 }
 0x1aa   :  { %3130 = vmatmul.mubr.msk.f32.gmra.mrb[4].mxu1 %vm972_vm1, %v969_v10 }
 0x1ab   :  { %1070 = vmatprep.mubr.f32.mxu1 %v4177_v7  ;;  %3574 = vmatpush1.bf16.msra.mxu1 %v3573_v11  ;;  %v1102_v11 = vld [vmem:[%s6017_s4] sm:$0xff] }
 0x1ac   :  { %3576 = vmatprep.subr.bf16.mxu1 %v3575_v12  ;;  %v1104_v12 = vld [vmem:[%s6017_s4 + $0x10] sm:$0xff] }
 0x1ad   :  { %v3605_v28 = vpack.c.bf16 %v1104_v12, %v1102_v11 }
 0x1ae   :  { %3131 = vmatmul.mubr.msk.f32.gmra.mrb[6].mxu1 %vm972_vm1, %v970_v17  ;;  %v1109_v17 = vld [vmem:[%s6017_s4 + $0x38] sm:$0xff] }
 0x1af   :  { %1076 = vmatprep.mubr.f32.mxu1 %v4177_v7  ;;  %3578 = vmatpush1.bf16.msra.mxu1 %v3577_v18 }
 0x1b0   :  { %3580 = vmatprep.subr.bf16.mxu1 %v3579_v19 }
 0x1b2   :  { %3132 = vmatmul.mubr.msk.f32.gmra.mrb[8].mxu1 %vm972_vm1, %v971_v24 }
 0x1b3   :  { %3582 = vmatpush1.bf16.msra.mxu1 %v3581_v25 }
 0x1b4   :  { %3584 = vmatprep.subr.bf16.mxu1 %v3583_v26 }
 0x1b7   :  { %3586 = vmatpush1.bf16.msra.mxu1 %v3585_v31 }
 0x1b8   :  { %3588 = vmatprep.subr.bf16.mxu1 %v3587_v32 }
 0x1bb   :  { %3590 = vmatpush1.bf16.msra.mxu1 %v3589_v35  ;;  %v3607_v35 = vpack.c.bf16 %v1109_v17, %v1107_v16 }
 0x1bc   :  { %3592 = vmatprep.subr.bf16.mxu1 %v3591_v38 }
 0x1bf   :  { %3594 = vmatpush1.bf16.msra.mxu1 %v3593_v41  ;;  %v1111_v41 = vld [vmem:[%s6017_s4 + $0x48] sm:$0xff] }
 0x1c0   :  { %3596 = vmatprep.subr.bf16.mxu1 %v3595_v46 }
 0x1c3   :  { %3598 = vmatpush1.bf16.msra.mxu1 %v3597_v52 }
 0x1c4   :  { %3600 = vmatprep.subr.bf16.mxu1 %v3599_v53 }
 0x1c7   :  { %3602 = vmatpush1.bf16.msra.mxu1 %v3601_v56  ;;  %v3611_v56 = vpack.c.bf16 %v1113_v42, %v1111_v41  ;;  %v1118_v42 = vld [vmem:[%s6017_s4 + $0x80] sm:$0xff] }
 0x1c8   :  { %1272 = vmatprep.subr.mxu1 %v3174_v57  ;;  %v1110_v57 = vld [vmem:[%s6017_s4 + $0x40] sm:$0xff] }
 0x1c9   :  { %v3613_v11 = vpack.c.bf16 %v1112_v58, %v1110_v57  ;;  %v1129_v57 = vld [vmem:[%s6017_s4 + $0xd8] sm:$0xff] }
 0x1cb   :  { %1273 = vmatpush1.msra.mxu1 %v3173_v60 }
 0x1cc   :  { %3604 = vmatprep.subr.bf16.mxu1 %v3603_v61 }
 0x275   :  { %v4787_v62 = vpop.f32.mrb[0].mxu1 }
 0x276   :  { %1083 = vst [vmem:[#allocation2] sm:$0xff] %v4787_v62  ;;  %v1056_v63 = vpop.f32.mrb[1].mxu1 }
 0x277   :  { %1085 = vst.msk [vmem:[#allocation2 + $0x8] sm:$0xff] %vm1084_vm2, %v1056_v63  ;;  %v1115_v63 = vld [vmem:[%s6017_s4 + $0x68] sm:$0xff] }
 0x279   :  { %v4791_v0 = vpop.f32.mrb[2].mxu1 }
 0x27a   :  { %v1062_v1 = vpop.f32.mrb[3].mxu1  ;;  %v1203_v5 = vrot.slane %v4791_v0, 1  ;;  %v1472_v8 = vrot.slane %v4791_v0, 2  ;;  %v1651_v19 = vrot.slane %v4791_v0, 3  ;;  %v1830_v48 = vrot.slane %v4791_v0, 4 }
 0x27b   :  { %1087 = vst.msk [vmem:[#allocation2 + $0x18] sm:$0xff] %vm1084_vm2, %v1062_v1  ;;  %v1117_v1 = vld [vmem:[%s6017_s4 + $0x78] sm:$0xff] }
 0x27c   :  { %v3615_v16 = vpack.c.bf16 %v1117_v1, %v1115_v63  ;;  %v1126_v1 = vld [vmem:[%s6017_s4 + $0xc0] sm:$0xff] }
 0x27d   :  { %v4794_v2 = vpop.f32.mrb[4].mxu1  ;;  %v1144_v4 = vld [vmem:[#allocation2] sm:$0xfe] }
 0x27e   :  { %v1068_v3 = vpop.f32.mrb[5].mxu1  ;;  %v1208_v6 = vrot.slane %v4794_v2, 1  ;;  %v1477_v9 = vrot.slane %v4794_v2, 2  ;;  %v1145_v10 = vld [vmem:[#allocation2 + $0x8] sm:$0xfe]  ;;  %v1202_v15 = vrot.slane %v1144_v4, 1 }
 0x27f   :  { %1089 = vst.msk [vmem:[#allocation2 + $0x28] sm:$0xff] %vm1084_vm2, %v1068_v3  ;;  %v1656_v24 = vrot.slane %v4794_v2, 3  ;;  %v1205_v26 = vrot.slane %v1145_v10, 1  ;;  %v1835_v53 = vrot.slane %v4794_v2, 4 }
 0x280   :  { %v1209_v13 = vsel %vm1201_vm3, %v1203_v5, %v1208_v6  ;;  %v4819_v18 = vsel %vm1470_vm4, %v1472_v8, %v1477_v9  ;;  %v1204_v39 = vsel %vm1201_vm3, %v1202_v15, %v1203_v5 }
 0x281   :  { %v4808_v14 = vpop.f32.mrb[6].mxu1  ;;  %v4843_v31 = vsel %vm1649_vm5, %v1651_v19, %v1656_v24  ;;  %v4905_v3 = vsel %vm1828_vm6, %v1830_v48, %v1835_v53 }
 0x282   :  { %v1074_v20 = vpop.f32.mrb[7].mxu1  ;;  %v4822_v21 = vld [vmem:[#allocation2 + $0x18] sm:$0xff]  ;;  %v1212_v22 = vrot.slane %v4808_v14, 1  ;;  %v1481_v23 = vrot.slane %v4808_v14, 2  ;;  %v1660_v25 = vrot.slane %v4808_v14, 3  ;;  %v1839_v54 = vrot.slane %v4808_v14, 4 }
 0x283   :  { %1091 = vst.msk [vmem:[#allocation2 + $0x38] sm:$0xff] %vm1084_vm2, %v1074_v20  ;;  %v1206_v27 = vrot.slane %v4822_v21, 1  ;;  %v1654_v43 = vrot.slane %v4822_v21, 3  ;;  %v1833_v51 = vrot.slane %v4822_v21, 4  ;;  %v1116_v20 = vld [vmem:[%s6017_s4 + $0x70] sm:$0xff] }
 0x284   :  { %v4833_v29 = vsel %vm1201_vm3, %v1208_v6, %v1212_v22  ;;  %v4838_v30 = vsel %vm1470_vm4, %v1477_v9, %v1481_v23  ;;  %v4848_v32 = vsel %vm1649_vm5, %v1656_v24, %v1660_v25  ;;  %v4910_v4 = vsel %vm1828_vm6, %v1835_v53, %v1839_v54  ;;  %v1122_v53 = vld [vmem:[%s6017_s4 + $0xa0] sm:$0xff] }
 0x285   :  { %v1078_v33 = vpop.f32.mrb[8].mxu1  ;;  %v1207_v34 = vsel %vm1201_vm3, %v1205_v26, %v1206_v27 }
 0x286   :  { %1092 = vst [vmem:[#allocation2 + $0x40] sm:$0xff] %v1078_v33  ;;  %v1080_v38 = vpop.f32.mrb[9].mxu1  ;;  %3175 = vmatprep.mubr.msk.f32.mxu1 %vm1084_vm2, %v1207_v34  ;;  %v4859_v40 = vld [vmem:[#allocation2 + $0x28] sm:$0xff]  ;;  %v1121_v34 = vld [vmem:[%s6017_s4 + $0x98] sm:$0xff] }
 0x287   :  { %1093 = vst.msk [vmem:[#allocation2 + $0x48] sm:$0xff] %vm1084_vm2, %v1080_v38  ;;  %1297 = vmatmul.mubr.f32.vlgmr.msra.gmra.mrb[10].mxu1 %v1204_v39  ;;  %v1210_v46 = vrot.slane %v4859_v40, 1  ;;  %v1658_v50 = vrot.slane %v4859_v40, 3  ;;  %v1837_v52 = vrot.slane %v4859_v40, 4  ;;  %v1479_v6 = vrot.slane %v4859_v40, 2  ;;  %v1119_v33 = vld [vmem:[%s6017_s4 + $0x88] sm:$0xff] }
 0x288   :  { %3606 = vmatpush1.bf16.msra.mxu1 %v3605_v28  ;;  %v3619_v41 = vpack.c.bf16 %v1121_v34, %v1119_v33 }
 0x289   :  { %v1211_v55 = vsel %vm1201_vm3, %v1206_v27, %v1210_v46  ;;  %3608 = vmatprep.subr.bf16.mxu1 %v3607_v35  ;;  %v4886_v59 = vsel %vm1649_vm5, %v1654_v43, %v1658_v50  ;;  %v4891_v60 = vsel %vm1828_vm6, %v1833_v51, %v1837_v52 }
 0x28a   :  { %3176 = vmatprep.mubr.msk.f32.mxu1 %vm1084_vm2, %v1211_v55  ;;  %v4894_v61 = vld [vmem:[#allocation2 + $0x38] sm:$0xff]  ;;  %v1124_v55 = vld [vmem:[%s6017_s4 + $0xb0] sm:$0xff] }
 0x28b   :  { %1303 = vmatmul.mubr.f32.gmra.mrb[12].mxu1 %v1209_v13  ;;  %v1214_v5 = vrot.slane %v4894_v61, 1  ;;  %v1483_v9 = vrot.slane %v4894_v61, 2  ;;  %v1662_v10 = vrot.slane %v4894_v61, 3  ;;  %v1841_v12 = vrot.slane %v4894_v61, 4  ;;  %v1114_v13 = vld [vmem:[%s6017_s4 + $0x60] sm:$0xff] }
 0x28c   :  { %3610 = vmatpush1.bf16.msra.mxu1 %v3609_v49  ;;  %v3617_v38 = vpack.c.bf16 %v1116_v20, %v1114_v13  ;;  %v3625_v58 = vpack.c.bf16 %v1124_v55, %v1122_v53  ;;  %v1130_v13 = vld [vmem:[%s6017_s4 + $0xe0] sm:$0xff]  ;;  %v1132_v20 = vld [vmem:[%s6017_s4 + $0xf0] sm:$0xff] }
 0x28d   :  { %v1215_v15 = vsel %vm1201_vm3, %v1210_v46, %v1214_v5  ;;  %3612 = vmatprep.subr.bf16.mxu1 %v3611_v56  ;;  %v1146_v17 = vld [vmem:[#allocation2 + $0x40] sm:$0x1]  ;;  %v4929_v24 = vsel %vm1470_vm4, %v1479_v6, %v1483_v9  ;;  %v4934_v26 = vsel %vm1649_vm5, %v1658_v50, %v1662_v10  ;;  %v4946_v35 = vsel %vm1828_vm6, %v1837_v52, %v1841_v12  ;;  %v1120_v46 = vld [vmem:[%s6017_s4 + $0x90] sm:$0xff]  ;;  %v1095_v50 = vld [vmem:[#allocation2 + $0x8] sm:$0xff] }
 0x28e   :  { %3177 = vmatprep.mubr.msk.f32.mxu1 %vm1084_vm2, %v1215_v15  ;;  %v1147_v27 = vld [vmem:[#allocation2 + $0x48] sm:$0x1]  ;;  %v1216_v28 = vrot.slane %v1146_v17, 1  ;;  %v3621_v52 = vpack.c.bf16 %v1120_v46, %v1118_v42  ;;  %v1133_v15 = vld [vmem:[%s6017_s4 + $0xf8] sm:$0xff]  ;;  %v3633_v33 = vpack.c.bf16 %v1132_v20, %v1130_v13  ;;  %v1138_v46 = vld [vmem:[%s6017_s4 + $0x120] sm:$0xff] }
 0x28f   :  { %1309 = vmatmul.mubr.f32.gmra.mrb[14].mxu1 %v4833_v29  ;;  %v1218_v36 = vrot.slane %v1147_v27, 1  ;;  %v1123_v29 = vld [vmem:[%s6017_s4 + $0xa8] sm:$0xff]  ;;  %v3183_v53 = vld [vmem:[%s6017_s4 + $0x2a0] sm:$0xff]  ;;  %v3185_v55 = vld [vmem:[%s6017_s4 + $0x2b0] sm:$0xff] }
 0x290   :  { %3614 = vmatpush1.bf16.msra.mxu1 %v3613_v11  ;;  %v1217_v37 = vsel %vm1201_vm3, %v1212_v22, %v1216_v28  ;;  %v1125_v22 = vld [vmem:[%s6017_s4 + $0xb8] sm:$0xff]  ;;  %v1127_v56 = vld [vmem:[%s6017_s4 + $0xc8] sm:$0xff] }
 0x291   :  { %v1219_v39 = vsel %vm1201_vm3, %v1214_v5, %v1218_v36  ;;  %3616 = vmatprep.subr.bf16.mxu1 %v3615_v16  ;;  %v3623_v49 = vpack.c.bf16 %v1125_v22, %v1123_v29  ;;  %v3627_v63 = vpack.c.bf16 %v1129_v57, %v1127_v56  ;;  %v1128_v5 = vld [vmem:[%s6017_s4 + $0xd0] sm:$0xff]  ;;  %v1131_v11 = vld [vmem:[%s6017_s4 + $0xe8] sm:$0xff]  ;;  %v1137_v28 = vld [vmem:[%s6017_s4 + $0x118] sm:$0xff] }
 0x292   :  { %3178 = vmatprep.mubr.msk.f32.mxu1 %vm1084_vm2, %v1219_v39  ;;  %v3629_v16 = vpack.c.bf16 %v1128_v5, %v1126_v1  ;;  %v3631_v17 = vpack.c.bf16 %v1133_v15, %v1131_v11  ;;  %v1135_v27 = vld [vmem:[%s6017_s4 + $0x108] sm:$0xff]  ;;  %v1134_v36 = vld [vmem:[%s6017_s4 + $0x100] sm:$0xff]  ;;  %v1141_v39 = vld [vmem:[%s6017_s4 + $0x138] sm:$0xff]  ;;  %v3645_v1 = vpack.c.bf16 %v3185_v55, %v3183_v53 }
 0x293   :  { %1315 = vmatmul.mubr.f32.gmra.mrb[16].mxu1 %v1217_v37  ;;  %v3635_v34 = vpack.c.bf16 %v1137_v28, %v1135_v27  ;;  %v1136_v37 = vld [vmem:[%s6017_s4 + $0x110] sm:$0xff]  ;;  %v3188_v56 = vld [vmem:[%s6017_s4 + $0x2c8] sm:$0xff]  ;;  %v3190_v57 = vld [vmem:[%s6017_s4 + $0x2d8] sm:$0xff] }
 0x294   :  { %3618 = vmatpush1.bf16.msra.mxu1 %v3617_v38  ;;  %3179 = vmatprep.mubr.msk.f32.mxu1 %vm1084_vm2, %v1095_v50  ;;  %v1139_v38 = vld [vmem:[%s6017_s4 + $0x128] sm:$0xff]  ;;  %v1140_v29 = vld [vmem:[%s6017_s4 + $0x130] sm:$0xff]  ;;  %v3647_v5 = vpack.c.bf16 %v3190_v57, %v3188_v56  ;;  %v3187_v11 = vld [vmem:[%s6017_s4 + $0x2c0] sm:$0xff] }
 0x295   :  { %3620 = vmatprep.subr.bf16.mxu1 %v3619_v41  ;;  %v3637_v41 = vpack.c.bf16 %v1136_v37, %v1134_v36  ;;  %v3639_v42 = vpack.c.bf16 %v1141_v39, %v1139_v38  ;;  %v3641_v22 = vpack.c.bf16 %v1140_v29, %v1138_v46  ;;  %v1143_v50 = vld [vmem:[%s6017_s4 + $0x148] sm:$0xff]  ;;  %v3189_v15 = vld [vmem:[%s6017_s4 + $0x2d0] sm:$0xff]  ;;  %v3191_v27 = vld [vmem:[%s6017_s4 + $0x2e0] sm:$0xff]  ;;  %v1475_v46 = vrot.slane %v4822_v21, 2 }
 0x296   :  { %v3649_v13 = vpack.c.bf16 %v3189_v15, %v3187_v11  ;;  %v3193_v28 = vld [vmem:[%s6017_s4 + $0x2f0] sm:$0xff]  ;;  %v3195_v37 = vld [vmem:[%s6017_s4 + $0x300] sm:$0xff]  ;;  %v1420_v39 = vld [vmem:[#allocation2 + $0x8] sm:$0xfc] }
 0x297   :  { %v3197_v38 = vld [vmem:[%s6017_s4 + $0x310] sm:$0xff]  ;;  %v3206_v53 = vld [vmem:[%s6017_s4 + $0x358] sm:$0xff] }
 0x298   :  { %3622 = vmatpush1.bf16.msra.mxu1 %v3621_v52  ;;  %v3184_v52 = vld [vmem:[%s6017_s4 + $0x2a8] sm:$0xff]  ;;  %v3657_v29 = vpack.c.bf16 %v3197_v38, %v3195_v37 }
 0x299   :  { %3624 = vmatprep.subr.bf16.mxu1 %v3623_v49  ;;  %v3186_v49 = vld [vmem:[%s6017_s4 + $0x2b8] sm:$0xff] }
 0x29c   :  { %3626 = vmatpush1.bf16.msra.mxu1 %v3625_v58  ;;  %v1142_v58 = vld [vmem:[%s6017_s4 + $0x140] sm:$0xff] }
 0x29d   :  { %3628 = vmatprep.subr.bf16.mxu1 %v3627_v63  ;;  %v3643_v63 = vpack.c.bf16 %v3186_v49, %v3184_v52  ;;  %v3199_v52 = vld [vmem:[%s6017_s4 + $0x320] sm:$0xff]  ;;  %v3201_v49 = vld [vmem:[%s6017_s4 + $0x330] sm:$0xff] }
 0x29e   :  { %v3661_v56 = vpack.c.bf16 %v3201_v49, %v3199_v52  ;;  %v3219_v52 = vld [vmem:[%s6017_s4 + $0x3c0] sm:$0xff]  ;;  %v3221_v49 = vld [vmem:[%s6017_s4 + $0x3d0] sm:$0xff] }
 0x2a0   :  { %3630 = vmatpush1.bf16.msra.mxu1 %v3629_v16  ;;  %v3192_v16 = vld [vmem:[%s6017_s4 + $0x2e8] sm:$0xff] }
 0x2a1   :  { %3632 = vmatprep.subr.bf16.mxu1 %v3631_v17  ;;  %v3194_v17 = vld [vmem:[%s6017_s4 + $0x2f8] sm:$0xff] }
 0x2a2   :  { %v3651_v20 = vpack.c.bf16 %v3194_v17, %v3192_v16  ;;  %v3207_v16 = vld [vmem:[%s6017_s4 + $0x360] sm:$0xff]  ;;  %v3209_v17 = vld [vmem:[%s6017_s4 + $0x370] sm:$0xff] }
 0x2a4   :  { %3634 = vmatpush1.bf16.msra.mxu1 %v3633_v33  ;;  %v3198_v33 = vld [vmem:[%s6017_s4 + $0x318] sm:$0xff] }
 0x2a5   :  { %3636 = vmatprep.subr.bf16.mxu1 %v3635_v34  ;;  %v3653_v34 = vpack.c.bf16 %v3193_v28, %v3191_v27  ;;  %v3669_v27 = vpack.c.bf16 %v3209_v17, %v3207_v16 }
 0x2a8   :  { %3638 = vmatpush1.bf16.msra.mxu1 %v3637_v41  ;;  %v3200_v41 = vld [vmem:[%s6017_s4 + $0x328] sm:$0xff] }
 0x2a9   :  { %3640 = vmatprep.subr.bf16.mxu1 %v3639_v42  ;;  %v3202_v42 = vld [vmem:[%s6017_s4 + $0x338] sm:$0xff] }
 0x2ac   :  { %3642 = vmatpush1.bf16.msra.mxu1 %v3641_v22  ;;  %v1474_v22 = vrot.slane %v1420_v39, 2  ;;  %v3215_v39 = vld [vmem:[%s6017_s4 + $0x3a0] sm:$0xff] }
 0x2ad   :  { %1370 = vmatprep.subr.mxu1 %v1143_v50  ;;  %v3659_v50 = vpack.c.bf16 %v3202_v42, %v3200_v41  ;;  %v3217_v41 = vld [vmem:[%s6017_s4 + $0x3b0] sm:$0xff]  ;;  %v3220_v42 = vld [vmem:[%s6017_s4 + $0x3c8] sm:$0xff] }
 0x2ae   :  { %v1476_v55 = vsel %vm1470_vm4, %v1474_v22, %v1475_v46  ;;  %v3677_v22 = vpack.c.bf16 %v3217_v41, %v3215_v39  ;;  %v3239_v39 = vld [vmem:[%s6017_s4 + $0x440] sm:$0xff] }
 0x2af   :  { %v1421_v41 = vld [vmem:[#allocation2 + $0x40] sm:$0x3] }
 0x2b0   :  { %1371 = vmatpush1.msra.mxu1 %v1142_v58  ;;  %v3203_v58 = vld [vmem:[%s6017_s4 + $0x340] sm:$0xff] }
 0x2b1   :  { %1395 = vmatmul.mubr.f32.vlgmr.msra.gmra.mrb[10].mxu1 %v4787_v62  ;;  %3644 = vmatprep.subr.bf16.mxu1 %v3643_v63  ;;  %v3196_v62 = vld [vmem:[%s6017_s4 + $0x308] sm:$0xff]  ;;  %v3205_v63 = vld [vmem:[%s6017_s4 + $0x350] sm:$0xff] }
 0x2b2   :  { %3180 = vmatprep.mubr.msk.f32.mxu1 %vm1084_vm2, %v4822_v21  ;;  %3646 = vmatpush1.bf16.msra.mxu1 %v3645_v1  ;;  %v3655_v36 = vpack.c.bf16 %v3198_v33, %v3196_v62  ;;  %v3208_v1 = vld [vmem:[%s6017_s4 + $0x368] sm:$0xff]  ;;  %v3665_v11 = vpack.c.bf16 %v3205_v63, %v3203_v58  ;;  %v3211_v62 = vld [vmem:[%s6017_s4 + $0x380] sm:$0xff]  ;;  %v3213_v33 = vld [vmem:[%s6017_s4 + $0x390] sm:$0xff] }
 0x2b3   :  { %3648 = vmatprep.subr.bf16.mxu1 %v3647_v5  ;;  %v3210_v5 = vld [vmem:[%s6017_s4 + $0x378] sm:$0xff]  ;;  %v3673_v37 = vpack.c.bf16 %v3213_v33, %v3211_v62  ;;  %v3229_v58 = vld [vmem:[%s6017_s4 + $0x3f0] sm:$0xff]  ;;  %v3231_v63 = vld [vmem:[%s6017_s4 + $0x400] sm:$0xff] }
 0x2b4   :  { %v3667_v15 = vpack.c.bf16 %v3210_v5, %v3208_v1  ;;  %v3234_v5 = vld [vmem:[%s6017_s4 + $0x418] sm:$0xff]  ;;  %v3685_v17 = vpack.c.bf16 %v3231_v63, %v3229_v58  ;;  %v3240_v33 = vld [vmem:[%s6017_s4 + $0x448] sm:$0xff]  ;;  %v3247_v58 = vld [vmem:[%s6017_s4 + $0x480] sm:$0xff] }
 0x2b5   :  { %1401 = vmatmul.mubr.f32.gmra.mrb[12].mxu1 %v4791_v0  ;;  %v3238_v62 = vld [vmem:[%s6017_s4 + $0x438] sm:$0xff]  ;;  %v3252_v63 = vld [vmem:[%s6017_s4 + $0x4a8] sm:$0xff] }
 0x2b6   :  { %3181 = vmatprep.mubr.msk.f32.mxu1 %vm1084_vm2, %v4859_v40  ;;  %3650 = vmatpush1.bf16.msra.mxu1 %v3649_v13  ;;  %v3212_v13 = vld [vmem:[%s6017_s4 + $0x388] sm:$0xff]  ;;  %v3242_v40 = vld [vmem:[%s6017_s4 + $0x458] sm:$0xff] }
 0x2b7   :  { %3652 = vmatprep.subr.bf16.mxu1 %v3651_v20  ;;  %v3214_v20 = vld [vmem:[%s6017_s4 + $0x398] sm:$0xff]  ;;  %v3300_v21 = vld [vmem:[%s6017_s4 + $0x608] sm:$0xff] }
 0x2b8   :  { %v3671_v28 = vpack.c.bf16 %v3214_v20, %v3212_v13  ;;  %v3233_v20 = vld [vmem:[%s6017_s4 + $0x410] sm:$0xff]  ;;  %v2064_v0 = vld [vmem:[%s6020_s7 + $0x28] sm:$0xff] }
 0x2b9   :  { %1407 = vmatmul.mubr.f32.gmra.mrb[14].mxu1 %v4794_v2  ;;  %v3204_v2 = vld [vmem:[%s6017_s4 + $0x348] sm:$0xff] }
 0x2ba   :  { %3182 = vmatprep.mubr.msk.f32.mxu1 %vm1084_vm2, %v4894_v61  ;;  %3654 = vmatpush1.bf16.msra.mxu1 %v3653_v34  ;;  %v3663_v57 = vpack.c.bf16 %v3206_v53, %v3204_v2  ;;  %v3216_v34 = vld [vmem:[%s6017_s4 + $0x3a8] sm:$0xff]  ;;  %v3681_v2 = vpack.c.bf16 %v3221_v49, %v3219_v52  ;;  %v1419_v53 = vld [vmem:[#allocation2] sm:$0xfc]  ;;  %v1485_v52 = vrot.slane %v1421_v41, 2  ;;  %v3266_v41 = vld [vmem:[%s6017_s4 + $0x518] sm:$0xff] }
 0x2bb   :  { %3656 = vmatprep.subr.bf16.mxu1 %v3655_v36  ;;  %v3218_v36 = vld [vmem:[%s6017_s4 + $0x3b8] sm:$0xff]  ;;  %v1471_v1 = vrot.slane %v1419_v53, 2  ;;  %v1599_v49 = vld [vmem:[#allocation2 + $0x8] sm:$0xf8]  ;;  %v2067_v61 = vld [vmem:[%s6020_s7 + $0x40] sm:$0xff] }
 0x2bc   :  { %v3675_v38 = vpack.c.bf16 %v3218_v36, %v3216_v34  ;;  %v1480_v34 = vsel %vm1470_vm4, %v1475_v46, %v1479_v6  ;;  %v1422_v36 = vld [vmem:[#allocation2 + $0x48] sm:$0x3] }
 0x2bd   :  { %1413 = vmatmul.mubr.f32.gmra.mrb[16].mxu1 %v4808_v14  ;;  %v3244_v6 = vld [vmem:[%s6017_s4 + $0x468] sm:$0xff]  ;;  %v1487_v46 = vrot.slane %v1422_v36, 2  ;;  %v3259_v36 = vld [vmem:[%s6017_s4 + $0x4e0] sm:$0xff]  ;;  %v2069_v14 = vld [vmem:[%s6020_s7 + $0x50] sm:$0xff] }
 0x2be   :  { %3658 = vmatpush1.bf16.msra.mxu1 %v3657_v29  ;;  %3225 = vmatprep.mubr.msk.f32.mxu1 %vm1084_vm2, %v1476_v55  ;;  %v3222_v29 = vld [vmem:[%s6017_s4 + $0x3d8] sm:$0xff]  ;;  %v3224_v55 = vld [vmem:[%s6017_s4 + $0x3e8] sm:$0xff] }
 0x2bf   :  { %3660 = vmatprep.subr.bf16.mxu1 %v3659_v50  ;;  %v3679_v50 = vpack.c.bf16 %v3222_v29, %v3220_v42  ;;  %v3695_v29 = vpack.c.bf16 %v3244_v6, %v3242_v40  ;;  %v3261_v6 = vld [vmem:[%s6017_s4 + $0x4f0] sm:$0xff] }
 0x2c2   :  { %3662 = vmatpush1.bf16.msra.mxu1 %v3661_v56  ;;  %v3230_v56 = vld [vmem:[%s6017_s4 + $0x3f8] sm:$0xff] }
 0x2c3   :  { %3664 = vmatprep.subr.bf16.mxu1 %v3663_v57  ;;  %v3232_v57 = vld [vmem:[%s6017_s4 + $0x408] sm:$0xff] }
 0x2c4   :  { %v3683_v16 = vpack.c.bf16 %v3232_v57, %v3230_v56  ;;  %v3245_v57 = vld [vmem:[%s6017_s4 + $0x470] sm:$0xff] }
 0x2c6   :  { %3666 = vmatpush1.bf16.msra.mxu1 %v3665_v11  ;;  %v3236_v11 = vld [vmem:[%s6017_s4 + $0x428] sm:$0xff] }
 0x2c7   :  { %3668 = vmatprep.subr.bf16.mxu1 %v3667_v15  ;;  %v3223_v15 = vld [vmem:[%s6017_s4 + $0x3e0] sm:$0xff]  ;;  %v3687_v13 = vpack.c.bf16 %v3236_v11, %v3234_v5  ;;  %v3701_v5 = vpack.c.bf16 %v3247_v58, %v3245_v57  ;;  %v3280_v58 = vld [vmem:[%s6017_s4 + $0x568] sm:$0xff] }
 0x2ca   :  { %3670 = vmatpush1.bf16.msra.mxu1 %v3669_v27  ;;  %v3235_v27 = vld [vmem:[%s6017_s4 + $0x420] sm:$0xff] }
 0x2cb   :  { %3672 = vmatprep.subr.bf16.mxu1 %v3671_v28  ;;  %v1473_v28 = vsel %vm1470_vm4, %v1471_v1, %v1472_v8  ;;  %v3689_v8 = vpack.c.bf16 %v3235_v27, %v3233_v20  ;;  %v3253_v20 = vld [vmem:[%s6017_s4 + $0x4b0] sm:$0xff]  ;;  %v3255_v27 = vld [vmem:[%s6017_s4 + $0x4c0] sm:$0xff] }
 0x2ce   :  { %3674 = vmatpush1.bf16.msra.mxu1 %v3673_v37  ;;  %v3691_v37 = vpack.c.bf16 %v3240_v33, %v3238_v62  ;;  %v3260_v62 = vld [vmem:[%s6017_s4 + $0x4e8] sm:$0xff]  ;;  %v3709_v33 = vpack.c.bf16 %v3255_v27, %v3253_v20  ;;  %v3285_v27 = vld [vmem:[%s6017_s4 + $0x590] sm:$0xff] }
 0x2cf   :  { %3676 = vmatprep.subr.bf16.mxu1 %v3675_v38  ;;  %v3237_v38 = vld [vmem:[%s6017_s4 + $0x430] sm:$0xff] }
 0x2d0   :  { %v3693_v42 = vpack.c.bf16 %v3239_v39, %v3237_v38  ;;  %v3264_v38 = vld [vmem:[%s6017_s4 + $0x508] sm:$0xff] }
 0x2d2   :  { %3678 = vmatpush1.bf16.msra.mxu1 %v3677_v22  ;;  %v3241_v22 = vld [vmem:[%s6017_s4 + $0x450] sm:$0xff] }
 0x2d3   :  { %3680 = vmatprep.subr.bf16.mxu1 %v3679_v50  ;;  %v3243_v50 = vld [vmem:[%s6017_s4 + $0x460] sm:$0xff] }
 0x2d4   :  { %v3697_v53 = vpack.c.bf16 %v3243_v50, %v3241_v22  ;;  %v3265_v50 = vld [vmem:[%s6017_s4 + $0x510] sm:$0xff] }
 0x2d6   :  { %3682 = vmatpush1.bf16.msra.mxu1 %v3681_v2  ;;  %v1488_v2 = vsel %vm1470_vm4, %v1483_v9, %v1487_v46  ;;  %v3250_v9 = vld [vmem:[%s6017_s4 + $0x498] sm:$0xff]  ;;  %v3263_v46 = vld [vmem:[%s6017_s4 + $0x500] sm:$0xff] }
 0x2d7   :  { %1541 = vmatprep.subr.mxu1 %v3224_v55  ;;  %v1653_v55 = vrot.slane %v1599_v49, 3  ;;  %v3703_v11 = vpack.c.bf16 %v3252_v63, %v3250_v9  ;;  %v3269_v9 = vld [vmem:[%s6017_s4 + $0x530] sm:$0xff] }
 0x2d9   :  { %v1655_v1 = vsel %vm1649_vm5, %v1653_v55, %v1654_v43  ;;  %v3256_v43 = vld [vmem:[%s6017_s4 + $0x4c8] sm:$0xff]  ;;  %v3275_v55 = vld [vmem:[%s6017_s4 + $0x540] sm:$0xff] }
 0x2da   :  { %1542 = vmatpush1.msra.mxu1 %v3223_v15  ;;  %v3251_v15 = vld [vmem:[%s6017_s4 + $0x4a0] sm:$0xff] }
 0x2db   :  { %1566 = vmatmul.mubr.f32.vlgmr.msra.gmra.mrb[10].mxu1 %v1473_v28  ;;  %3684 = vmatprep.subr.bf16.mxu1 %v3683_v16  ;;  %v3254_v16 = vld [vmem:[%s6017_s4 + $0x4b8] sm:$0xff] }
 0x2dc   :  { %3226 = vmatprep.mubr.msk.f32.mxu1 %vm1084_vm2, %v1480_v34  ;;  %3686 = vmatpush1.bf16.msra.mxu1 %v3685_v17  ;;  %v3258_v28 = vld [vmem:[%s6017_s4 + $0x4d8] sm:$0xff] }
 0x2dd   :  { %3688 = vmatprep.subr.bf16.mxu1 %v3687_v13  ;;  %v3707_v13 = vpack.c.bf16 %v3256_v43, %v3254_v16  ;;  %v3711_v34 = vpack.c.bf16 %v3260_v62, %v3258_v28  ;;  %v3284_v16 = vld [vmem:[%s6017_s4 + $0x588] sm:$0xff]  ;;  %v3286_v43 = vld [vmem:[%s6017_s4 + $0x598] sm:$0xff] }
 0x2de   :  { %v3731_v20 = vpack.c.bf16 %v3286_v43, %v3284_v16  ;;  %v3288_v28 = vld [vmem:[%s6017_s4 + $0x5a8] sm:$0xff]  ;;  %v3309_v16 = vld [vmem:[%s6017_s4 + $0x650] sm:$0xff] }
 0x2df   :  { %1572 = vmatmul.mubr.f32.gmra.mrb[12].mxu1 %v4819_v18  ;;  %v3246_v18 = vld [vmem:[%s6017_s4 + $0x478] sm:$0xff]  ;;  %v3312_v43 = vld [vmem:[%s6017_s4 + $0x668] sm:$0xff] }
 0x2e0   :  { %3227 = vmatprep.mubr.msk.f32.mxu1 %vm1084_vm2, %v4929_v24  ;;  %3690 = vmatpush1.bf16.msra.mxu1 %v3689_v8  ;;  %v3248_v24 = vld [vmem:[%s6017_s4 + $0x488] sm:$0xff]  ;;  %v3257_v8 = vld [vmem:[%s6017_s4 + $0x4d0] sm:$0xff] }
 0x2e1   :  { %3692 = vmatprep.subr.bf16.mxu1 %v3691_v37  ;;  %v3699_v56 = vpack.c.bf16 %v3248_v24, %v3246_v18  ;;  %v3262_v37 = vld [vmem:[%s6017_s4 + $0x4f8] sm:$0xff]  ;;  %v3713_v39 = vpack.c.bf16 %v3259_v36, %v3257_v8  ;;  %v1598_v18 = vld [vmem:[#allocation2] sm:$0xf8] }
 0x2e2   :  { %v3715_v40 = vpack.c.bf16 %v3264_v38, %v3262_v37  ;;  %v3270_v24 = vld [vmem:[%s6017_s4 + $0x538] sm:$0xff]  ;;  %v1650_v57 = vrot.slane %v1598_v18, 3  ;;  %v3287_v36 = vld [vmem:[%s6017_s4 + $0x5a0] sm:$0xff]  ;;  %v3289_v37 = vld [vmem:[%s6017_s4 + $0x5b0] sm:$0xff] }
 0x2e3   :  { %1578 = vmatmul.mubr.f32.gmra.mrb[14].mxu1 %v4838_v30  ;;  %v1486_v30 = vsel %vm1470_vm4, %v1481_v23, %v1485_v52  ;;  %v3249_v23 = vld [vmem:[%s6017_s4 + $0x490] sm:$0xff]  ;;  %v3267_v52 = vld [vmem:[%s6017_s4 + $0x520] sm:$0xff] }
 0x2e4   :  { %3228 = vmatprep.mubr.msk.f32.mxu1 %vm1084_vm2, %v1488_v2  ;;  %3694 = vmatpush1.bf16.msra.mxu1 %v3693_v42  ;;  %v3705_v17 = vpack.c.bf16 %v3251_v15, %v3249_v23  ;;  %v3268_v42 = vld [vmem:[%s6017_s4 + $0x528] sm:$0xff]  ;;  %v3721_v49 = vpack.c.bf16 %v3267_v52, %v3265_v50  ;;  %v3281_v23 = vld [vmem:[%s6017_s4 + $0x570] sm:$0xff]  ;;  %v1652_v15 = vsel %vm1649_vm5, %v1650_v57, %v1651_v19  ;;  %v3283_v19 = vld [vmem:[%s6017_s4 + $0x580] sm:$0xff] }
 0x2e5   :  { %3696 = vmatprep.subr.bf16.mxu1 %v3695_v29  ;;  %v3717_v29 = vpack.c.bf16 %v3263_v46, %v3261_v6  ;;  %v3719_v22 = vpack.c.bf16 %v3268_v42, %v3266_v41  ;;  %v3276_v2 = vld [vmem:[%s6017_s4 + $0x548] sm:$0xff]  ;;  %v3737_v6 = vpack.c.bf16 %v3289_v37, %v3287_v36  ;;  %v3291_v42 = vld [vmem:[%s6017_s4 + $0x5c0] sm:$0xff]  ;;  %v3297_v18 = vld [vmem:[%s6017_s4 + $0x5f0] sm:$0xff] }
 0x2e6   :  { %v3306_v57 = vld [vmem:[%s6017_s4 + $0x638] sm:$0xff]  ;;  %v3315_v36 = vld [vmem:[%s6017_s4 + $0x680] sm:$0xff] }
 0x2e7   :  { %1584 = vmatmul.mubr.f32.gmra.mrb[16].mxu1 %v1486_v30  ;;  %v3282_v30 = vld [vmem:[%s6017_s4 + $0x578] sm:$0xff] }
 0x2e8   :  { %3698 = vmatpush1.bf16.msra.mxu1 %v3697_v53  ;;  %3271 = vmatprep.mubr.msk.f32.mxu1 %vm1084_vm2, %v1655_v1  ;;  %v3278_v53 = vld [vmem:[%s6017_s4 + $0x558] sm:$0xff] }
 0x2e9   :  { %3700 = vmatprep.subr.bf16.mxu1 %v3699_v56  ;;  %v3277_v56 = vld [vmem:[%s6017_s4 + $0x550] sm:$0xff]  ;;  %v3723_v63 = vpack.c.bf16 %v3278_v53, %v3276_v2  ;;  %v3299_v53 = vld [vmem:[%s6017_s4 + $0x600] sm:$0xff] }
 0x2ea   :  { %v3725_v1 = vpack.c.bf16 %v3277_v56, %v3275_v55  ;;  %v3301_v55 = vld [vmem:[%s6017_s4 + $0x610] sm:$0xff]  ;;  %v3304_v56 = vld [vmem:[%s6017_s4 + $0x628] sm:$0xff] }
 0x2ec   :  { %3702 = vmatpush1.bf16.msra.mxu1 %v3701_v5  ;;  %v3727_v5 = vpack.c.bf16 %v3282_v30, %v3280_v58  ;;  %v3749_v58 = vpack.c.bf16 %v3301_v55, %v3299_v53  ;;  %v3751_v30 = vpack.c.bf16 %v3306_v57, %v3304_v56  ;;  %v2077_v53 = vld [vmem:[%s6020_s7 + $0x90] sm:$0xff]  ;;  %v2078_v55 = vld [vmem:[%s6020_s7 + $0x98] sm:$0xff]  ;;  %v1956_v57 = vld [vmem:[%s6018_s5] sm:$0x3] }
 0x2ed   :  { %3704 = vmatprep.subr.bf16.mxu1 %v3703_v11  ;;  %v3279_v11 = vld [vmem:[%s6017_s4 + $0x560] sm:$0xff]  ;;  %v3837_v56 = vpack.c.bf16 %v2078_v55, %v2077_v53  ;;  %v3342_v55 = vld [vmem:[%s6020_s7 + $0x130] sm:$0xff] }
 0x2f0   :  { %3706 = vmatpush1.bf16.msra.mxu1 %v3705_v17  ;;  %v3729_v17 = vpack.c.bf16 %v3281_v23, %v3279_v11 }
 0x2f1   :  { %3708 = vmatprep.subr.bf16.mxu1 %v3707_v13  ;;  %v1601_v13 = vld [vmem:[#allocation2 + $0x48] sm:$0x7] }
 0x2f2   :  { %v1666_v62 = vrot.slane %v1601_v13, 3 }
 0x2f4   :  { %3710 = vmatpush1.bf16.msra.mxu1 %v3709_v33  ;;  %v1600_v33 = vld [vmem:[#allocation2 + $0x40] sm:$0x7] }
 0x2f5   :  { %3712 = vmatprep.subr.bf16.mxu1 %v3711_v34  ;;  %v3733_v34 = vpack.c.bf16 %v3285_v27, %v3283_v19  ;;  %v1664_v38 = vrot.slane %v1600_v33, 3  ;;  %v3311_v19 = vld [vmem:[%s6017_s4 + $0x660] sm:$0xff]  ;;  %v3313_v27 = vld [vmem:[%s6017_s4 + $0x670] sm:$0xff] }
 0x2f6   :  { %v2059_v33 = vld [vmem:[%s6020_s7] sm:$0xff] }
 0x2f8   :  { %3714 = vmatpush1.bf16.msra.mxu1 %v3713_v39  ;;  %v1778_v39 = vld [vmem:[#allocation2 + $0x8] sm:$0xf0] }
 0x2f9   :  { %3716 = vmatprep.subr.bf16.mxu1 %v3715_v40  ;;  %v1667_v40 = vsel %vm1649_vm5, %v1662_v10, %v1666_v62  ;;  %v1832_v46 = vrot.slane %v1778_v39, 4  ;;  %v3296_v10 = vld [vmem:[%s6017_s4 + $0x5e8] sm:$0xff]  ;;  %v2062_v39 = vld [vmem:[%s6020_s7 + $0x18] sm:$0xff] }
 0x2fa   :  { %v3316_v62 = vld [vmem:[%s6017_s4 + $0x688] sm:$0xff] }
 0x2fb   :  { %v1834_v50 = vsel %vm1828_vm6, %v1832_v46, %v1833_v51  ;;  %v3302_v51 = vld [vmem:[%s6017_s4 + $0x618] sm:$0xff]  ;;  %v2063_v46 = vld [vmem:[%s6020_s7 + $0x20] sm:$0xff] }
 0x2fc   :  { %3718 = vmatpush1.bf16.msra.mxu1 %v3717_v29  ;;  %v3293_v29 = vld [vmem:[%s6017_s4 + $0x5d0] sm:$0xff]  ;;  %v3747_v2 = vpack.c.bf16 %v3302_v51, %v3300_v21  ;;  %v2075_v51 = vld [vmem:[%s6020_s7 + $0x80] sm:$0xff] }
 0x2fd   :  { %3720 = vmatprep.subr.bf16.mxu1 %v3719_v22  ;;  %v3298_v22 = vld [vmem:[%s6017_s4 + $0x5f8] sm:$0xff]  ;;  %v3741_v52 = vpack.c.bf16 %v3293_v29, %v3291_v42  ;;  %v2065_v42 = vld [vmem:[%s6020_s7 + $0x30] sm:$0xff] }
 0x2fe   :  { %v2066_v29 = vld [vmem:[%s6020_s7 + $0x38] sm:$0xff] }
 0x300   :  { %3722 = vmatpush1.bf16.msra.mxu1 %v3721_v49  ;;  %v3743_v49 = vpack.c.bf16 %v3298_v22, %v3296_v10 }
 0x301   :  { %1720 = vmatprep.subr.mxu1 %v3270_v24 }
 0x304   :  { %1721 = vmatpush1.msra.mxu1 %v3269_v9  ;;  %v3303_v9 = vld [vmem:[%s6017_s4 + $0x620] sm:$0xff] }
 0x305   :  { %1745 = vmatmul.mubr.f32.vlgmr.msra.gmra.mrb[10].mxu1 %v1652_v15  ;;  %3724 = vmatprep.subr.bf16.mxu1 %v3723_v63  ;;  %v3305_v63 = vld [vmem:[%s6017_s4 + $0x630] sm:$0xff]  ;;  %v3307_v15 = vld [vmem:[%s6017_s4 + $0x640] sm:$0xff] }
 0x306   :  { %3272 = vmatprep.mubr.msk.f32.mxu1 %vm1084_vm2, %v4886_v59  ;;  %3726 = vmatpush1.bf16.msra.mxu1 %v3725_v1  ;;  %v3290_v59 = vld [vmem:[%s6017_s4 + $0x5b8] sm:$0xff]  ;;  %v3308_v1 = vld [vmem:[%s6017_s4 + $0x648] sm:$0xff]  ;;  %v3753_v11 = vpack.c.bf16 %v3305_v63, %v3303_v9  ;;  %v3757_v13 = vpack.c.bf16 %v3309_v16, %v3307_v15 }
 0x307   :  { %3728 = vmatprep.subr.bf16.mxu1 %v3727_v5  ;;  %v3735_v8 = vpack.c.bf16 %v3290_v59, %v3288_v28  ;;  %v3310_v5 = vld [vmem:[%s6017_s4 + $0x658] sm:$0xff]  ;;  %v3761_v28 = vpack.c.bf16 %v3313_v27, %v3311_v19  ;;  %v1777_v59 = vld [vmem:[#allocation2] sm:$0xf0] }
 0x308   :  { %v3755_v23 = vpack.c.bf16 %v3310_v5, %v3308_v1 }
 0x309   :  { %1751 = vmatmul.mubr.f32.gmra.mrb[12].mxu1 %v4843_v31  ;;  %v3292_v31 = vld [vmem:[%s6017_s4 + $0x5c8] sm:$0xff] }
 0x30a   :  { %3273 = vmatprep.mubr.msk.f32.mxu1 %vm1084_vm2, %v4934_v26  ;;  %3730 = vmatpush1.bf16.msra.mxu1 %v3729_v17  ;;  %v3294_v26 = vld [vmem:[%s6017_s4 + $0x5d8] sm:$0xff] }
 0x30b   :  { %3732 = vmatprep.subr.bf16.mxu1 %v3731_v20  ;;  %v3739_v41 = vpack.c.bf16 %v3294_v26, %v3292_v31  ;;  %v3314_v17 = vld [vmem:[%s6017_s4 + $0x678] sm:$0xff]  ;;  %v4178_v26 = vmov 0.0|0.0  }
 0x30c   :  { %v3759_v20 = vpack.c.bf16 %v3314_v17, %v3312_v43 }
 0x30d   :  { %1757 = vmatmul.mubr.f32.gmra.mrb[14].mxu1 %v4848_v32  ;;  %v1665_v32 = vsel %vm1649_vm5, %v1660_v25, %v1664_v38  ;;  %v3295_v25 = vld [vmem:[%s6017_s4 + $0x5e0] sm:$0xff]  ;;  %v2061_v38 = vld [vmem:[%s6020_s7 + $0x10] sm:$0xff] }
 0x30e   :  { %3274 = vmatprep.mubr.msk.f32.mxu1 %vm1084_vm2, %v1667_v40  ;;  %3734 = vmatpush1.bf16.msra.mxu1 %v3733_v34  ;;  %v3745_v24 = vpack.c.bf16 %v3297_v18, %v3295_v25  ;;  %v2060_v34 = vld [vmem:[%s6020_s7 + $0x8] sm:$0xff]  ;;  %v2073_v25 = vld [vmem:[%s6020_s7 + $0x70] sm:$0xff]  ;;  %v2074_v18 = vld [vmem:[%s6020_s7 + $0x78] sm:$0xff] }
 0x30f   :  { %3736 = vmatprep.subr.bf16.mxu1 %v3735_v8  ;;  %v1829_v8 = vrot.slane %v1777_v59, 4  ;;  %v3810_v37 = vpack.c.bf16 %v2060_v34, %v2059_v33  ;;  %v1780_v40 = vld [vmem:[#allocation2 + $0x48] sm:$0xf]  ;;  %v3831_v21 = vpack.c.bf16 %v2074_v18, %v2073_v25  ;;  %v3338_v18 = vld [vmem:[%s6020_s7 + $0x110] sm:$0xff] }
 0x311   :  { %1763 = vmatmul.mubr.f32.gmra.mrb[16].mxu1 %v1665_v32  ;;  %v1831_v31 = vsel %vm1828_vm6, %v1829_v8, %v1830_v48  ;;  %v1845_v48 = vrot.slane %v1780_v40, 4  ;;  %v1984_v40 = vld [vmem:[%s6019_s6] sm:$0x3] }
 0x312   :  { %3738 = vmatpush1.bf16.msra.mxu1 %v3737_v6  ;;  %3317 = vmatprep.mubr.msk.f32.mxu1 %vm1084_vm2, %v1834_v50  ;;  %v3813_v6 = vpack.c.bf16 %v2062_v39, %v2061_v38  ;;  %v2071_v50 = vld [vmem:[%s6020_s7 + $0x60] sm:$0xff] }
 0x313   :  { %3740 = vmatprep.subr.bf16.mxu1 %v3739_v41  ;;  %v1779_v41 = vld [vmem:[#allocation2 + $0x40] sm:$0xf] }
 0x314   :  { %v1843_v32 = vrot.slane %v1779_v41, 4  ;;  %v3326_v41 = vld [vmem:[%s6020_s7 + $0xb0] sm:$0xff] }
 0x316   :  { %3742 = vmatpush1.bf16.msra.mxu1 %v3741_v52  ;;  %v1844_v10 = vsel %vm1828_vm6, %v1839_v54, %v1843_v32  ;;  %v2070_v54 = vld [vmem:[%s6020_s7 + $0x58] sm:$0xff]  ;;  %v2072_v52 = vld [vmem:[%s6020_s7 + $0x68] sm:$0xff] }
 0x317   :  { %3744 = vmatprep.subr.bf16.mxu1 %v3743_v49  ;;  %v3825_v22 = vpack.c.bf16 %v2070_v54, %v2069_v14  ;;  %v3828_v49 = vpack.c.bf16 %v2072_v52, %v2071_v50  ;;  %v3329_v32 = vld [vmem:[%s6020_s7 + $0xc8] sm:$0xff]  ;;  %v3334_v54 = vld [vmem:[%s6020_s7 + $0xf0] sm:$0xff]  ;;  %v3336_v52 = vld [vmem:[%s6020_s7 + $0x100] sm:$0xff] }
 0x31a   :  { %3746 = vmatpush1.bf16.msra.mxu1 %v3745_v24  ;;  %v2076_v24 = vld [vmem:[%s6020_s7 + $0x88] sm:$0xff] }
 0x31b   :  { %3748 = vmatprep.subr.bf16.mxu1 %v3747_v2  ;;  %v3834_v2 = vpack.c.bf16 %v2076_v24, %v2075_v51  ;;  %v3340_v24 = vld [vmem:[%s6020_s7 + $0x120] sm:$0xff] }
 0x31e   :  { %3750 = vmatpush1.bf16.msra.mxu1 %v3749_v58  ;;  %v1961_v58 = vrot.slane %v1956_v57, %v923_v45 }
 0x31f   :  { %3752 = vmatprep.subr.bf16.mxu1 %v3751_v30  ;;  %v1965_v30 = vrot.slane %v1956_v57, %v927_v47 }
 0x322   :  { %3754 = vmatpush1.bf16.msra.mxu1 %v3753_v11 }
 0x323   :  { %3756 = vmatprep.subr.bf16.mxu1 %v3755_v23 }
 0x326   :  { %3758 = vmatpush1.bf16.msra.mxu1 %v3757_v13 }
 0x327   :  { %3760 = vmatprep.subr.bf16.mxu1 %v3759_v20 }
 0x32a   :  { %3762 = vmatpush1.bf16.msra.mxu1 %v3761_v28 }
 0x32b   :  { %1899 = vmatprep.subr.mxu1 %v3316_v62 }
 0x32e   :  { %1900 = vmatpush1.msra.mxu1 %v3315_v36 }
 0x32f   :  { %1924 = vmatmul.mubr.f32.vlgmr.msra.gmra.mrb[10].mxu1 %v1831_v31  ;;  %3809 = vmatprep.subr.bf16.mxu1 %v4178_v26 }
 0x330   :  { %3318 = vmatprep.mubr.msk.f32.mxu1 %vm1084_vm2, %v4891_v60  ;;  %3811 = vmatpush1.bf16.msra.mxu1 %v3810_v37  ;;  %v3816_v60 = vpack.c.bf16 %v2064_v0, %v2063_v46  ;;  %v3325_v46 = vld [vmem:[%s6020_s7 + $0xa8] sm:$0xff]  ;;  %v3322_v0 = vld [vmem:[%s6019_s6 + $0x2] sm:$0x3] }
 0x331   :  { %3812 = vmatprep.subr.bf16.mxu1 %v4178_v26 }
 0x333   :  { %1930 = vmatmul.mubr.f32.gmra.mrb[12].mxu1 %v4905_v3  ;;  %v1846_v3 = vsel %vm1828_vm6, %v1841_v12, %v1845_v48 }
 0x334   :  { %3319 = vmatprep.mubr.msk.f32.mxu1 %vm1084_vm2, %v4946_v35  ;;  %3814 = vmatpush1.bf16.msra.mxu1 %v3813_v6  ;;  %v3819_v35 = vpack.c.bf16 %v2066_v29, %v2065_v42  ;;  %v3324_v6 = vld [vmem:[%s6020_s7 + $0xa0] sm:$0xff] }
 0x335   :  { %3815 = vmatprep.subr.bf16.mxu1 %v4178_v26  ;;  %v3780_v48 = vpack.c.bf16 %v3325_v46, %v3324_v6  ;;  %v3328_v29 = vld [vmem:[%s6020_s7 + $0xc0] sm:$0xff]  ;;  %v3380_v6 = vld [vmem:[%s6020_s7 + $0x228] sm:$0xff] }
 0x337   :  { %1936 = vmatmul.mubr.f32.gmra.mrb[14].mxu1 %v4910_v4  ;;  %v2068_v4 = vld [vmem:[%s6020_s7 + $0x48] sm:$0xff] }
 0x338   :  { %3320 = vmatprep.mubr.msk.f32.mxu1 %vm1084_vm2, %v1846_v3  ;;  %3817 = vmatpush1.bf16.msra.mxu1 %v3816_v60  ;;  %v3822_v12 = vpack.c.bf16 %v2068_v4, %v2067_v61  ;;  %v3327_v60 = vld [vmem:[%s6020_s7 + $0xb8] sm:$0xff]  ;;  %v3786_v3 = vpack.c.bf16 %v3329_v32, %v3328_v29  ;;  %v3332_v4 = vld [vmem:[%s6020_s7 + $0xe0] sm:$0xff] }
 0x339   :  { %3818 = vmatprep.subr.bf16.mxu1 %v4178_v26  ;;  %v3783_v42 = vpack.c.bf16 %v3327_v60, %v3326_v41  ;;  %v3381_v60 = vld [vmem:[%s6020_s7 + $0x230] sm:$0xff]  ;;  %v3356_v32 = vld [vmem:[%s6020_s7 + $0x180] sm:$0xff] }
 0x33b   :  { %1942 = vmatmul.mubr.f32.gmra.mrb[16].mxu1 %v1844_v10  ;;  %v3331_v10 = vld [vmem:[%s6020_s7 + $0xd8] sm:$0xff] }
 0x33c   :  { %3820 = vmatpush1.bf16.msra.mxu1 %v3819_v35  ;;  %v3330_v35 = vld [vmem:[%s6020_s7 + $0xd0] sm:$0xff] }
 0x33d   :  { %3821 = vmatprep.subr.bf16.mxu1 %v4178_v26  ;;  %v3789_v61 = vpack.c.bf16 %v3331_v10, %v3330_v35  ;;  %v3383_v10 = vld [vmem:[%s6020_s7 + $0x240] sm:$0xff] }
 0x340   :  { %3823 = vmatpush1.bf16.msra.mxu1 %v3822_v12  ;;  %v3333_v12 = vld [vmem:[%s6020_s7 + $0xe8] sm:$0xff] }
 0x341   :  { %3824 = vmatprep.subr.bf16.mxu1 %v4178_v26  ;;  %v3792_v14 = vpack.c.bf16 %v3333_v12, %v3332_v4  ;;  %v3358_v12 = vld [vmem:[%s6020_s7 + $0x190] sm:$0xff] }
 0x344   :  { %3826 = vmatpush1.bf16.msra.mxu1 %v3825_v22  ;;  %v3335_v22 = vld [vmem:[%s6020_s7 + $0xf8] sm:$0xff] }
 0x345   :  { %3827 = vmatprep.subr.bf16.mxu1 %v4178_v26  ;;  %v3795_v50 = vpack.c.bf16 %v3335_v22, %v3334_v54  ;;  %v3385_v22 = vld [vmem:[%s6020_s7 + $0x250] sm:$0xff] }
 0x348   :  { %3829 = vmatpush1.bf16.msra.mxu1 %v3828_v49  ;;  %v3337_v49 = vld [vmem:[%s6020_s7 + $0x108] sm:$0xff] }
 0x349   :  { %3830 = vmatprep.subr.bf16.mxu1 %v4178_v26  ;;  %v3798_v25 = vpack.c.bf16 %v3337_v49, %v3336_v52  ;;  %v3360_v49 = vld [vmem:[%s6020_s7 + $0x1a0] sm:$0xff] }
 0x34c   :  { %3832 = vmatpush1.bf16.msra.mxu1 %v3831_v21  ;;  %v3339_v21 = vld [vmem:[%s6020_s7 + $0x118] sm:$0xff] }
 0x34d   :  { %3833 = vmatprep.subr.bf16.mxu1 %v4178_v26  ;;  %v3801_v51 = vpack.c.bf16 %v3339_v21, %v3338_v18 }
 0x350   :  { %3835 = vmatpush1.bf16.msra.mxu1 %v3834_v2  ;;  %v3341_v2 = vld [vmem:[%s6020_s7 + $0x128] sm:$0xff] }
 0x351   :  { %3836 = vmatprep.subr.bf16.mxu1 %v4178_v26  ;;  %v3804_v53 = vpack.c.bf16 %v3341_v2, %v3340_v24  ;;  %v3363_v24 = vld [vmem:[%s6020_s7 + $0x1b8] sm:$0xff] }
 0x354   :  { %3838 = vmatpush1.bf16.msra.mxu1 %v3837_v56  ;;  %v3343_v56 = vld [vmem:[%s6020_s7 + $0x138] sm:$0xff] }
 0x355   :  { %v3807_v57 = vpack.c.bf16 %v3343_v56, %v3342_v55  ;;  %v3365_v55 = vld [vmem:[%s6020_s7 + $0x1c8] sm:$0xff] }
 0x402   :  { %v1925_v9 = vpop.f32.mrb[10].mxu1 }
 0x403   :  { %v1968_v63 = vadd.f32 %v1961_v58, %v1925_v9  ;;  %v1927_v1 = vpop.f32.mrb[11].mxu1  ;;  %v3371_v9 = vld [vmem:[%s6020_s7 + $0x1e0] sm:$0xff] }
 0x404   :  { %v1969_v5 = vadd.f32 %v1965_v30, %v1927_v1 }
 0x405   :  { %4133 = vtanh.f32 %v1968_v63  ;;  %v3372_v63 = vld [vmem:[%s6020_s7 + $0x1e8] sm:$0xff] }
 0x406   :  { %v1931_v11 = vpop.f32.mrb[12].mxu1  ;;  %4135 = vtanh.f32 %v1969_v5  ;;  %v3369_v5 = vld [vmem:[%s6019_s6 + $0x6] sm:$0x3] }
 0x407   :  { %v1970_v23 = vadd.f32 %v1961_v58, %v1931_v11  ;;  %v1933_v15 = vpop.f32.mrb[13].mxu1 }
 0x408   :  { %v1971_v16 = vadd.f32 %v1965_v30, %v1933_v15  ;;  %v3373_v15 = vld [vmem:[%s6020_s7 + $0x1f0] sm:$0xff] }
 0x409   :  { %4137 = vtanh.f32 %v1970_v23  ;;  %v3886_v23 = vpack.c.bf16 %v3372_v63, %v3371_v9  ;;  %v3387_v9 = vld [vmem:[%s6020_s7 + $0x260] sm:$0xff]  ;;  %v3388_v63 = vld [vmem:[%s6020_s7 + $0x268] sm:$0xff] }
 0x40a   :  { %4139 = vtanh.f32 %v1971_v16  ;;  %v1937_v43 = vpop.f32.mrb[14].mxu1  ;;  %v3374_v16 = vld [vmem:[%s6020_s7 + $0x1f8] sm:$0xff] }
 0x40b   :  { %v1972_v17 = vadd.f32 %v1961_v58, %v1937_v43  ;;  %v1939_v13 = vpop.f32.mrb[15].mxu1  ;;  %v3348_v43 = vld [vmem:[%s6020_s7 + $0x140] sm:$0xff] }
 0x40c   :  { %v1973_v20 = vadd.f32 %v1965_v30, %v1939_v13  ;;  %v3889_v13 = vpack.c.bf16 %v3374_v16, %v3373_v15 }
 0x40d   :  { %4141 = vtanh.f32 %v1972_v17  ;;  %v3349_v17 = vld [vmem:[%s6020_s7 + $0x148] sm:$0xff] }
 0x40e   :  { %v1943_v45 = vpop.f32.mrb[16].mxu1  ;;  %4143 = vtanh.f32 %v1973_v20  ;;  %v3375_v20 = vld [vmem:[%s6020_s7 + $0x200] sm:$0xff] }
 0x40f   :  { %v1974_v44 = vadd.f32 %v1961_v58, %v1943_v45  ;;  %v1945_v47 = vpop.f32.mrb[17].mxu1  ;;  %v4134_v27 = vpop.eup %4133  ;;  %v3376_v45 = vld [vmem:[%s6020_s7 + $0x208] sm:$0xff] }
 0x410   :  { %v1975_v19 = vadd.f32 %v1965_v30, %v1945_v47  ;;  %v4136_v28 = vpop.eup %4135  ;;  %v3848_v47 = vpack.c.bf16 %v3349_v17, %v3348_v43 }
 0x411   :  { %4145 = vtanh.f32 %v1974_v44  ;;  %v3346_v44 = vld [vmem:[%s6019_s6 + $0x4] sm:$0x3] }
 0x412   :  { %4147 = vtanh.f32 %v1975_v19  ;;  %v3350_v19 = vld [vmem:[%s6020_s7 + $0x150] sm:$0xff] }
 0x413   :  { %v4138_v59 = vpop.eup %4137 }
 0x414   :  { %v4140_v62 = vpop.eup %4139  ;;  %v5557_v33 = vpack.c.bf16 %v4138_v59, %v4134_v27  ;;  %v3351_v27 = vld [vmem:[%s6020_s7 + $0x158] sm:$0xff]  ;;  %v3377_v59 = vld [vmem:[%s6020_s7 + $0x210] sm:$0xff] }
 0x415   :  { %v5559_v34 = vpack.c.bf16 %v4140_v62, %v4136_v28  ;;  %v3892_v28 = vpack.c.bf16 %v3376_v45, %v3375_v20  ;;  %v3378_v62 = vld [vmem:[%s6020_s7 + $0x218] sm:$0xff] }
 0x417   :  { %3764 = vmatprep.subr.bf16.mxu0 %v5559_v34  ;;  %3878 = vmatprep.subr.bf16.mxu1 %v5559_v34  ;;  %v4142_v8 = vpop.eup %4141 }
 0x418   :  { %3766 = vmatpush1.bf16.msra.mxu0 %v5557_v33  ;;  %v4144_v36 = vpop.eup %4143 }
 0x41b   :  { %v4146_v37 = vpop.eup %4145 }
 0x41c   :  { %v4148_v38 = vpop.eup %4147  ;;  %v5564_v39 = vpack.c.bf16 %v4146_v37, %v4142_v8  ;;  %v3851_v8 = vpack.c.bf16 %v3351_v27, %v3350_v19  ;;  %v3353_v37 = vld [vmem:[%s6020_s7 + $0x168] sm:$0xff] }
 0x41d   :  { %v5566_v31 = vpack.c.bf16 %v4148_v38, %v4144_v36  ;;  %v3352_v36 = vld [vmem:[%s6020_s7 + $0x160] sm:$0xff]  ;;  %v3895_v38 = vpack.c.bf16 %v3378_v62, %v3377_v59  ;;  %v3395_v19 = vld [vmem:[%s6020_s7 + $0x288] sm:$0xff] }
 0x41e   :  { %v3854_v46 = vpack.c.bf16 %v3353_v37, %v3352_v36  ;;  %v3392_v27 = vld [vmem:[%s6019_s6 + $0x8] sm:$0x3]  ;;  %v3400_v36 = vld [vmem:[%s6020_s7 + $0x2b0] sm:$0xff]  ;;  %v3401_v37 = vld [vmem:[%s6020_s7 + $0x2b8] sm:$0xff] }
 0x41f   :  { %3768 = vmatprep.subr.bf16.mxu0 %v5566_v31  ;;  %v3399_v62 = vld [vmem:[%s6020_s7 + $0x2a8] sm:$0xff] }
 0x420   :  { %3770 = vmatpush1.bf16.msra.mxu0 %v5564_v39 }
 0x421   :  { %3772 = vmatprep.subr.bf16.mxu0 %v5559_v34 }
 0x423   :  { %3321 = vmatmul.mubr.msk.f32.vlgmr.msra.gmra.mrb[18].mxu0 %vm80_vm0, %v1984_v40  ;;  %v3379_v40 = vld [vmem:[%s6020_s7 + $0x220] sm:$0xff] }
 0x424   :  { %3774 = vmatpush1.bf16.msra.mxu0 %v5557_v33  ;;  %2148 = vmatprep.mubr.f32.mxu0 %v4177_v7  ;;  %v3898_v41 = vpack.c.bf16 %v3380_v6, %v3379_v40  ;;  %v3402_v40 = vld [vmem:[%s6020_s7 + $0x2c0] sm:$0xff]  ;;  %v3403_v6 = vld [vmem:[%s6020_s7 + $0x2c8] sm:$0xff] }
 0x425   :  { %3776 = vmatprep.subr.bf16.mxu0 %v5566_v31 }
 0x428   :  { %3778 = vmatpush1.bf16.msra.mxu0 %v5564_v39 }
 0x429   :  { %3779 = vmatprep.subr.bf16.mxu0 %v4178_v26 }
 0x42b   :  { %3323 = vmatmul.mubr.msk.f32.vlgmr.msra.gmra.mrb[20].mxu0 %vm80_vm0, %v3322_v0  ;;  %v3354_v0 = vld [vmem:[%s6020_s7 + $0x170] sm:$0xff] }
 0x42c   :  { %3781 = vmatpush1.bf16.msra.mxu0 %v3780_v48  ;;  %v3355_v48 = vld [vmem:[%s6020_s7 + $0x178] sm:$0xff] }
 0x42d   :  { %3782 = vmatprep.subr.bf16.mxu0 %v4178_v26  ;;  %v3857_v29 = vpack.c.bf16 %v3355_v48, %v3354_v0  ;;  %v3404_v0 = vld [vmem:[%s6020_s7 + $0x2d0] sm:$0xff]  ;;  %v3405_v48 = vld [vmem:[%s6020_s7 + $0x2d8] sm:$0xff] }
 0x430   :  { %3784 = vmatpush1.bf16.msra.mxu0 %v3783_v42  ;;  %v3382_v42 = vld [vmem:[%s6020_s7 + $0x238] sm:$0xff] }
 0x431   :  { %3785 = vmatprep.subr.bf16.mxu0 %v4178_v26  ;;  %v3901_v35 = vpack.c.bf16 %v3382_v42, %v3381_v60  ;;  %v3406_v60 = vld [vmem:[%s6020_s7 + $0x2e0] sm:$0xff]  ;;  %v3407_v42 = vld [vmem:[%s6020_s7 + $0x2e8] sm:$0xff] }
 0x434   :  { %3787 = vmatpush1.bf16.msra.mxu0 %v3786_v3  ;;  %v3357_v3 = vld [vmem:[%s6020_s7 + $0x188] sm:$0xff] }
 0x435   :  { %3788 = vmatprep.subr.bf16.mxu0 %v4178_v26  ;;  %v3860_v4 = vpack.c.bf16 %v3357_v3, %v3356_v32  ;;  %v3408_v32 = vld [vmem:[%s6020_s7 + $0x2f0] sm:$0xff]  ;;  %v3409_v3 = vld [vmem:[%s6020_s7 + $0x2f8] sm:$0xff] }
 0x438   :  { %3790 = vmatpush1.bf16.msra.mxu0 %v3789_v61  ;;  %v3384_v61 = vld [vmem:[%s6020_s7 + $0x248] sm:$0xff] }
 0x439   :  { %3791 = vmatprep.subr.bf16.mxu0 %v4178_v26  ;;  %v3904_v54 = vpack.c.bf16 %v3384_v61, %v3383_v10  ;;  %v3410_v10 = vld [vmem:[%s6020_s7 + $0x300] sm:$0xff]  ;;  %v3411_v61 = vld [vmem:[%s6020_s7 + $0x308] sm:$0xff] }
 0x43c   :  { %3793 = vmatpush1.bf16.msra.mxu0 %v3792_v14  ;;  %v3359_v14 = vld [vmem:[%s6020_s7 + $0x198] sm:$0xff] }
 0x43d   :  { %3794 = vmatprep.subr.bf16.mxu0 %v4178_v26  ;;  %v3863_v52 = vpack.c.bf16 %v3359_v14, %v3358_v12  ;;  %v3412_v12 = vld [vmem:[%s6020_s7 + $0x310] sm:$0xff]  ;;  %v3413_v14 = vld [vmem:[%s6020_s7 + $0x318] sm:$0xff] }
 0x440   :  { %3796 = vmatpush1.bf16.msra.mxu0 %v3795_v50  ;;  %v3386_v50 = vld [vmem:[%s6020_s7 + $0x258] sm:$0xff] }
 0x441   :  { %3797 = vmatprep.subr.bf16.mxu0 %v4178_v26  ;;  %v3907_v18 = vpack.c.bf16 %v3386_v50, %v3385_v22  ;;  %v2844_v22 = vld [vmem:[%s6022_s9] sm:$0xff]  ;;  %v2845_v50 = vld [vmem:[%s6022_s9 + $0x8] sm:$0xff] }
 0x444   :  { %3799 = vmatpush1.bf16.msra.mxu0 %v3798_v25  ;;  %v3361_v25 = vld [vmem:[%s6020_s7 + $0x1a8] sm:$0xff] }
 0x445   :  { %3800 = vmatprep.subr.bf16.mxu0 %v4178_v26  ;;  %v3866_v21 = vpack.c.bf16 %v3361_v25, %v3360_v49  ;;  %v3954_v49 = vpack.c.bf16 %v2845_v50, %v2844_v22  ;;  %v2847_v25 = vld [vmem:[%s6022_s9 + $0x18] sm:$0xff] }
 0x448   :  { %3802 = vmatpush1.bf16.msra.mxu0 %v3801_v51  ;;  %v3362_v51 = vld [vmem:[%s6020_s7 + $0x1b0] sm:$0xff] }
 0x449   :  { %3803 = vmatprep.subr.bf16.mxu0 %v4178_v26  ;;  %v3869_v2 = vpack.c.bf16 %v3363_v24, %v3362_v51  ;;  %v2849_v51 = vld [vmem:[%s6022_s9 + $0x28] sm:$0xff] }
 0x44c   :  { %3805 = vmatpush1.bf16.msra.mxu0 %v3804_v53  ;;  %v3364_v53 = vld [vmem:[%s6020_s7 + $0x1c0] sm:$0xff] }
 0x44d   :  { %3806 = vmatprep.subr.bf16.mxu0 %v4178_v26  ;;  %v3872_v56 = vpack.c.bf16 %v3365_v55, %v3364_v53  ;;  %v2851_v53 = vld [vmem:[%s6022_s9 + $0x38] sm:$0xff] }
 0x450   :  { %3808 = vmatpush1.bf16.msra.mxu0 %v3807_v57  ;;  %v3366_v57 = vld [vmem:[%s6020_s7 + $0x1d0] sm:$0xff] }
 0x451   :  { %3840 = vmatprep.subr.bf16.mxu0 %v5559_v34 }
 0x4f6   :  { %v2054_v58 = vpop.f32.mrb[18].mxu0 }
 0x4f7   :  { %v2056_v30 = vpop.f32.mrb[19].mxu0 }
 0x4f8   :  { %3345 = vmatprep.mubr.msk.f32.mxu1 %vm80_vm0, %v2056_v30 }
 0x4f9   :  { %2317 = vmatmul.mubr.f32.vlgmr.msra.gmra.mrb[18].mxu1 %v2054_v58  ;;  %v3367_v58 = vld [vmem:[%s6020_s7 + $0x1d8] sm:$0xff] }
 0x4fa   :  { %3880 = vmatpush1.bf16.msra.mxu1 %v5557_v33  ;;  %2562 = vmatprep.mubr.f32.mxu1 %v4177_v7  ;;  %v3875_v30 = vpack.c.bf16 %v3367_v58, %v3366_v57 }
 0x4fb   :  { %3882 = vmatprep.subr.bf16.mxu1 %v5566_v31 }
 0x4fe   :  { %3884 = vmatpush1.bf16.msra.mxu1 %v5564_v39  ;;  %v2150_v1 = vpop.f32.mrb[20].mxu0 }
 0x4ff   :  { %v2152_v11 = vpop.f32.mrb[21].mxu0  ;;  %3885 = vmatprep.subr.bf16.mxu1 %v4178_v26 }
 0x500   :  { %3344 = vmatprep.mubr.msk.f32.mxu0 %vm80_vm0, %v2152_v11 }
 0x501   :  { %2244 = vmatmul.mubr.f32.vlgmr.msra.gmra.mrb[22].mxu0 %v2150_v1  ;;  %3370 = vmatmul.mubr.msk.f32.vlgmr.msra.gmra.mrb[20].mxu1 %vm80_vm0, %v3369_v5  ;;  %v3910_v1 = vpack.c.bf16 %v3388_v63, %v3387_v9  ;;  %v3389_v5 = vld [vmem:[%s6020_s7 + $0x270] sm:$0xff] }
 0x502   :  { %3842 = vmatpush1.bf16.msra.mxu0 %v5557_v33  ;;  %2391 = vmatprep.mubr.f32.mxu0 %v4177_v7 }
 0x503   :  { %3844 = vmatprep.subr.bf16.mxu0 %v5566_v31  ;;  %3887 = vmatpush1.bf16.msra.mxu1 %v3886_v23 }
 0x504   :  { %3888 = vmatprep.subr.bf16.mxu1 %v4178_v26 }
 0x506   :  { %3846 = vmatpush1.bf16.msra.mxu0 %v5564_v39 }
 0x507   :  { %3847 = vmatprep.subr.bf16.mxu0 %v4178_v26  ;;  %3890 = vmatpush1.bf16.msra.mxu1 %v3889_v13 }
 0x508   :  { %3891 = vmatprep.subr.bf16.mxu1 %v4178_v26 }
 0x509   :  { %3347 = vmatmul.mubr.msk.f32.vlgmr.msra.gmra.mrb[24].mxu0 %vm80_vm0, %v3346_v44 }
 0x50a   :  { %3849 = vmatpush1.bf16.msra.mxu0 %v3848_v47  ;;  %v3394_v47 = vld [vmem:[%s6020_s7 + $0x280] sm:$0xff] }
 0x50b   :  { %3850 = vmatprep.subr.bf16.mxu0 %v4178_v26  ;;  %3893 = vmatpush1.bf16.msra.mxu1 %v3892_v28  ;;  %v3924_v28 = vpack.c.bf16 %v3395_v19, %v3394_v47  ;;  %v2943_v47 = vld [vmem:[%s6024_s11 + $0x10] sm:$0xff] }
 0x50c   :  { %3894 = vmatprep.subr.bf16.mxu1 %v4178_v26  ;;  %v2858_v19 = vld [vmem:[%s6022_s9 + $0x70] sm:$0xff] }
 0x50e   :  { %3852 = vmatpush1.bf16.msra.mxu0 %v3851_v8 }
 0x50f   :  { %3853 = vmatprep.subr.bf16.mxu0 %v4178_v26  ;;  %3896 = vmatpush1.bf16.msra.mxu1 %v3895_v38  ;;  %v3933_v38 = vpack.c.bf16 %v3401_v37, %v3400_v36  ;;  %v2945_v37 = vld [vmem:[%s6024_s11 + $0x20] sm:$0xff] }
 0x510   :  { %3897 = vmatprep.subr.bf16.mxu1 %v4178_v26 }
 0x512   :  { %3855 = vmatpush1.bf16.msra.mxu0 %v3854_v46  ;;  %v3936_v46 = vpack.c.bf16 %v3403_v6, %v3402_v40  ;;  %v2947_v40 = vld [vmem:[%s6024_s11 + $0x30] sm:$0xff] }
 0x513   :  { %3856 = vmatprep.subr.bf16.mxu0 %v4178_v26  ;;  %3899 = vmatpush1.bf16.msra.mxu1 %v3898_v41  ;;  %v3939_v41 = vpack.c.bf16 %v3405_v48, %v3404_v0  ;;  %v2949_v48 = vld [vmem:[%s6024_s11 + $0x40] sm:$0xff] }
 0x514   :  { %3900 = vmatprep.subr.bf16.mxu1 %v4178_v26 }
 0x516   :  { %3858 = vmatpush1.bf16.msra.mxu0 %v3857_v29  ;;  %v3942_v29 = vpack.c.bf16 %v3407_v42, %v3406_v60  ;;  %v2951_v42 = vld [vmem:[%s6024_s11 + $0x50] sm:$0xf] }
 0x517   :  { %3859 = vmatprep.subr.bf16.mxu0 %v4178_v26  ;;  %3902 = vmatpush1.bf16.msra.mxu1 %v3901_v35  ;;  %v3945_v35 = vpack.c.bf16 %v3409_v3, %v3408_v32 }
 0x518   :  { %3903 = vmatprep.subr.bf16.mxu1 %v4178_v26 }
 0x51a   :  { %3861 = vmatpush1.bf16.msra.mxu0 %v3860_v4  ;;  %v3948_v4 = vpack.c.bf16 %v3411_v61, %v3410_v10 }
 0x51b   :  { %3862 = vmatprep.subr.bf16.mxu0 %v4178_v26  ;;  %3905 = vmatpush1.bf16.msra.mxu1 %v3904_v54  ;;  %v3951_v54 = vpack.c.bf16 %v3413_v14, %v3412_v12 }
 0x51c   :  { %3906 = vmatprep.subr.bf16.mxu1 %v4178_v26 }
 0x51e   :  { %3864 = vmatpush1.bf16.msra.mxu0 %v3863_v52  ;;  %v2846_v52 = vld [vmem:[%s6022_s9 + $0x10] sm:$0xff] }
 0x51f   :  { %3865 = vmatprep.subr.bf16.mxu0 %v4178_v26  ;;  %3908 = vmatpush1.bf16.msra.mxu1 %v3907_v18  ;;  %v3957_v18 = vpack.c.bf16 %v2847_v25, %v2846_v52 }
 0x520   :  { %3909 = vmatprep.subr.bf16.mxu1 %v4178_v26 }
 0x522   :  { %3867 = vmatpush1.bf16.msra.mxu0 %v3866_v21  ;;  %v2848_v21 = vld [vmem:[%s6022_s9 + $0x20] sm:$0xff] }
 0x523   :  { %3868 = vmatprep.subr.bf16.mxu0 %v4178_v26  ;;  %3911 = vmatpush1.bf16.msra.mxu1 %v3910_v1  ;;  %v3960_v24 = vpack.c.bf16 %v2849_v51, %v2848_v21 }
 0x524   :  { %3912 = vmatprep.subr.bf16.mxu1 %v4178_v26 }
 0x526   :  { %3870 = vmatpush1.bf16.msra.mxu0 %v3869_v2  ;;  %v2850_v2 = vld [vmem:[%s6022_s9 + $0x30] sm:$0xff] }
 0x527   :  { %3871 = vmatprep.subr.bf16.mxu0 %v4178_v26  ;;  %v3963_v55 = vpack.c.bf16 %v2851_v53, %v2850_v2 }
 0x52a   :  { %3873 = vmatpush1.bf16.msra.mxu0 %v3872_v56 }
 0x52b   :  { %3874 = vmatprep.subr.bf16.mxu0 %v4178_v26 }
 0x52e   :  { %3876 = vmatpush1.bf16.msra.mxu0 %v3875_v30 }
 0x52f   :  { %3916 = vmatprep.subr.bf16.mxu0 %v5559_v34  ;;  %v3390_v34 = vld [vmem:[%s6020_s7 + $0x278] sm:$0xff] }
 0x530   :  { %v3913_v11 = vpack.c.bf16 %v3390_v34, %v3389_v5  ;;  %v2852_v34 = vld [vmem:[%s6022_s9 + $0x40] sm:$0xff] }
 0x532   :  { %3914 = vmatpush1.bf16.msra.mxu1 %v3913_v11  ;;  %v2853_v11 = vld [vmem:[%s6022_s9 + $0x48] sm:$0xff] }
 0x533   :  { %3953 = vmatprep.subr.bf16.mxu1 %v4178_v26 }
 0x5cc   :  { %v2318_v23 = vpop.f32.mrb[18].mxu1 }
 0x5cd   :  { %v2320_v15 = vpop.f32.mrb[19].mxu1 }
 0x5ce   :  { %v3966_v15 = vpack.c.bf16 %v2853_v11, %v2852_v34 }
 0x5d4   :  { %v2245_v16 = vpop.f32.mrb[22].mxu0  ;;  %v2564_v43 = vpop.f32.mrb[20].mxu1 }
 0x5d5   :  { %v2247_v17 = vpop.f32.mrb[23].mxu0  ;;  %v5814_v13 = vadd.f32 %v2318_v23, %v2245_v16  ;;  %v2566_v20 = vpop.f32.mrb[21].mxu1  ;;  %v2854_v23 = vld [vmem:[%s6022_s9 + $0x50] sm:$0xff]  ;;  %v2855_v16 = vld [vmem:[%s6022_s9 + $0x58] sm:$0xff] }
 0x5d6   :  { %3391 = vmatprep.mubr.msk.f32.mxu1 %vm80_vm0, %v2566_v20  ;;  %v2856_v17 = vld [vmem:[%s6022_s9 + $0x60] sm:$0xff] }
 0x5d7   :  { %2658 = vmatmul.mubr.f32.vlgmr.msra.gmra.mrb[22].mxu1 %v2564_v43  ;;  %v3969_v43 = vpack.c.bf16 %v2855_v16, %v2854_v23 }
 0x5d8   :  { %3955 = vmatpush3.bf16.msra.mxu1 %v3954_v49  ;;  %3479 = vmatprep.mubr.msk.f32.mxu1 %vm4179_vm7, %v4177_v7 }
 0x5d9   :  { %3956 = vmatprep.subr.bf16.mxu1 %v4178_v26 }
 0x5dc   :  { %v2393_v45 = vpop.f32.mrb[24].mxu0  ;;  %3958 = vmatpush3.bf16.msra.mxu1 %v3957_v18 }
 0x5dd   :  { %v2395_v44 = vpop.f32.mrb[25].mxu0  ;;  %3959 = vmatprep.subr.bf16.mxu1 %v4178_v26 }
 0x5de   :  { %3368 = vmatprep.mubr.msk.f32.mxu0 %vm80_vm0, %v2395_v44  ;;  %v2942_v44 = vld [vmem:[%s6024_s11 + $0x8] sm:$0xff] }
 0x5df   :  { %2487 = vmatmul.mubr.f32.vlgmr.msra.gmra.mrb[26].mxu0 %v2393_v45  ;;  %v2941_v45 = vld [vmem:[%s6024_s11] sm:$0xff] }
 0x5e0   :  { %3918 = vmatpush1.bf16.msra.mxu0 %v5557_v33  ;;  %2733 = vmatprep.mubr.f32.mxu0 %v4177_v7  ;;  %v3396_v33 = vld [vmem:[%s6020_s7 + $0x290] sm:$0xff] }
 0x5e1   :  { %3920 = vmatprep.subr.bf16.mxu0 %v5566_v31  ;;  %v3397_v31 = vld [vmem:[%s6020_s7 + $0x298] sm:$0xff]  ;;  %3961 = vmatpush3.bf16.msra.mxu1 %v3960_v24 }
 0x5e2   :  { %v3927_v59 = vpack.c.bf16 %v3397_v31, %v3396_v33  ;;  %3962 = vmatprep.subr.bf16.mxu1 %v4178_v26 }
 0x5e4   :  { %3922 = vmatpush1.bf16.msra.mxu0 %v5564_v39  ;;  %v3398_v39 = vld [vmem:[%s6020_s7 + $0x2a0] sm:$0xff] }
 0x5e5   :  { %3923 = vmatprep.subr.bf16.mxu0 %v4178_v26  ;;  %v3930_v8 = vpack.c.bf16 %v3399_v62, %v3398_v39  ;;  %3964 = vmatpush3.bf16.msra.mxu1 %v3963_v55 }
 0x5e6   :  { %3965 = vmatprep.subr.bf16.mxu1 %v4178_v26 }
 0x5e7   :  { %3393 = vmatmul.mubr.msk.f32.vlgmr.msra.gmra.mrb[28].mxu0 %vm80_vm0, %v3392_v27  ;;  %v3975_v27 = vpack.c.bf16 %v2942_v44, %v2941_v45 }
 0x5e8   :  { %3925 = vmatpush1.bf16.msra.mxu0 %v3924_v28  ;;  %v2944_v28 = vld [vmem:[%s6024_s11 + $0x18] sm:$0xff] }
 0x5e9   :  { %3926 = vmatprep.subr.bf16.mxu0 %v4178_v26  ;;  %3967 = vmatpush3.bf16.msra.mxu1 %v3966_v15  ;;  %v3978_v33 = vpack.c.bf16 %v2944_v28, %v2943_v47 }
 0x5ea   :  { %3968 = vmatprep.subr.bf16.mxu1 %v4178_v26 }
 0x5ec   :  { %3928 = vmatpush1.bf16.msra.mxu0 %v3927_v59  ;;  %v3415_v59 = vld [vmem:[%s6021_s8] ss:$0 sm:$0xff] }
 0x5ed   :  { %3929 = vmatprep.subr.bf16.mxu0 %v4178_v26  ;;  %3970 = vmatpush3.bf16.msra.mxu1 %v3969_v43 }
 0x5ee   :  { %3971 = vmatprep.subr.bf16.mxu1 %v4178_v26 }
 0x5f0   :  { %3931 = vmatpush1.bf16.msra.mxu0 %v3930_v8 }
 0x5f1   :  { %3932 = vmatprep.subr.bf16.mxu0 %v4178_v26 }
 0x5f4   :  { %3934 = vmatpush1.bf16.msra.mxu0 %v3933_v38  ;;  %v2946_v38 = vld [vmem:[%s6024_s11 + $0x28] sm:$0xff] }
 0x5f5   :  { %3935 = vmatprep.subr.bf16.mxu0 %v4178_v26  ;;  %v3981_v6 = vpack.c.bf16 %v2946_v38, %v2945_v37 }
 0x5f8   :  { %3937 = vmatpush1.bf16.msra.mxu0 %v3936_v46  ;;  %v2948_v46 = vld [vmem:[%s6024_s11 + $0x38] sm:$0xff] }
 0x5f9   :  { %3938 = vmatprep.subr.bf16.mxu0 %v4178_v26  ;;  %v3984_v0 = vpack.c.bf16 %v2948_v46, %v2947_v40 }
 0x5fc   :  { %3940 = vmatpush1.bf16.msra.mxu0 %v3939_v41  ;;  %v2950_v41 = vld [vmem:[%s6024_s11 + $0x48] sm:$0xff]  ;;  %s4153_s11 = scalar_lea.vmem %s3044_s3, 32 }
 0x5fd   :  { %3941 = vmatprep.subr.bf16.mxu0 %v4178_v26  ;;  %v3987_v60 = vpack.c.bf16 %v2950_v41, %v2949_v48  ;;  %p4154_p0 = scmp.ne.s32.totalorder %s3044_s3, %s4153_s11  ;;  %p4159_p2 = scmp.lt.s32.totalorder %s4153_s11, %s4153_s11 }
 0x5ff   :  { %p4160_p3 = por %p4159_p2, %p4158_p1 }
 0x600   :  { %3943 = vmatpush1.bf16.msra.mxu0 %v3942_v29  ;;  %v3416_v29 = vld [vmem:[%s6023_s10] ss:$0 sm:$0xff] }
 0x601   :  { %3944 = vmatprep.subr.bf16.mxu0 %v4178_v26  ;;  %p4161_p4 = pnand %p4160_p3, %p4154_p0 }
 0x604   :  { %3946 = vmatpush1.bf16.msra.mxu0 %v3945_v35 }
 0x605   :  { %3947 = vmatprep.subr.bf16.mxu0 %v4178_v26 }
 0x608   :  { %3949 = vmatpush1.bf16.msra.mxu0 %v3948_v4 }
 0x609   :  { %3950 = vmatprep.subr.bf16.mxu0 %v4178_v26 }
 0x60c   :  { %3952 = vmatpush1.bf16.msra.mxu0 %v3951_v54 }
 0x60d   :  { %3974 = vmatprep.subr.bf16.mxu0 %v4178_v26 }
 0x6aa   :  { %v2659_v56 = vpop.f32.mrb[22].mxu1 }
 0x6ab   :  { %v2661_v57 = vpop.f32.mrb[23].mxu1 }
 0x6b2   :  { %v2488_v58 = vpop.f32.mrb[26].mxu0 }
 0x6b3   :  { %v2492_v30 = vadd.f32 %v2488_v58, %v5814_v13  ;;  %v2490_v9 = vpop.f32.mrb[27].mxu0  ;;  %v2857_v13 = vld [vmem:[%s6022_s9 + $0x68] sm:$0xff] }
 0x6b4   :  { %v3972_v20 = vpack.c.bf16 %v2857_v13, %v2856_v17 }
 0x6b5   :  { %v2663_v63 = vadd.f32 %v2659_v56, %v2492_v30 }
 0x6b6   :  { %3973 = vmatpush3.bf16.msra.mxu1 %v3972_v20 }
 0x6b7   :  { %3477 = vmatprep.subr.mxu1 %v4177_v7 }
 0x6ba   :  { %v2735_v1 = vpop.f32.mrb[28].mxu0  ;;  %3478 = vmatpush3.msra.mxu1 %v2858_v19 }
 0x6bb   :  { %v2737_v5 = vpop.f32.mrb[29].mxu0 }
 0x6bc   :  { %3414 = vmatprep.mubr.msk.f32.mxu0 %vm80_vm0, %v2737_v5 }
 0x6bd   :  { %2829 = vmatmul.mubr.f32.vlgmr.msra.gmra.mrb[30].mxu0 %v2735_v1 }
 0x6be   :  { %3504 = vmatprep.mubr.msk.f32.mxu0 %vm4179_vm7, %v4177_v7  ;;  %3976 = vmatpush3.bf16.msra.mxu0 %v3975_v27 }
 0x6bf   :  { %3977 = vmatprep.subr.bf16.mxu0 %v4178_v26 }
 0x6c2   :  { %3979 = vmatpush3.bf16.msra.mxu0 %v3978_v33 }
 0x6c3   :  { %3980 = vmatprep.subr.bf16.mxu0 %v4178_v26 }
 0x6c6   :  { %3982 = vmatpush3.bf16.msra.mxu0 %v3981_v6 }
 0x6c7   :  { %3983 = vmatprep.subr.bf16.mxu0 %v4178_v26 }
 0x6ca   :  { %3985 = vmatpush3.bf16.msra.mxu0 %v3984_v0 }
 0x6cb   :  { %3986 = vmatprep.subr.bf16.mxu0 %v4178_v26 }
 0x6ce   :  { %3988 = vmatpush3.bf16.msra.mxu0 %v3987_v60 }
 0x6cf   :  { %3502 = vmatprep.subr.mxu0 %v4177_v7  ;;  %v3418_v7 = vld [vmem:[%s6025_s12] ss:$0 sm:$0xff] }
 0x6d2   :  { %3503 = vmatpush3.msk.msra.mxu0 %vm1828_vm6, %v2951_v42 }
 0x790   :  { %v2830_v31 = vpop.f32.mrb[30].mxu0 }
 0x791   :  { %v2834_v39 = vadd.f32 %v2830_v31, %v2663_v63  ;;  %v2832_v62 = vpop.f32.mrb[31].mxu0 }
 0x793   :  { %v2842_v8 = vadd.f32 %v3415_v59, %v2834_v39 }
 0x795   :  { %4149 = vtanh.f32 %v2842_v8 }
 0x79f   :  { %v4150_v36 = vpop.eup %4149 }
 0x7a0   :  { %3480 = vmatmul.mubr.msk.f32.vlgmr.msra.gmra.mrb[24].mxu1 %vm2866_vm8, %v4150_v36 }
 0x873   :  { %v2936_v32 = vpop.f32.mrb[24].mxu1 }
 0x874   :  { %v2937_v3 = vadd.f32 %v3416_v29, %v2936_v32  ;;  %v3481_v35 = vpop.f32.mrb[25].mxu1 }
 0x876   :  { %4151 = vtanh.f32 %v2937_v3 }
 0x880   :  { %v4152_v10 = vpop.eup %4151 }
 0x881   :  { %3505 = vmatmul.mubr.msk.f32.vlgmr.msra.gmra.mrb[32].mxu0 %vm2959_vm9, %v4152_v10 }
 0x954   :  { %v3032_v26 = vpop.f32.mrb[32].mxu0 }
 0x955   :  { %v3033_v61 = vadd.f32 %v3418_v7, %v3032_v26  ;;  %v3506_v4 = vpop.f32.mrb[33].mxu0 }
 0x957   :  { %3036 = vst [vmem:[#allocation3] sm:$0x3] %v3033_v61 }
 0x958   :  { %4164 = shalt.err (!%p4161_p4)
}
 0x959   :  { %s4165_s25 = scalar_lea.hbm %s6026_s13, 32 }
 0x95a   :  { %p4166_p5 = scmp.ne.s32.totalorder %s6026_s13, %s4165_s25  ;;  %p4169_p6 = scmp.lt.u32.totalorder %s4165_s25, %s6026_s13 }
 0x95c   :  { %p4171_p7 = pnand %p4169_p6, %p4166_p5 }
 0x95e   :  { %4174 = shalt.err (!%p4171_p7)
}
 0x95f   :  { %3046 = dma.vmem_to_hbm [thread:$0]  %s3044_s3, 32, %s6026_s13, [#allocation4]  }
 0x960   :  { %4175 = dma.done.wait [#allocation4], 32  }
 0x961   :  { %4176 = vsyncadd [#allocation4], 4294967264 }
 0x962   :  { %3050 = vsyncpa [#allocation4], 1 }

</bundles_post_ra>
